<compile_context>
chip_gen: v7x
topology: tpu7x:2x2x1
jax: 0.10.0
libtpu: 0.0.40
codegen_flags: <defaults>
</compile_context>

<pallas_src>
import jax
import jax.numpy as jnp
from jax import lax
from jax.experimental import pallas as pl
from jax.experimental.pallas import tpu as pltpu


def _convgru_kernel(cp_ref, w1_ref, w2_ref, b_ref, out_ref, rh_pad_ref):
    # cp_ref : (1, H+2, W+2, C)  zero-padded concat([x, h_prev]),  C = Cin + Ch
    # w1_ref : (9*C, 3*Ch)       fused im2col weights for [z | r | o(x-part)]
    # w2_ref : (9*Ch, Ch)        im2col weights for the o-gate h-part (on r*h)
    # b_ref  : (1, 3*Ch)         fused bias [b_z | b_r | b_o]
    # out_ref: (1, H, W, Ch)     new hidden state
    # rh_pad_ref: VMEM scratch (H+2, W+2, Ch) holding zero-padded r*h_prev
    H = out_ref.shape[1]
    W = out_ref.shape[2]
    Ch = out_ref.shape[3]
    C = cp_ref.shape[3]
    Cin = C - Ch
    HW = H * W

    # ---- pass 1: one fused matmul for all three gate convolutions ----------
    # im2col: 9 shifted (H, W, C) windows of the padded input, flattened and
    # concatenated along the contraction axis -> (H*W, 9*C).
    taps = []
    for ky in range(3):
        for kx in range(3):
            taps.append(cp_ref[0, ky:ky + H, kx:kx + W, :].reshape(HW, C))
    a1 = jnp.concatenate(taps, axis=1)                          # (HW, 9*C)

    acc1 = jnp.dot(a1, w1_ref[...], preferred_element_type=jnp.float32)
    acc1 = acc1 + b_ref[...]                                    # (HW, 3*Ch)

    z = jax.nn.sigmoid(acc1[:, 0:Ch])
    r = jax.nn.sigmoid(acc1[:, Ch:2 * Ch])
    o_x = acc1[:, 2 * Ch:3 * Ch]          # x-part of the out gate (incl. b_o)

    # Previous hidden state = h channels of the centre tap, already on-chip.
    h = a1[:, 4 * C + Cin:5 * C]                                # (HW, Ch)
    rh = r * h

    # ---- pass 2: candidate-gate conv over zero-padded r*h ------------------
    # Zero only the 1-pixel border of the scratch (no full memset); the
    # interior is fully overwritten below.
    zrow = jnp.zeros((1, W + 2, Ch), jnp.float32)
    zcol = jnp.zeros((H + 2, 1, Ch), jnp.float32)
    rh_pad_ref[0:1, :, :] = zrow
    rh_pad_ref[H + 1:H + 2, :, :] = zrow
    rh_pad_ref[:, 0:1, :] = zcol
    rh_pad_ref[:, W + 1:W + 2, :] = zcol
    rh_pad_ref[1:1 + H, 1:1 + W, :] = rh.reshape(H, W, Ch)

    taps2 = []
    for ky in range(3):
        for kx in range(3):
            taps2.append(rh_pad_ref[ky:ky + H, kx:kx + W, :].reshape(HW, Ch))
    a2 = jnp.concatenate(taps2, axis=1)                         # (HW, 9*Ch)

    acc2 = jnp.dot(a2, w2_ref[...], preferred_element_type=jnp.float32)

    h_cand = jnp.tanh(o_x + acc2)
    h_new = (1.0 - z) * h + z * h_cand
    out_ref[...] = h_new.reshape(1, H, W, Ch).astype(out_ref.dtype)


def convgru_cell_pallas(x, h_prev, w_z, w_r, w_o, b_z, b_r, b_o):
    """ConvGRU cell forward (NHWC activations, HWIO conv weights).

    x      : (B, H, W, Cin)
    h_prev : (B, H, W, Ch) or None
    w_*    : (3, 3, Cin+Ch, Ch)   update / reset / out gate conv weights
    b_*    : (Ch,)
    returns: (B, H, W, Ch) new hidden state (dtype follows x)
    """
    B, H, W, Cin = x.shape
    Ch = w_z.shape[-1]
    if h_prev is None:
        # Explicit hidden shape (does NOT silently require Ch == Cin).
        h_prev = jnp.zeros((B, H, W, Ch), x.dtype)
    C = Cin + Ch
    assert w_z.shape == (3, 3, C, Ch) and w_r.shape == w_z.shape == w_o.shape
    # TODO(synk): kernel_size is fixed at 3 (module default); generalize taps.

    # Fused, zero-padded activation input: concat([x, h_prev]) once, pad once.
    cp = jnp.pad(jnp.concatenate([x, h_prev], axis=-1),
                 ((0, 0), (1, 1), (1, 1), (0, 0)))

    # Fused 2D im2col weight slabs (wrapper-side layout plumbing):
    #   w1 rows = (ky, kx, c) of the padded combined input, cols = [z | r | o],
    #      where the o block keeps only the x-part (h rows zeroed),
    #   w2 rows = (ky, kx, c_h), cols = o-gate h-part (applied to r*h).
    w_o_x = jnp.concatenate(
        [w_o[:, :, :Cin, :], jnp.zeros((3, 3, Ch, Ch), w_o.dtype)], axis=2)
    w1 = jnp.concatenate([w_z, w_r, w_o_x], axis=-1).reshape(9 * C, 3 * Ch)
    w2 = w_o[:, :, Cin:, :].reshape(9 * Ch, Ch)
    bias = jnp.concatenate([b_z, b_r, b_o]).reshape(1, 3 * Ch)

    # TODO(synk): for large H/W on v7x (64 MiB VMEM), add a spatially tiled
    # grid axis with a 1-row halo (and/or bf16 inputs) instead of whole-image
    # blocks; at these shapes whole-image blocks fit comfortably.
    return pl.pallas_call(
        _convgru_kernel,
        out_shape=jax.ShapeDtypeStruct((B, H, W, Ch), x.dtype),
        grid_spec=pltpu.PrefetchScalarGridSpec(
            num_scalar_prefetch=0,
            grid=(B,),
            in_specs=[
                pl.BlockSpec((1, H + 2, W + 2, C), lambda bi: (bi, 0, 0, 0)),
                pl.BlockSpec((9 * C, 3 * Ch), lambda bi: (0, 0)),
                pl.BlockSpec((9 * Ch, Ch), lambda bi: (0, 0)),
                pl.BlockSpec((1, 3 * Ch), lambda bi: (0, 0)),
            ],
            out_specs=pl.BlockSpec((1, H, W, Ch), lambda bi: (bi, 0, 0, 0)),
            scratch_shapes=[pltpu.VMEM((H + 2, W + 2, Ch), jnp.float32)],
        ),
        compiler_params=pltpu.CompilerParams(
            # Batch axis is parallel: Mosaic may shard it across the two
            # TensorCores on v7x; it is a no-op on single-core v5e/v6e.
            dimension_semantics=("parallel",),
            vmem_limit_bytes=32 * 1024 * 1024,
        ),
    )(cp, w1, w2, bias)


def convgru_cell_ref(x, h_prev, w_z, w_r, w_o, b_z, b_r, b_o):
    """Pure-JAX reference (NHWC, HWIO weights), mirrors the PyTorch forward."""
    def conv(inp, w, b):
        y = lax.conv_general_dilated(
            inp, w, window_strides=(1, 1), padding="SAME",
            dimension_numbers=("NHWC", "HWIO", "NHWC"))
        return y + b
    combined = jnp.concatenate([x, h_prev], axis=-1)
    z = jax.nn.sigmoid(conv(combined, w_z, b_z))
    r = jax.nn.sigmoid(conv(combined, w_r, b_r))
    h_cand = jnp.tanh(conv(jnp.concatenate([x, r * h_prev], axis=-1), w_o, b_o))
    return (1.0 - z) * h_prev + z * h_cand


if __name__ == "__main__":
    # Small shapes consistent with the module: batch=2, input_dim=4,
    # hidden_dim=8, spatial=16x16, kernel_size=3 (NCHW x would be (2,4,16,16)).
    B, H, W, Cin, Ch, K = 2, 16, 16, 4, 8, 3

    key = jax.random.PRNGKey(0)
    kx_, kh_, kwz, kwr, kwo, kbz, kbr, kbo = jax.random.split(key, 8)

    x = jax.random.normal(kx_, (B, H, W, Cin), jnp.float32)
    h_prev = jax.random.normal(kh_, (B, H, W, Ch), jnp.float32)

    # Deterministic Conv2d-like init, generated directly in HWIO layout.
    fan_in = (Cin + Ch) * K * K
    scale = 1.0 / (fan_in ** 0.5)
    w_z = jax.random.uniform(kwz, (K, K, Cin + Ch, Ch), jnp.float32, -scale, scale)
    w_r = jax.random.uniform(kwr, (K, K, Cin + Ch, Ch), jnp.float32, -scale, scale)
    w_o = jax.random.uniform(kwo, (K, K, Cin + Ch, Ch), jnp.float32, -scale, scale)
    b_z = jax.random.uniform(kbz, (Ch,), jnp.float32, -scale, scale)
    b_r = jax.random.uniform(kbr, (Ch,), jnp.float32, -scale, scale)
    b_o = jax.random.uniform(kbo, (Ch,), jnp.float32, -scale, scale)

    h_new = convgru_cell_pallas(x, h_prev, w_z, w_r, w_o, b_z, b_r, b_o)
    h_new = jax.block_until_ready(h_new)

    h_ref = convgru_cell_ref(x, h_prev, w_z, w_r, w_o, b_z, b_r, b_o)
    assert h_new.shape == (B, H, W, Ch)
    err = float(jnp.max(jnp.abs(h_new - h_ref)))
    assert jnp.allclose(h_new, h_ref, atol=2e-4, rtol=2e-4), err

    print("KERNEL_OK")
</pallas_src>

<mosaic_0001>
module attributes {stable_mosaic.version = 11 : i64} {
  func.func @_convgru_kernel(%arg0: i32, %arg1: memref<1x18x18x12xf32, #tpu.memory_space<vmem>>, %arg2: memref<108x24xf32, #tpu.memory_space<vmem>>, %arg3: memref<72x8xf32, #tpu.memory_space<vmem>>, %arg4: memref<1x24xf32, #tpu.memory_space<vmem>>, %arg5: memref<1x16x16x8xf32, #tpu.memory_space<vmem>>, %arg6: memref<18x18x8xf32, #tpu.memory_space<vmem>>) attributes {dimension_semantics = [#tpu.dimension_semantics<parallel>], iteration_bounds = array<i64: 2>, scalar_prefetch = 0 : i64, scratch_operands = 1 : i64, tpu.core_type = #tpu.core_type<tc>, window_params = [{transform_indices = @transform_0, window_bounds = array<i64: 1, 18, 18, 12>}, {pipeline_mode = #tpu.pipeline_mode<synchronous>, transform_indices = @transform_1, window_bounds = array<i64: 108, 24>}, {pipeline_mode = #tpu.pipeline_mode<synchronous>, transform_indices = @transform_2, window_bounds = array<i64: 72, 8>}, {pipeline_mode = #tpu.pipeline_mode<synchronous>, transform_indices = @transform_3, window_bounds = array<i64: 1, 24>}, {transform_indices = @transform_4, window_bounds = array<i64: 1, 16, 16, 8>}]} {
    %c0 = arith.constant 0 : index
    %c0_0 = arith.constant 0 : index
    %c0_1 = arith.constant 0 : index
    %c0_2 = arith.constant 0 : index
    %0 = vector.load %arg1[%c0, %c0_0, %c0_1, %c0_2] : memref<1x18x18x12xf32, #tpu.memory_space<vmem>>, vector<1x16x16x12xf32>
    %1 = vector.shape_cast %0 : vector<1x16x16x12xf32> to vector<16x16x12xf32>
    %2 = vector.shape_cast %1 : vector<16x16x12xf32> to vector<256x12xf32>
    %c0_3 = arith.constant 0 : index
    %c0_4 = arith.constant 0 : index
    %c1 = arith.constant 1 : index
    %c0_5 = arith.constant 0 : index
    %3 = vector.load %arg1[%c0_3, %c0_4, %c1, %c0_5] : memref<1x18x18x12xf32, #tpu.memory_space<vmem>>, vector<1x16x16x12xf32>
    %4 = vector.shape_cast %3 : vector<1x16x16x12xf32> to vector<16x16x12xf32>
    %5 = vector.shape_cast %4 : vector<16x16x12xf32> to vector<256x12xf32>
    %c0_6 = arith.constant 0 : index
    %c0_7 = arith.constant 0 : index
    %c2 = arith.constant 2 : index
    %c0_8 = arith.constant 0 : index
    %6 = vector.load %arg1[%c0_6, %c0_7, %c2, %c0_8] : memref<1x18x18x12xf32, #tpu.memory_space<vmem>>, vector<1x16x16x12xf32>
    %7 = vector.shape_cast %6 : vector<1x16x16x12xf32> to vector<16x16x12xf32>
    %8 = vector.shape_cast %7 : vector<16x16x12xf32> to vector<256x12xf32>
    %c0_9 = arith.constant 0 : index
    %c1_10 = arith.constant 1 : index
    %c0_11 = arith.constant 0 : index
    %c0_12 = arith.constant 0 : index
    %9 = vector.load %arg1[%c0_9, %c1_10, %c0_11, %c0_12] : memref<1x18x18x12xf32, #tpu.memory_space<vmem>>, vector<1x16x16x12xf32>
    %10 = vector.shape_cast %9 : vector<1x16x16x12xf32> to vector<16x16x12xf32>
    %11 = vector.shape_cast %10 : vector<16x16x12xf32> to vector<256x12xf32>
    %c0_13 = arith.constant 0 : index
    %c1_14 = arith.constant 1 : index
    %c1_15 = arith.constant 1 : index
    %c0_16 = arith.constant 0 : index
    %12 = vector.load %arg1[%c0_13, %c1_14, %c1_15, %c0_16] : memref<1x18x18x12xf32, #tpu.memory_space<vmem>>, vector<1x16x16x12xf32>
    %13 = vector.shape_cast %12 : vector<1x16x16x12xf32> to vector<16x16x12xf32>
    %14 = vector.shape_cast %13 : vector<16x16x12xf32> to vector<256x12xf32>
    %c0_17 = arith.constant 0 : index
    %c1_18 = arith.constant 1 : index
    %c2_19 = arith.constant 2 : index
    %c0_20 = arith.constant 0 : index
    %15 = vector.load %arg1[%c0_17, %c1_18, %c2_19, %c0_20] : memref<1x18x18x12xf32, #tpu.memory_space<vmem>>, vector<1x16x16x12xf32>
    %16 = vector.shape_cast %15 : vector<1x16x16x12xf32> to vector<16x16x12xf32>
    %17 = vector.shape_cast %16 : vector<16x16x12xf32> to vector<256x12xf32>
    %c0_21 = arith.constant 0 : index
    %c2_22 = arith.constant 2 : index
    %c0_23 = arith.constant 0 : index
    %c0_24 = arith.constant 0 : index
    %18 = vector.load %arg1[%c0_21, %c2_22, %c0_23, %c0_24] : memref<1x18x18x12xf32, #tpu.memory_space<vmem>>, vector<1x16x16x12xf32>
    %19 = vector.shape_cast %18 : vector<1x16x16x12xf32> to vector<16x16x12xf32>
    %20 = vector.shape_cast %19 : vector<16x16x12xf32> to vector<256x12xf32>
    %c0_25 = arith.constant 0 : index
    %c2_26 = arith.constant 2 : index
    %c1_27 = arith.constant 1 : index
    %c0_28 = arith.constant 0 : index
    %21 = vector.load %arg1[%c0_25, %c2_26, %c1_27, %c0_28] : memref<1x18x18x12xf32, #tpu.memory_space<vmem>>, vector<1x16x16x12xf32>
    %22 = vector.shape_cast %21 : vector<1x16x16x12xf32> to vector<16x16x12xf32>
    %23 = vector.shape_cast %22 : vector<16x16x12xf32> to vector<256x12xf32>
    %c0_29 = arith.constant 0 : index
    %c2_30 = arith.constant 2 : index
    %c2_31 = arith.constant 2 : index
    %c0_32 = arith.constant 0 : index
    %24 = vector.load %arg1[%c0_29, %c2_30, %c2_31, %c0_32] : memref<1x18x18x12xf32, #tpu.memory_space<vmem>>, vector<1x16x16x12xf32>
    %25 = vector.shape_cast %24 : vector<1x16x16x12xf32> to vector<16x16x12xf32>
    %26 = vector.shape_cast %25 : vector<16x16x12xf32> to vector<256x12xf32>
    %27 = tpu.concatenate %2, %5, %8, %11, %14, %17, %20, %23, %26 in 1 : vector<256x12xf32>, vector<256x12xf32>, vector<256x12xf32>, vector<256x12xf32>, vector<256x12xf32>, vector<256x12xf32>, vector<256x12xf32>, vector<256x12xf32>, vector<256x12xf32> -> vector<256x108xf32>
    %c0_33 = arith.constant 0 : index
    %c0_34 = arith.constant 0 : index
    %28 = vector.load %arg2[%c0_33, %c0_34] : memref<108x24xf32, #tpu.memory_space<vmem>>, vector<108x24xf32>
    %cst = arith.constant dense<0.000000e+00> : vector<256x24xf32>
    %29 = tpu.matmul %27, %28, %cst {dimension_numbers = #tpu.dot_dimension_numbers<[1], [0], [0], [1], [0, 0, 1, 1], [], []>} : vector<256x108xf32>, vector<108x24xf32>, vector<256x24xf32> -> vector<256x24xf32>
    %c0_35 = arith.constant 0 : index
    %c0_36 = arith.constant 0 : index
    %30 = vector.load %arg4[%c0_35, %c0_36] : memref<1x24xf32, #tpu.memory_space<vmem>>, vector<1x24xf32>
    %31 = vector.broadcast %30 : vector<1x24xf32> to vector<256x24xf32>
    %32 = arith.addf %29, %31 : vector<256x24xf32>
    %33 = vector.extract_strided_slice %32 {offsets = [0, 0], sizes = [256, 8], strides = [1, 1]} : vector<256x24xf32> to vector<256x8xf32>
    %34 = arith.negf %33 : vector<256x8xf32>
    %35 = math.exp %34 : vector<256x8xf32>
    %cst_37 = arith.constant 1.000000e+00 : f32
    %36 = vector.broadcast %cst_37 : f32 to vector<256x8xf32>
    %37 = arith.addf %36, %35 : vector<256x8xf32>
    %38 = arith.divf %36, %37 : vector<256x8xf32>
    %39 = vector.extract_strided_slice %32 {offsets = [0, 8], sizes = [256, 8], strides = [1, 1]} : vector<256x24xf32> to vector<256x8xf32>
    %40 = arith.negf %39 : vector<256x8xf32>
    %41 = math.exp %40 : vector<256x8xf32>
    %cst_38 = arith.constant 1.000000e+00 : f32
    %42 = vector.broadcast %cst_38 : f32 to vector<256x8xf32>
    %43 = arith.addf %42, %41 : vector<256x8xf32>
    %44 = arith.divf %42, %43 : vector<256x8xf32>
    %45 = vector.extract_strided_slice %32 {offsets = [0, 16], sizes = [256, 8], strides = [1, 1]} : vector<256x24xf32> to vector<256x8xf32>
    %46 = vector.extract_strided_slice %27 {offsets = [0, 52], sizes = [256, 8], strides = [1, 1]} : vector<256x108xf32> to vector<256x8xf32>
    %47 = arith.mulf %44, %46 : vector<256x8xf32>
    %cst_39 = arith.constant 0.000000e+00 : f32
    %48 = vector.broadcast %cst_39 : f32 to vector<1x18x8xf32>
    %cst_40 = arith.constant 0.000000e+00 : f32
    %49 = vector.broadcast %cst_40 : f32 to vector<18x1x8xf32>
    %c0_41 = arith.constant 0 : index
    %c0_42 = arith.constant 0 : index
    %c0_43 = arith.constant 0 : index
    %50 = vector.load %arg6[%c0_41, %c0_42, %c0_43] : memref<18x18x8xf32, #tpu.memory_space<vmem>>, vector<1x18x8xf32>
    tpu.vector_store %arg6[%c0_41, %c0_42, %c0_43], %48 {strides = array<i32>} : memref<18x18x8xf32, #tpu.memory_space<vmem>>, vector<1x18x8xf32>,
    %c17 = arith.constant 17 : index
    %c0_44 = arith.constant 0 : index
    %c0_45 = arith.constant 0 : index
    %51 = vector.load %arg6[%c17, %c0_44, %c0_45] : memref<18x18x8xf32, #tpu.memory_space<vmem>>, vector<1x18x8xf32>
    tpu.vector_store %arg6[%c17, %c0_44, %c0_45], %48 {strides = array<i32>} : memref<18x18x8xf32, #tpu.memory_space<vmem>>, vector<1x18x8xf32>,
    %c0_46 = arith.constant 0 : index
    %c0_47 = arith.constant 0 : index
    %c0_48 = arith.constant 0 : index
    %52 = vector.load %arg6[%c0_46, %c0_47, %c0_48] : memref<18x18x8xf32, #tpu.memory_space<vmem>>, vector<18x1x8xf32>
    tpu.vector_store %arg6[%c0_46, %c0_47, %c0_48], %49 {strides = array<i32>} : memref<18x18x8xf32, #tpu.memory_space<vmem>>, vector<18x1x8xf32>,
    %c0_49 = arith.constant 0 : index
    %c17_50 = arith.constant 17 : index
    %c0_51 = arith.constant 0 : index
    %53 = vector.load %arg6[%c0_49, %c17_50, %c0_51] : memref<18x18x8xf32, #tpu.memory_space<vmem>>, vector<18x1x8xf32>
    tpu.vector_store %arg6[%c0_49, %c17_50, %c0_51], %49 {strides = array<i32>} : memref<18x18x8xf32, #tpu.memory_space<vmem>>, vector<18x1x8xf32>,
    %54 = vector.shape_cast %47 : vector<256x8xf32> to vector<16x16x8xf32>
    %c1_52 = arith.constant 1 : index
    %c1_53 = arith.constant 1 : index
    %c0_54 = arith.constant 0 : index
    %55 = vector.load %arg6[%c1_52, %c1_53, %c0_54] : memref<18x18x8xf32, #tpu.memory_space<vmem>>, vector<16x16x8xf32>
    tpu.vector_store %arg6[%c1_52, %c1_53, %c0_54], %54 {strides = array<i32>} : memref<18x18x8xf32, #tpu.memory_space<vmem>>, vector<16x16x8xf32>,
    %c0_55 = arith.constant 0 : index
    %c0_56 = arith.constant 0 : index
    %c0_57 = arith.constant 0 : index
    %56 = vector.load %arg6[%c0_55, %c0_56, %c0_57] : memref<18x18x8xf32, #tpu.memory_space<vmem>>, vector<16x16x8xf32>
    %57 = vector.shape_cast %56 : vector<16x16x8xf32> to vector<256x8xf32>
    %c0_58 = arith.constant 0 : index
    %c1_59 = arith.constant 1 : index
    %c0_60 = arith.constant 0 : index
    %58 = vector.load %arg6[%c0_58, %c1_59, %c0_60] : memref<18x18x8xf32, #tpu.memory_space<vmem>>, vector<16x16x8xf32>
    %59 = vector.shape_cast %58 : vector<16x16x8xf32> to vector<256x8xf32>
    %c0_61 = arith.constant 0 : index
    %c2_62 = arith.constant 2 : index
    %c0_63 = arith.constant 0 : index
    %60 = vector.load %arg6[%c0_61, %c2_62, %c0_63] : memref<18x18x8xf32, #tpu.memory_space<vmem>>, vector<16x16x8xf32>
    %61 = vector.shape_cast %60 : vector<16x16x8xf32> to vector<256x8xf32>
    %c1_64 = arith.constant 1 : index
    %c0_65 = arith.constant 0 : index
    %c0_66 = arith.constant 0 : index
    %62 = vector.load %arg6[%c1_64, %c0_65, %c0_66] : memref<18x18x8xf32, #tpu.memory_space<vmem>>, vector<16x16x8xf32>
    %63 = vector.shape_cast %62 : vector<16x16x8xf32> to vector<256x8xf32>
    %c1_67 = arith.constant 1 : index
    %c1_68 = arith.constant 1 : index
    %c0_69 = arith.constant 0 : index
    %64 = vector.load %arg6[%c1_67, %c1_68, %c0_69] : memref<18x18x8xf32, #tpu.memory_space<vmem>>, vector<16x16x8xf32>
    %65 = vector.shape_cast %64 : vector<16x16x8xf32> to vector<256x8xf32>
    %c1_70 = arith.constant 1 : index
    %c2_71 = arith.constant 2 : index
    %c0_72 = arith.constant 0 : index
    %66 = vector.load %arg6[%c1_70, %c2_71, %c0_72] : memref<18x18x8xf32, #tpu.memory_space<vmem>>, vector<16x16x8xf32>
    %67 = vector.shape_cast %66 : vector<16x16x8xf32> to vector<256x8xf32>
    %c2_73 = arith.constant 2 : index
    %c0_74 = arith.constant 0 : index
    %c0_75 = arith.constant 0 : index
    %68 = vector.load %arg6[%c2_73, %c0_74, %c0_75] : memref<18x18x8xf32, #tpu.memory_space<vmem>>, vector<16x16x8xf32>
    %69 = vector.shape_cast %68 : vector<16x16x8xf32> to vector<256x8xf32>
    %c2_76 = arith.constant 2 : index
    %c1_77 = arith.constant 1 : index
    %c0_78 = arith.constant 0 : index
    %70 = vector.load %arg6[%c2_76, %c1_77, %c0_78] : memref<18x18x8xf32, #tpu.memory_space<vmem>>, vector<16x16x8xf32>
    %71 = vector.shape_cast %70 : vector<16x16x8xf32> to vector<256x8xf32>
    %c2_79 = arith.constant 2 : index
    %c2_80 = arith.constant 2 : index
    %c0_81 = arith.constant 0 : index
    %72 = vector.load %arg6[%c2_79, %c2_80, %c0_81] : memref<18x18x8xf32, #tpu.memory_space<vmem>>, vector<16x16x8xf32>
    %73 = vector.shape_cast %72 : vector<16x16x8xf32> to vector<256x8xf32>
    %74 = tpu.concatenate %57, %59, %61, %63, %65, %67, %69, %71, %73 in 1 : vector<256x8xf32>, vector<256x8xf32>, vector<256x8xf32>, vector<256x8xf32>, vector<256x8xf32>, vector<256x8xf32>, vector<256x8xf32>, vector<256x8xf32>, vector<256x8xf32> -> vector<256x72xf32>
    %c0_82 = arith.constant 0 : index
    %c0_83 = arith.constant 0 : index
    %75 = vector.load %arg3[%c0_82, %c0_83] : memref<72x8xf32, #tpu.memory_space<vmem>>, vector<72x8xf32>
    %cst_84 = arith.constant dense<0.000000e+00> : vector<256x8xf32>
    %76 = tpu.matmul %74, %75, %cst_84 {dimension_numbers = #tpu.dot_dimension_numbers<[1], [0], [0], [1], [0, 0, 1, 1], [], []>} : vector<256x72xf32>, vector<72x8xf32>, vector<256x8xf32> -> vector<256x8xf32>
    %77 = arith.addf %45, %76 : vector<256x8xf32>
    %78 = math.tanh %77 : vector<256x8xf32>
    %cst_85 = arith.constant 1.000000e+00 : f32
    %79 = vector.broadcast %cst_85 : f32 to vector<256x8xf32>
    %80 = arith.subf %79, %38 : vector<256x8xf32>
    %81 = arith.mulf %80, %46 : vector<256x8xf32>
    %82 = arith.mulf %38, %78 : vector<256x8xf32>
    %83 = arith.addf %81, %82 : vector<256x8xf32>
    %84 = vector.shape_cast %83 : vector<256x8xf32> to vector<1x16x16x8xf32>
    %c0_86 = arith.constant 0 : index
    %c0_87 = arith.constant 0 : index
    %c0_88 = arith.constant 0 : index
    %c0_89 = arith.constant 0 : index
    %85 = vector.load %arg5[%c0_86, %c0_87, %c0_88, %c0_89] : memref<1x16x16x8xf32, #tpu.memory_space<vmem>>, vector<1x16x16x8xf32>
    tpu.vector_store %arg5[%c0_86, %c0_87, %c0_88, %c0_89], %84 {strides = array<i32>} : memref<1x16x16x8xf32, #tpu.memory_space<vmem>>, vector<1x16x16x8xf32>,
    return
  }
  func.func @transform_0(%arg0: i32) -> (i32, i32, i32, i32) {
    %c0_i32 = arith.constant 0 : i32
    %c0_i32_0 = arith.constant 0 : i32
    %c0_i32_1 = arith.constant 0 : i32
    %c0_i32_2 = arith.constant 0 : i32
    return %arg0, %c0_i32, %c0_i32_0, %c0_i32_1 : i32, i32, i32, i32
  }
  func.func @transform_1(%arg0: i32) -> (i32, i32) {
    %c0_i32 = arith.constant 0 : i32
    %c0_i32_0 = arith.constant 0 : i32
    %c0_i32_1 = arith.constant 0 : i32
    return %c0_i32, %c0_i32_0 : i32, i32
  }
  func.func @transform_2(%arg0: i32) -> (i32, i32) {
    %c0_i32 = arith.constant 0 : i32
    %c0_i32_0 = arith.constant 0 : i32
    %c0_i32_1 = arith.constant 0 : i32
    return %c0_i32, %c0_i32_0 : i32, i32
  }
  func.func @transform_3(%arg0: i32) -> (i32, i32) {
    %c0_i32 = arith.constant 0 : i32
    %c0_i32_0 = arith.constant 0 : i32
    %c0_i32_1 = arith.constant 0 : i32
    return %c0_i32, %c0_i32_0 : i32, i32
  }
  func.func @transform_4(%arg0: i32) -> (i32, i32, i32, i32) {
    %c0_i32 = arith.constant 0 : i32
    %c0_i32_0 = arith.constant 0 : i32
    %c0_i32_1 = arith.constant 0 : i32
    %c0_i32_2 = arith.constant 0 : i32
    return %arg0, %c0_i32, %c0_i32_0, %c0_i32_1 : i32, i32, i32, i32
  }
}

</mosaic_0001>

<bundles_post_ra>
// kernel: tpu_custom_call.1
= control target key start
LH: loop header
LB: loop body
LE: loop exit
PB: predicated region body
PF: predicated region fallthrough
CT: control target
= control target key end

     0   :  { %s6075_s15 = smov 0   ;;  %s10127_s0 = inlined_call_operand.vmem [shape: f32[2,18,18,12], index: 0, kind: input, shape index: {}]   ;;  %s10128_s1 = inlined_call_operand.vmem [shape: f32[108,24], index: 1, kind: input, shape index: {}]   ;;  %s10129_s2 = inlined_call_operand.vmem [shape: f32[72,8], index: 2, kind: input, shape index: {}]   ;;  %s10130_s3 = inlined_call_operand.vmem [shape: f32[1,24], index: 3, kind: input, shape index: {}]   ;;  %s10131_s4 = inlined_call_operand.vmem [shape: f32[2,16,16,8], index: 4, kind: output, shape index: {}]  }
   0x1 LB: > { %s5185_s16 = sadd.s32 4294967295, %s6029_s15   ;;  %p5189_p0 = scmp.ge.s32.totalorder %s6029_s15, 1  ;;  %s6029_s15 = sphi %s6075_s15, %s14_s15  }
   0x2   : > { %p162_p1 = scmp.lt.s32.totalorder %s6029_s15, 3 }
   0x4   : > { %p163_p2 = pnand %p5189_p0, %p162_p1 }
   0x6   : > { %166 = sbr.rel (%p163_p2) target bundleno = 2049 (0x801), region = 36 }
   0xd   : > { %p188_p3 = scmp.lt.s32.totalorder %s5185_s16, 1  ;;  %s6031_s21 = smov 12   ;;  %vm1894_vm0 = vcmask 1043456   ;;  %vm6038_vm1 = vmmov 1   ;;  %vm1512_vm3 = vcmask 97280   ;;  %vm1545_vm4 = vcmask 195584  }
   0xe   : > { %s6032_s22 = smov 24   ;;  %s6033_s23 = smov 36   ;;  %vm5740_vm2 = vmpackc.low %vm1894_vm0, %vm6038_vm1  ;;  %vm1578_vm5 = vcmask 293888   ;;  %vm1611_vm6 = vcmask 392192   ;;  %vm1644_vm7 = vcmask 490496   ;;  %vm1677_vm8 = vcmask 588800  }
   0xf   : > { %s11112_s16 = smov (!%p188_p3, %s5185_s16), 1  ;;  %s6034_s24 = smov 48   ;;  %vm1710_vm9 = vcmask 687104   ;;  %vm1743_vm10 = vcmask 785408   ;;  %vm1797_vm11 = vcmask 883712   ;;  %vm2443_vm12 = vcmask 64512  }
  0x10   : > { %s5761_s17 = smul.u32 432, %s11112_s16  ;;  %s6035_s25 = smov 60   ;;  %vm2446_vm13 = vcmask 58368   ;;  %vm2452_vm14 = vcmask 57344   ;;  %vm3995_vm15 = vcmask 130048   ;;  %vm4060_vm0 = vcmask 261120  }
  0x11   : > { %s6036_s26 = smov 72   ;;  %s6037_s27 = smov 84   ;;  %vm4093_vm1 = vcmask 326656  }
  0x12   : > { %s6089_s20 = scalar_lea.vmem %s10127_s0, %s5761_s17  ;;  %s6039_s10 = smov 96  }
  0x13   : > { %v6092_v0 = vld [vmem:[%s6089_s20 + $0x19] sm:$0xff]  ;;  %v230_v1 = vld [vmem:[%s6089_s20 + $0x1] sm:$0xff]  ;;  %v231_v3 = vld [vmem:[%s6089_s20 + $0x9] sm:$0xff]  ;;  %s6042_s12 = smov 8   ;;  %s6043_s13 = smov 16  }
  0x14   : > { %524 = vrot.lane.b32.xlu1 %v6092_v0, %s6031_s21  ;;  %520 = vrot.lane.b32.xlu0 %v230_v1, %s6031_s21  ;;  %v6099_v2 = vld [vmem:[%s6089_s20 + $0x21] sm:$0xff]  ;;  %v6106_v4 = vld [vmem:[%s6089_s20 + $0x39] sm:$0xff]  ;;  %s6044_s14 = smov 32  }
  0x15   : > { %v6109_v5 = vld [vmem:[%s6089_s20 + $0x31] sm:$0xff]  ;;  %v6119_v7 = vld [vmem:[%s6089_s20 + $0x49] sm:$0xff]  ;;  %v6129_v9 = vld [vmem:[%s6089_s20 + $0x61] sm:$0xff] }
  0x16   : > { %v6116_v6 = vld [vmem:[%s6089_s20 + $0x51] sm:$0xff]  ;;  %v6126_v8 = vld [vmem:[%s6089_s20 + $0x69] sm:$0xff]  ;;  %v6136_v10 = vld [vmem:[%s6089_s20 + $0x81] sm:$0xff] }
  0x17   : > { %v6139_v11 = vld [vmem:[%s6089_s20 + $0x79] sm:$0xff]  ;;  %v6149_v13 = vld [vmem:[%s6089_s20 + $0x91] sm:$0xff]  ;;  %v6159_v15 = vld [vmem:[%s6089_s20 + $0xa9] sm:$0xff] }
  0x18   : > { %526 = vrot.lane.b32.xlu1 %v6099_v2, %s6031_s21  ;;  %522 = vrot.lane.b32.xlu0 %v231_v3, %s6031_s21  ;;  %v6146_v12 = vld [vmem:[%s6089_s20 + $0x99] sm:$0xff]  ;;  %v6156_v14 = vld [vmem:[%s6089_s20 + $0xb1] sm:$0xff] }
  0x19   : > { %v6166_v16 = vld [vmem:[%s6089_s20 + $0xc9] sm:$0xff]  ;;  %v6169_v17 = vld [vmem:[%s6089_s20 + $0xc1] sm:$0xff]  ;;  %v6179_v19 = vld [vmem:[%s6089_s20 + $0xd9] sm:$0xff] }
  0x1a   : > { %v6176_v18 = vld [vmem:[%s6089_s20 + $0xe1] sm:$0xff]  ;;  %v6186_v20 = vld [vmem:[%s6089_s20 + $0xf9] sm:$0xff]  ;;  %v6189_v21 = vld [vmem:[%s6089_s20 + $0xf1] sm:$0xff] }
  0x1b   : > { %v6196_v22 = vld [vmem:[%s6089_s20 + $0x111] sm:$0xff]  ;;  %v6199_v23 = vld [vmem:[%s6089_s20 + $0x109] sm:$0xff]  ;;  %v6209_v25 = vld [vmem:[%s6089_s20 + $0x121] sm:$0xff] }
  0x1c   : > { %530 = vrot.lane.b32.xlu1 %v6106_v4, %s6031_s21  ;;  %528 = vrot.lane.b32.xlu0 %v6109_v5, %s6031_s21  ;;  %v6206_v24 = vld [vmem:[%s6089_s20 + $0x129] sm:$0xff]  ;;  %v6216_v26 = vld [vmem:[%s6089_s20 + $0x141] sm:$0xff] }
  0x1d   : > { %v6219_v27 = vld [vmem:[%s6089_s20 + $0x139] sm:$0xff]  ;;  %v6229_v29 = vld [vmem:[%s6089_s20 + $0x151] sm:$0xff]  ;;  %v6239_v31 = vld [vmem:[%s6089_s20 + $0x169] sm:$0xff] }
  0x1e   : > { %v6226_v28 = vld [vmem:[%s6089_s20 + $0x159] sm:$0xff]  ;;  %v6236_v30 = vld [vmem:[%s6089_s20 + $0x171] sm:$0xff]  ;;  %v262_v33 = vld [vmem:[%s6089_s20 + $0x2] sm:$0xff] }
  0x1f   : > { %v263_v32 = vld [vmem:[%s6089_s20 + $0xa] sm:$0xff]  ;;  %v6250_v34 = vld [vmem:[%s6089_s20 + $0x22] sm:$0xff]  ;;  %v6253_v35 = vld [vmem:[%s6089_s20 + $0x1a] sm:$0xff] }
  0x20   : > { %534 = vrot.lane.b32.xlu1 %v6116_v6, %s6031_s21  ;;  %532 = vrot.lane.b32.xlu0 %v6119_v7, %s6031_s21  ;;  %v6260_v36 = vld [vmem:[%s6089_s20 + $0x3a] sm:$0xff]  ;;  %v6263_v37 = vld [vmem:[%s6089_s20 + $0x32] sm:$0xff] }
  0x21   : > { %v6270_v38 = vld [vmem:[%s6089_s20 + $0x52] sm:$0xff]  ;;  %v6273_v39 = vld [vmem:[%s6089_s20 + $0x4a] sm:$0xff]  ;;  %v6283_v41 = vld [vmem:[%s6089_s20 + $0x62] sm:$0xff] }
  0x22   : > { %v6280_v40 = vld [vmem:[%s6089_s20 + $0x6a] sm:$0xff]  ;;  %v6290_v42 = vld [vmem:[%s6089_s20 + $0x82] sm:$0xff]  ;;  %v6293_v43 = vld [vmem:[%s6089_s20 + $0x7a] sm:$0xff] }
  0x23   : > { %v6300_v44 = vld [vmem:[%s6089_s20 + $0x9a] sm:$0xff]  ;;  %v6303_v45 = vld [vmem:[%s6089_s20 + $0x92] sm:$0xff]  ;;  %v6313_v47 = vld [vmem:[%s6089_s20 + $0xaa] sm:$0xff] }
  0x24   : > { %538 = vrot.lane.b32.xlu1 %v6126_v8, %s6031_s21  ;;  %536 = vrot.lane.b32.xlu0 %v6129_v9, %s6031_s21  ;;  %v6310_v46 = vld [vmem:[%s6089_s20 + $0xb2] sm:$0xff]  ;;  %v6320_v48 = vld [vmem:[%s6089_s20 + $0xca] sm:$0xff] }
  0x25   : > { %v6323_v49 = vld [vmem:[%s6089_s20 + $0xc2] sm:$0xff]  ;;  %v6333_v51 = vld [vmem:[%s6089_s20 + $0xda] sm:$0xff]  ;;  %v6343_v53 = vld [vmem:[%s6089_s20 + $0xf2] sm:$0xff] }
  0x26   : > { %v6330_v50 = vld [vmem:[%s6089_s20 + $0xe2] sm:$0xff]  ;;  %v6340_v52 = vld [vmem:[%s6089_s20 + $0xfa] sm:$0xff]  ;;  %v6350_v54 = vld [vmem:[%s6089_s20 + $0x112] sm:$0xff] }
  0x27   : > { %v6353_v55 = vld [vmem:[%s6089_s20 + $0x10a] sm:$0xff]  ;;  %v6363_v57 = vld [vmem:[%s6089_s20 + $0x122] sm:$0xff]  ;;  %v6373_v59 = vld [vmem:[%s6089_s20 + $0x13a] sm:$0xff] }
  0x28   : > { %542 = vrot.lane.b32.xlu1 %v6136_v10, %s6031_s21  ;;  %540 = vrot.lane.b32.xlu0 %v6139_v11, %s6031_s21  ;;  %v6360_v56 = vld [vmem:[%s6089_s20 + $0x12a] sm:$0xff]  ;;  %v6370_v58 = vld [vmem:[%s6089_s20 + $0x142] sm:$0xff] }
  0x29   : > { %v6384_v62 = vld [vmem:[%s6089_s20 + $0x15a] sm:$0xff]  ;;  %v6387_v63 = vld [vmem:[%s6089_s20 + $0x152] sm:$0xff] }
  0x2a   : > { %10313 = vst [vmem:[#allocation5_spill] sm:$0xff] %v6384_v62  ;;  %10314 = vst [vmem:[#allocation6_spill] sm:$0xff] %v6387_v63 }
  0x2c   : > { %546 = vrot.lane.b32.xlu1 %v6146_v12, %s6031_s21  ;;  %544 = vrot.lane.b32.xlu0 %v6149_v13, %s6031_s21 }
  0x30   : > { %550 = vrot.lane.b32.xlu1 %v6156_v14, %s6031_s21  ;;  %548 = vrot.lane.b32.xlu0 %v6159_v15, %s6031_s21 }
  0x34   : > { %554 = vrot.lane.b32.xlu1 %v6166_v16, %s6031_s21  ;;  %552 = vrot.lane.b32.xlu0 %v6169_v17, %s6031_s21 }
  0x38   : > { %558 = vrot.lane.b32.xlu1 %v6176_v18, %s6031_s21  ;;  %556 = vrot.lane.b32.xlu0 %v6179_v19, %s6031_s21 }
  0x3c   : > { %562 = vrot.lane.b32.xlu1 %v6186_v20, %s6031_s21  ;;  %560 = vrot.lane.b32.xlu0 %v6189_v21, %s6031_s21 }
  0x40   : > { %566 = vrot.lane.b32.xlu1 %v6196_v22, %s6031_s21  ;;  %564 = vrot.lane.b32.xlu0 %v6199_v23, %s6031_s21 }
  0x44   : > { %570 = vrot.lane.b32.xlu1 %v6206_v24, %s6031_s21  ;;  %568 = vrot.lane.b32.xlu0 %v6209_v25, %s6031_s21 }
  0x48   : > { %574 = vrot.lane.b32.xlu1 %v6216_v26, %s6031_s21  ;;  %572 = vrot.lane.b32.xlu0 %v6219_v27, %s6031_s21 }
  0x4c   : > { %578 = vrot.lane.b32.xlu1 %v6226_v28, %s6031_s21  ;;  %576 = vrot.lane.b32.xlu0 %v6229_v29, %s6031_s21 }
  0x50   : > { %582 = vrot.lane.b32.xlu1 %v6236_v30, %s6031_s21  ;;  %580 = vrot.lane.b32.xlu0 %v6239_v31, %s6031_s21 }
  0x54   : > { %650 = vrot.lane.b32.xlu1 %v263_v32, %s6032_s22  ;;  %648 = vrot.lane.b32.xlu0 %v262_v33, %s6032_s22  ;;  %v6398_v32 = vld [vmem:[%s6089_s20 + $0x172] sm:$0xff]  ;;  %v6401_v33 = vld [vmem:[%s6089_s20 + $0x16a] sm:$0xff] }
  0x55   : > { %10317 = vst [vmem:[#allocation9_spill] sm:$0xff] %v6398_v32  ;;  %10318 = vst [vmem:[#allocation10_spill] sm:$0xff] %v6401_v33 }
  0x58   : > { %654 = vrot.lane.b32.xlu1 %v6250_v34, %s6032_s22  ;;  %652 = vrot.lane.b32.xlu0 %v6253_v35, %s6032_s22 }
  0x5c   : > { %658 = vrot.lane.b32.xlu1 %v6260_v36, %s6032_s22  ;;  %656 = vrot.lane.b32.xlu0 %v6263_v37, %s6032_s22 }
  0x60   : > { %662 = vrot.lane.b32.xlu1 %v6270_v38, %s6032_s22  ;;  %660 = vrot.lane.b32.xlu0 %v6273_v39, %s6032_s22 }
  0x64   : > { %666 = vrot.lane.b32.xlu1 %v6280_v40, %s6032_s22  ;;  %664 = vrot.lane.b32.xlu0 %v6283_v41, %s6032_s22 }
  0x68   : > { %670 = vrot.lane.b32.xlu1 %v6290_v42, %s6032_s22  ;;  %668 = vrot.lane.b32.xlu0 %v6293_v43, %s6032_s22 }
  0x6c   : > { %674 = vrot.lane.b32.xlu1 %v6300_v44, %s6032_s22  ;;  %672 = vrot.lane.b32.xlu0 %v6303_v45, %s6032_s22 }
  0x70   : > { %678 = vrot.lane.b32.xlu1 %v6310_v46, %s6032_s22  ;;  %676 = vrot.lane.b32.xlu0 %v6313_v47, %s6032_s22 }
  0x74   : > { %682 = vrot.lane.b32.xlu1 %v6320_v48, %s6032_s22  ;;  %680 = vrot.lane.b32.xlu0 %v6323_v49, %s6032_s22 }
  0x78   : > { %686 = vrot.lane.b32.xlu1 %v6330_v50, %s6032_s22  ;;  %684 = vrot.lane.b32.xlu0 %v6333_v51, %s6032_s22 }
  0x7c   : > { %690 = vrot.lane.b32.xlu1 %v6340_v52, %s6032_s22  ;;  %688 = vrot.lane.b32.xlu0 %v6343_v53, %s6032_s22 }
  0x80   : > { %694 = vrot.lane.b32.xlu1 %v6350_v54, %s6032_s22  ;;  %692 = vrot.lane.b32.xlu0 %v6353_v55, %s6032_s22 }
  0x84   : > { %698 = vrot.lane.b32.xlu1 %v6360_v56, %s6032_s22  ;;  %696 = vrot.lane.b32.xlu0 %v6363_v57, %s6032_s22 }
  0x86   : > { %v6375_v60 = vpop.permute.xlu1 %524  ;;  %v6377_v61 = vpop.permute.xlu0 %520 }
  0x87   : > { %10311 = vst [vmem:[#allocation3_spill] sm:$0xff] %v6375_v60  ;;  %10312 = vst [vmem:[#allocation4_spill] sm:$0xff] %v6377_v61 }
  0x88   : > { %702 = vrot.lane.b32.xlu1 %v6370_v58, %s6032_s22  ;;  %700 = vrot.lane.b32.xlu0 %v6373_v59, %s6032_s22 }
  0x8a   : > { %v6389_v1 = vpop.permute.xlu1 %526  ;;  %v6391_v3 = vpop.permute.xlu0 %522 }
  0x8b   : > { %10315 = vst [vmem:[#allocation7_spill] sm:$0xff] %v6389_v1  ;;  %10316 = vst [vmem:[#allocation8_spill] sm:$0xff] %v6391_v3 }
  0x8c   : > { %706 = vrot.lane.b32.xlu1 %v6384_v62, %s6032_s22  ;;  %704 = vrot.lane.b32.xlu0 %v6387_v63, %s6032_s22  ;;  %v200_v63 = vld [vmem:[%s6089_s20 + $0x18] sm:$0xff]  ;;  %v201_v62 = vld [vmem:[%s6089_s20 + $0x20] sm:$0xff] }
  0x8e   : > { %v6403_v61 = vpop.permute.xlu1 %530  ;;  %v6405_v60 = vpop.permute.xlu0 %528 }
  0x8f   : > { %10319 = vst [vmem:[#allocation11_spill] sm:$0xff] %v6403_v61  ;;  %10320 = vst [vmem:[#allocation12_spill] sm:$0xff] %v6405_v60 }
  0x90   : > { %710 = vrot.lane.b32.xlu1 %v6398_v32, %s6032_s22  ;;  %708 = vrot.lane.b32.xlu0 %v6401_v33, %s6032_s22  ;;  %v6424_v33 = vld [vmem:[%s6089_s20 + $0x38] sm:$0xff]  ;;  %v6427_v32 = vld [vmem:[%s6089_s20 + $0x30] sm:$0xff] }
  0x91   : > { %10325 = vst [vmem:[#allocation17_spill] sm:$0xff] %v6424_v33  ;;  %10326 = vst [vmem:[#allocation18_spill] sm:$0xff] %v6427_v32 }
  0x92   : > { %v6411_v3 = vpop.permute.xlu1 %534  ;;  %v6413_v1 = vpop.permute.xlu0 %532 }
  0x93   : > { %10321 = vst [vmem:[#allocation13_spill] sm:$0xff] %v6411_v3  ;;  %10322 = vst [vmem:[#allocation14_spill] sm:$0xff] %v6413_v1  ;;  %v6438_v1 = vld [vmem:[%s6089_s20 + $0x50] sm:$0xff] }
  0x94   : > { %778 = vrot.lane.b32.xlu1 %v201_v62, %s6033_s23  ;;  %776 = vrot.lane.b32.xlu0 %v200_v63, %s6033_s23  ;;  %10329 = vst [vmem:[#allocation21_spill] sm:$0xff] %v6438_v1 }
  0x96   : > { %v6419_v60 = vpop.permute.xlu1 %538  ;;  %v6421_v61 = vpop.permute.xlu0 %536 }
  0x97   : > { %10323 = vst [vmem:[#allocation15_spill] sm:$0xff] %v6419_v60  ;;  %10324 = vst [vmem:[#allocation16_spill] sm:$0xff] %v6421_v61  ;;  %v6441_v60 = vld [vmem:[%s6089_s20 + $0x48] sm:$0xff] }
  0x98   : > { %782 = vrot.lane.b32.xlu1 %v6424_v33, %s6033_s23  ;;  %780 = vrot.lane.b32.xlu0 %v6427_v32, %s6033_s23  ;;  %10330 = vst [vmem:[#allocation22_spill] sm:$0xff] %v6441_v60  ;;  %v6452_v32 = vld [vmem:[%s6089_s20 + $0x68] sm:$0xff]  ;;  %v6606_v33 = vld [vmem:[%s6089_s20 + $0x170] sm:$0xff] }
  0x99   : > { %10333 = vst [vmem:[#allocation25_spill] sm:$0xff] %v6452_v32 }
  0x9a   : > { %v6433_v62 = vpop.permute.xlu1 %542  ;;  %v6435_v63 = vpop.permute.xlu0 %540 }
  0x9b   : > { %10327 = vst [vmem:[#allocation19_spill] sm:$0xff] %v6433_v62  ;;  %10328 = vst [vmem:[#allocation20_spill] sm:$0xff] %v6435_v63  ;;  %v6455_v62 = vld [vmem:[%s6089_s20 + $0x60] sm:$0xff] }
  0x9c   : > { %786 = vrot.lane.b32.xlu1 %v6438_v1, %s6033_s23  ;;  %784 = vrot.lane.b32.xlu0 %v6441_v60, %s6033_s23  ;;  %10334 = vst [vmem:[#allocation26_spill] sm:$0xff] %v6455_v62  ;;  %v6466_v1 = vld [vmem:[%s6089_s20 + $0x80] sm:$0xff] }
  0x9d   : > { %10337 = vst [vmem:[#allocation29_spill] sm:$0xff] %v6466_v1 }
  0x9e   : > { %v6447_v61 = vpop.permute.xlu1 %546  ;;  %v6449_v3 = vpop.permute.xlu0 %544 }
  0x9f   : > { %10331 = vst [vmem:[#allocation23_spill] sm:$0xff] %v6447_v61  ;;  %10332 = vst [vmem:[#allocation24_spill] sm:$0xff] %v6449_v3  ;;  %v6469_v61 = vld [vmem:[%s6089_s20 + $0x78] sm:$0xff] }
  0xa0   : > { %790 = vrot.lane.b32.xlu1 %v6452_v32, %s6033_s23  ;;  %788 = vrot.lane.b32.xlu0 %v6455_v62, %s6033_s23  ;;  %10338 = vst [vmem:[#allocation30_spill] sm:$0xff] %v6469_v61  ;;  %v6480_v32 = vld [vmem:[%s6089_s20 + $0x98] sm:$0xff] }
  0xa1   : > { %10341 = vst [vmem:[#allocation33_spill] sm:$0xff] %v6480_v32 }
  0xa2   : > { %v6461_v63 = vpop.permute.xlu1 %550  ;;  %v6463_v60 = vpop.permute.xlu0 %548 }
  0xa3   : > { %10335 = vst [vmem:[#allocation27_spill] sm:$0xff] %v6461_v63  ;;  %10336 = vst [vmem:[#allocation28_spill] sm:$0xff] %v6463_v60  ;;  %v6483_v63 = vld [vmem:[%s6089_s20 + $0x90] sm:$0xff] }
  0xa4   : > { %794 = vrot.lane.b32.xlu1 %v6466_v1, %s6033_s23  ;;  %792 = vrot.lane.b32.xlu0 %v6469_v61, %s6033_s23  ;;  %10342 = vst [vmem:[#allocation34_spill] sm:$0xff] %v6483_v63  ;;  %v6494_v1 = vld [vmem:[%s6089_s20 + $0xb0] sm:$0xff] }
  0xa5   : > { %10345 = vst [vmem:[#allocation37_spill] sm:$0xff] %v6494_v1 }
  0xa6   : > { %v6475_v3 = vpop.permute.xlu1 %554  ;;  %v6477_v62 = vpop.permute.xlu0 %552 }
  0xa7   : > { %10339 = vst [vmem:[#allocation31_spill] sm:$0xff] %v6475_v3  ;;  %10340 = vst [vmem:[#allocation32_spill] sm:$0xff] %v6477_v62  ;;  %v6497_v3 = vld [vmem:[%s6089_s20 + $0xa8] sm:$0xff] }
  0xa8   : > { %798 = vrot.lane.b32.xlu1 %v6480_v32, %s6033_s23  ;;  %796 = vrot.lane.b32.xlu0 %v6483_v63, %s6033_s23  ;;  %10346 = vst [vmem:[#allocation38_spill] sm:$0xff] %v6497_v3  ;;  %v6508_v32 = vld [vmem:[%s6089_s20 + $0xc8] sm:$0xff] }
  0xa9   : > { %10349 = vst [vmem:[#allocation41_spill] sm:$0xff] %v6508_v32 }
  0xaa   : > { %v6489_v60 = vpop.permute.xlu1 %558  ;;  %v6491_v61 = vpop.permute.xlu0 %556 }
  0xab   : > { %10343 = vst [vmem:[#allocation35_spill] sm:$0xff] %v6489_v60  ;;  %10344 = vst [vmem:[#allocation36_spill] sm:$0xff] %v6491_v61  ;;  %v6511_v60 = vld [vmem:[%s6089_s20 + $0xc0] sm:$0xff] }
  0xac   : > { %802 = vrot.lane.b32.xlu1 %v6494_v1, %s6033_s23  ;;  %800 = vrot.lane.b32.xlu0 %v6497_v3, %s6033_s23  ;;  %10350 = vst [vmem:[#allocation42_spill] sm:$0xff] %v6511_v60  ;;  %v6522_v1 = vld [vmem:[%s6089_s20 + $0xe0] sm:$0xff] }
  0xad   : > { %10353 = vst [vmem:[#allocation45_spill] sm:$0xff] %v6522_v1 }
  0xae   : > { %v6503_v62 = vpop.permute.xlu1 %562  ;;  %v6505_v63 = vpop.permute.xlu0 %560 }
  0xaf   : > { %10347 = vst [vmem:[#allocation39_spill] sm:$0xff] %v6503_v62  ;;  %10348 = vst [vmem:[#allocation40_spill] sm:$0xff] %v6505_v63  ;;  %v6525_v62 = vld [vmem:[%s6089_s20 + $0xd8] sm:$0xff] }
  0xb0   : > { %806 = vrot.lane.b32.xlu1 %v6508_v32, %s6033_s23  ;;  %804 = vrot.lane.b32.xlu0 %v6511_v60, %s6033_s23  ;;  %10354 = vst [vmem:[#allocation46_spill] sm:$0xff] %v6525_v62  ;;  %v6536_v32 = vld [vmem:[%s6089_s20 + $0xf8] sm:$0xff] }
  0xb1   : > { %10357 = vst [vmem:[#allocation49_spill] sm:$0xff] %v6536_v32 }
  0xb2   : > { %v6517_v61 = vpop.permute.xlu1 %566  ;;  %v6519_v3 = vpop.permute.xlu0 %564 }
  0xb3   : > { %10351 = vst [vmem:[#allocation43_spill] sm:$0xff] %v6517_v61  ;;  %10352 = vst [vmem:[#allocation44_spill] sm:$0xff] %v6519_v3  ;;  %v6539_v61 = vld [vmem:[%s6089_s20 + $0xf0] sm:$0xff] }
  0xb4   : > { %810 = vrot.lane.b32.xlu1 %v6522_v1, %s6033_s23  ;;  %808 = vrot.lane.b32.xlu0 %v6525_v62, %s6033_s23  ;;  %10358 = vst [vmem:[#allocation50_spill] sm:$0xff] %v6539_v61  ;;  %v6550_v1 = vld [vmem:[%s6089_s20 + $0x110] sm:$0xff] }
  0xb5   : > { %10361 = vst [vmem:[#allocation53_spill] sm:$0xff] %v6550_v1 }
  0xb6   : > { %v6531_v63 = vpop.permute.xlu1 %570  ;;  %v6533_v60 = vpop.permute.xlu0 %568 }
  0xb7   : > { %10355 = vst [vmem:[#allocation47_spill] sm:$0xff] %v6531_v63  ;;  %10356 = vst [vmem:[#allocation48_spill] sm:$0xff] %v6533_v60  ;;  %v6553_v63 = vld [vmem:[%s6089_s20 + $0x108] sm:$0xff] }
  0xb8   : > { %814 = vrot.lane.b32.xlu1 %v6536_v32, %s6033_s23  ;;  %812 = vrot.lane.b32.xlu0 %v6539_v61, %s6033_s23  ;;  %10362 = vst [vmem:[#allocation54_spill] sm:$0xff] %v6553_v63  ;;  %v6564_v32 = vld [vmem:[%s6089_s20 + $0x128] sm:$0xff] }
  0xb9   : > { %10365 = vst [vmem:[#allocation57_spill] sm:$0xff] %v6564_v32 }
  0xba   : > { %v6545_v3 = vpop.permute.xlu1 %574  ;;  %v6547_v62 = vpop.permute.xlu0 %572 }
  0xbb   : > { %10359 = vst [vmem:[#allocation51_spill] sm:$0xff] %v6545_v3  ;;  %10360 = vst [vmem:[#allocation52_spill] sm:$0xff] %v6547_v62  ;;  %v6567_v3 = vld [vmem:[%s6089_s20 + $0x120] sm:$0xff] }
  0xbc   : > { %818 = vrot.lane.b32.xlu1 %v6550_v1, %s6033_s23  ;;  %816 = vrot.lane.b32.xlu0 %v6553_v63, %s6033_s23  ;;  %10366 = vst [vmem:[#allocation58_spill] sm:$0xff] %v6567_v3  ;;  %v6578_v1 = vld [vmem:[%s6089_s20 + $0x140] sm:$0xff] }
  0xbd   : > { %10369 = vst [vmem:[#allocation61_spill] sm:$0xff] %v6578_v1 }
  0xbe   : > { %v6559_v60 = vpop.permute.xlu1 %578  ;;  %v6561_v61 = vpop.permute.xlu0 %576 }
  0xbf   : > { %10363 = vst [vmem:[#allocation55_spill] sm:$0xff] %v6559_v60  ;;  %10364 = vst [vmem:[#allocation56_spill] sm:$0xff] %v6561_v61  ;;  %v6581_v61 = vld [vmem:[%s6089_s20 + $0x138] sm:$0xff] }
  0xc0   : > { %822 = vrot.lane.b32.xlu1 %v6564_v32, %s6033_s23  ;;  %820 = vrot.lane.b32.xlu0 %v6567_v3, %s6033_s23  ;;  %10370 = vst [vmem:[#allocation62_spill] sm:$0xff] %v6581_v61  ;;  %v6592_v32 = vld [vmem:[%s6089_s20 + $0x158] sm:$0xff] }
  0xc1   : > { %10373 = vst [vmem:[#allocation65_spill] sm:$0xff] %v6592_v32 }
  0xc2   : > { %v6573_v62 = vpop.permute.xlu1 %582  ;;  %v6575_v63 = vpop.permute.xlu0 %580 }
  0xc3   : > { %10367 = vst [vmem:[#allocation59_spill] sm:$0xff] %v6573_v62  ;;  %10368 = vst [vmem:[#allocation60_spill] sm:$0xff] %v6575_v63  ;;  %v6595_v62 = vld [vmem:[%s6089_s20 + $0x150] sm:$0xff] }
  0xc4   : > { %826 = vrot.lane.b32.xlu1 %v6578_v1, %s6033_s23  ;;  %824 = vrot.lane.b32.xlu0 %v6581_v61, %s6033_s23  ;;  %10374 = vst [vmem:[#allocation66_spill] sm:$0xff] %v6595_v62  ;;  %v6609_v61 = vld [vmem:[%s6089_s20 + $0x168] sm:$0xff] }
  0xc6   : > { %v6587_v60 = vpop.permute.xlu1 %650  ;;  %v6589_v3 = vpop.permute.xlu0 %648 }
  0xc7   : > { %10371 = vst [vmem:[#allocation63_spill] sm:$0xff] %v6587_v60  ;;  %10372 = vst [vmem:[#allocation64_spill] sm:$0xff] %v6589_v3  ;;  %v6616_v3 = vld [vmem:[%s6089_s20 + $0x188] sm:$0xff]  ;;  %v6619_v60 = vld [vmem:[%s6089_s20 + $0x180] sm:$0xff] }
  0xc8   : > { %830 = vrot.lane.b32.xlu1 %v6592_v32, %s6033_s23  ;;  %828 = vrot.lane.b32.xlu0 %v6595_v62, %s6033_s23 }
  0xca   : > { %v6601_v63 = vpop.permute.xlu1 %654  ;;  %v6603_v1 = vpop.permute.xlu0 %652 }
  0xcb   : > { %10375 = vst [vmem:[#allocation67_spill] sm:$0xff] %v6601_v63  ;;  %10376 = vst [vmem:[#allocation68_spill] sm:$0xff] %v6603_v1 }
  0xcc   : > { %834 = vrot.lane.b32.xlu1 %v6606_v33, %s6033_s23  ;;  %832 = vrot.lane.b32.xlu0 %v6609_v61, %s6033_s23 }
  0xce   : > { %v6621_v32 = vpop.permute.xlu1 %658  ;;  %v6623_v62 = vpop.permute.xlu0 %656 }
  0xcf   : > { %10377 = vst [vmem:[#allocation69_spill] sm:$0xff] %v6621_v32  ;;  %10378 = vst [vmem:[#allocation70_spill] sm:$0xff] %v6623_v62 }
  0xd0   : > { %838 = vrot.lane.b32.xlu1 %v6616_v3, %s6033_s23  ;;  %836 = vrot.lane.b32.xlu0 %v6619_v60, %s6033_s23 }
  0xd2   : > { %v6629_v1 = vpop.permute.xlu1 %662  ;;  %v6631_v63 = vpop.permute.xlu0 %660 }
  0xd3   : > { %10379 = vst [vmem:[#allocation71_spill] sm:$0xff] %v6629_v1  ;;  %10380 = vst [vmem:[#allocation72_spill] sm:$0xff] %v6631_v63 }
  0xd4   : > { %906 = vrot.lane.b32.xlu1 %v6099_v2, %s6034_s24  ;;  %904 = vrot.lane.b32.xlu0 %v6092_v0, %s6034_s24 }
  0xd6   : > { %v6637_v32 = vpop.permute.xlu1 %666  ;;  %v6639_v62 = vpop.permute.xlu0 %664 }
  0xd8   : > { %910 = vrot.lane.b32.xlu1 %v6106_v4, %s6034_s24  ;;  %908 = vrot.lane.b32.xlu0 %v6109_v5, %s6034_s24 }
  0xda   : > { %v6645_v1 = vpop.permute.xlu1 %670  ;;  %v6647_v63 = vpop.permute.xlu0 %668 }
  0xdb   : > { %10381 = vst [vmem:[#allocation73_spill] sm:$0xff] %v6645_v1  ;;  %10382 = vst [vmem:[#allocation74_spill] sm:$0xff] %v6647_v63  ;;  %v5984_v1 = vld [vmem:[%s6089_s20 + $0x30] sm:$0xff] }
  0xdc   : > { %914 = vrot.lane.b32.xlu1 %v6116_v6, %s6034_s24  ;;  %912 = vrot.lane.b32.xlu0 %v6119_v7, %s6034_s24 }
  0xde   : > { %v6653_v0 = vpop.permute.xlu1 %674  ;;  %v6655_v2 = vpop.permute.xlu0 %672 }
  0xdf   : > { %10383 = vst [vmem:[#allocation75_spill] sm:$0xff] %v6653_v0  ;;  %10384 = vst [vmem:[#allocation76_spill] sm:$0xff] %v6655_v2 }
  0xe0   : > { %918 = vrot.lane.b32.xlu1 %v6126_v8, %s6034_s24  ;;  %916 = vrot.lane.b32.xlu0 %v6129_v9, %s6034_s24 }
  0xe2   : > { %v6661_v4 = vpop.permute.xlu1 %678  ;;  %v6663_v5 = vpop.permute.xlu0 %676 }
  0xe3   : > { %10385 = vst [vmem:[#allocation77_spill] sm:$0xff] %v6661_v4  ;;  %10386 = vst [vmem:[#allocation78_spill] sm:$0xff] %v6663_v5  ;;  %v5355_v4 = vld [vmem:[%s6089_s20 + $0x4a] sm:$0xff] }
  0xe4   : > { %922 = vrot.lane.b32.xlu1 %v6136_v10, %s6034_s24  ;;  %920 = vrot.lane.b32.xlu0 %v6139_v11, %s6034_s24 }
  0xe6   : > { %v6669_v6 = vpop.permute.xlu1 %682  ;;  %v6671_v7 = vpop.permute.xlu0 %680 }
  0xe7   : > { %10387 = vst [vmem:[#allocation79_spill] sm:$0xff] %v6669_v6  ;;  %10388 = vst [vmem:[#allocation80_spill] sm:$0xff] %v6671_v7  ;;  %v5329_v6 = vld [vmem:[%s6089_s20 + $0x91] sm:$0xff] }
  0xe8   : > { %926 = vrot.lane.b32.xlu1 %v6146_v12, %s6034_s24  ;;  %924 = vrot.lane.b32.xlu0 %v6149_v13, %s6034_s24 }
  0xea   : > { %v6677_v8 = vpop.permute.xlu1 %686  ;;  %v6679_v9 = vpop.permute.xlu0 %684 }
  0xeb   : > { %10389 = vst [vmem:[#allocation81_spill] sm:$0xff] %v6677_v8  ;;  %10390 = vst [vmem:[#allocation82_spill] sm:$0xff] %v6679_v9  ;;  %v10459_v9 = vld [vmem:[#allocation45_spill] sm:$0xff]  ;;  %v5323_v8 = vld [vmem:[%s6089_s20 + $0x49] sm:$0xff] }
  0xec   : > { %930 = vrot.lane.b32.xlu1 %v6156_v14, %s6034_s24  ;;  %928 = vrot.lane.b32.xlu0 %v6159_v15, %s6034_s24 }
  0xee   : > { %v6685_v10 = vpop.permute.xlu1 %690  ;;  %v6687_v11 = vpop.permute.xlu0 %688 }
  0xef   : > { %10391 = vst [vmem:[#allocation83_spill] sm:$0xff] %v6685_v10  ;;  %10392 = vst [vmem:[#allocation84_spill] sm:$0xff] %v6687_v11  ;;  %v10451_v11 = vld [vmem:[#allocation37_spill] sm:$0xff] }
  0xf0   : > { %934 = vrot.lane.b32.xlu1 %v6166_v16, %s6034_s24  ;;  %932 = vrot.lane.b32.xlu0 %v6169_v17, %s6034_s24 }
  0xf2   : > { %v6693_v12 = vpop.permute.xlu1 %694  ;;  %v6695_v13 = vpop.permute.xlu0 %692 }
  0xf3   : > { %10393 = vst [vmem:[#allocation85_spill] sm:$0xff] %v6693_v12  ;;  %10394 = vst [vmem:[#allocation86_spill] sm:$0xff] %v6695_v13  ;;  %v10443_v13 = vld [vmem:[#allocation29_spill] sm:$0xff] }
  0xf4   : > { %938 = vrot.lane.b32.xlu1 %v6176_v18, %s6034_s24  ;;  %936 = vrot.lane.b32.xlu0 %v6179_v19, %s6034_s24 }
  0xf6   : > { %v6701_v14 = vpop.permute.xlu1 %698  ;;  %v6703_v15 = vpop.permute.xlu0 %696 }
  0xf7   : > { %10395 = vst [vmem:[#allocation87_spill] sm:$0xff] %v6701_v14  ;;  %10396 = vst [vmem:[#allocation88_spill] sm:$0xff] %v6703_v15 }
  0xf8   : > { %942 = vrot.lane.b32.xlu1 %v6186_v20, %s6034_s24  ;;  %940 = vrot.lane.b32.xlu0 %v6189_v21, %s6034_s24 }
  0xfa   : > { %v6709_v16 = vpop.permute.xlu1 %702  ;;  %v6711_v17 = vpop.permute.xlu0 %700 }
  0xfb   : > { %10397 = vst [vmem:[#allocation89_spill] sm:$0xff] %v6709_v16  ;;  %10398 = vst [vmem:[#allocation90_spill] sm:$0xff] %v6711_v17 }
  0xfc   : > { %946 = vrot.lane.b32.xlu1 %v6196_v22, %s6034_s24  ;;  %944 = vrot.lane.b32.xlu0 %v6199_v23, %s6034_s24 }
  0xfe   : > { %v6717_v18 = vpop.permute.xlu1 %706  ;;  %v6719_v19 = vpop.permute.xlu0 %704 }
  0xff   : > { %10399 = vst [vmem:[#allocation91_spill] sm:$0xff] %v6717_v18  ;;  %10400 = vst [vmem:[#allocation92_spill] sm:$0xff] %v6719_v19 }
 0x100   : > { %950 = vrot.lane.b32.xlu1 %v6206_v24, %s6034_s24  ;;  %948 = vrot.lane.b32.xlu0 %v6209_v25, %s6034_s24 }
 0x102   : > { %v6725_v20 = vpop.permute.xlu1 %710  ;;  %v6727_v21 = vpop.permute.xlu0 %708 }
 0x103   : > { %10401 = vst [vmem:[#allocation93_spill] sm:$0xff] %v6725_v20  ;;  %10402 = vst [vmem:[#allocation94_spill] sm:$0xff] %v6727_v21 }
 0x104   : > { %954 = vrot.lane.b32.xlu1 %v6216_v26, %s6034_s24  ;;  %952 = vrot.lane.b32.xlu0 %v6219_v27, %s6034_s24  ;;  %v6750_v26 = vld [vmem:[%s6089_s20 + $0x189] sm:$0xff]  ;;  %v6753_v27 = vld [vmem:[%s6089_s20 + $0x181] sm:$0xff] }
 0x106   : > { %v6733_v22 = vpop.permute.xlu1 %778  ;;  %v6735_v23 = vpop.permute.xlu0 %776 }
 0x108   : > { %958 = vrot.lane.b32.xlu1 %v6226_v28, %s6034_s24  ;;  %956 = vrot.lane.b32.xlu0 %v6229_v29, %s6034_s24 }
 0x10a   : > { %v6741_v24 = vpop.permute.xlu1 %782  ;;  %v6743_v25 = vpop.permute.xlu0 %780 }
 0x10c   : > { %962 = vrot.lane.b32.xlu1 %v6236_v30, %s6034_s24  ;;  %960 = vrot.lane.b32.xlu0 %v6239_v31, %s6034_s24 }
 0x10e   : > { %v6755_v21 = vpop.permute.xlu1 %786  ;;  %v6757_v28 = vpop.permute.xlu0 %784 }
 0x110   : > { %966 = vrot.lane.b32.xlu1 %v6750_v26, %s6034_s24  ;;  %964 = vrot.lane.b32.xlu0 %v6753_v27, %s6034_s24 }
 0x112   : > { %v6763_v29 = vpop.permute.xlu1 %790  ;;  %v6765_v30 = vpop.permute.xlu0 %788 }
 0x114   : > { %1034 = vrot.lane.b32.xlu1 %v6250_v34, %s6035_s25  ;;  %1032 = vrot.lane.b32.xlu0 %v6253_v35, %s6035_s25 }
 0x116   : > { %v6771_v31 = vpop.permute.xlu1 %794  ;;  %v6773_v20 = vpop.permute.xlu0 %792 }
 0x117   : > { %10403 = vst [vmem:[#allocation95_spill] sm:$0xff] %v6771_v31  ;;  %10404 = vst [vmem:[#allocation96_spill] sm:$0xff] %v6773_v20  ;;  %v10568_v20 = vld [vmem:[#allocation24_spill] sm:$0xff]  ;;  %v10570_v31 = vld [vmem:[#allocation27_spill] sm:$0xff] }
 0x118   : > { %1038 = vrot.lane.b32.xlu1 %v6260_v36, %s6035_s25  ;;  %1036 = vrot.lane.b32.xlu0 %v6263_v37, %s6035_s25 }
 0x11a   : > { %v6779_v19 = vpop.permute.xlu1 %798  ;;  %v6781_v18 = vpop.permute.xlu0 %796 }
 0x11b   : > { %10405 = vst [vmem:[#allocation97_spill] sm:$0xff] %v6779_v19  ;;  %10406 = vst [vmem:[#allocation98_spill] sm:$0xff] %v6781_v18  ;;  %v10553_v18 = vld [vmem:[#allocation7_spill] sm:$0xff] }
 0x11c   : > { %1042 = vrot.lane.b32.xlu1 %v6270_v38, %s6035_s25  ;;  %1040 = vrot.lane.b32.xlu0 %v6273_v39, %s6035_s25 }
 0x11e   : > { %v6787_v34 = vpop.permute.xlu1 %802  ;;  %v6789_v35 = vpop.permute.xlu0 %800 }
 0x11f   : > { %10407 = vst [vmem:[#allocation99_spill] sm:$0xff] %v6787_v34  ;;  %10408 = vst [vmem:[#allocation100_spill] sm:$0xff] %v6789_v35  ;;  %v5361_v34 = vld [vmem:[%s6089_s20 + $0x92] sm:$0xff] }
 0x120   : > { %1046 = vrot.lane.b32.xlu1 %v6280_v40, %s6035_s25  ;;  %1044 = vrot.lane.b32.xlu0 %v6283_v41, %s6035_s25 }
 0x122   : > { %v6795_v36 = vpop.permute.xlu1 %806  ;;  %v6797_v37 = vpop.permute.xlu0 %804 }
 0x123   : > { %10409 = vst [vmem:[#allocation101_spill] sm:$0xff] %v6795_v36  ;;  %10410 = vst [vmem:[#allocation102_spill] sm:$0xff] %v6797_v37 }
 0x124   : > { %1050 = vrot.lane.b32.xlu1 %v6290_v42, %s6035_s25  ;;  %1048 = vrot.lane.b32.xlu0 %v6293_v43, %s6035_s25 }
 0x126   : > { %v6803_v38 = vpop.permute.xlu1 %810  ;;  %v6805_v39 = vpop.permute.xlu0 %808 }
 0x127   : > { %10411 = vst [vmem:[#allocation103_spill] sm:$0xff] %v6803_v38  ;;  %10412 = vst [vmem:[#allocation104_spill] sm:$0xff] %v6805_v39  ;;  %v5327_v38 = vld [vmem:[%s6089_s20 + $0x79] sm:$0xff] }
 0x128   : > { %1054 = vrot.lane.b32.xlu1 %v6300_v44, %s6035_s25  ;;  %1052 = vrot.lane.b32.xlu0 %v6303_v45, %s6035_s25 }
 0x12a   : > { %v6811_v40 = vpop.permute.xlu1 %814  ;;  %v6813_v41 = vpop.permute.xlu0 %812 }
 0x12b   : > { %10413 = vst [vmem:[#allocation105_spill] sm:$0xff] %v6811_v40  ;;  %10414 = vst [vmem:[#allocation106_spill] sm:$0xff] %v6813_v41  ;;  %v10455_v41 = vld [vmem:[#allocation41_spill] sm:$0xff] }
 0x12c   : > { %1058 = vrot.lane.b32.xlu1 %v6310_v46, %s6035_s25  ;;  %1056 = vrot.lane.b32.xlu0 %v6313_v47, %s6035_s25 }
 0x12e   : > { %v6819_v42 = vpop.permute.xlu1 %818  ;;  %v6821_v43 = vpop.permute.xlu0 %816 }
 0x12f   : > { %10415 = vst [vmem:[#allocation107_spill] sm:$0xff] %v6819_v42  ;;  %10416 = vst [vmem:[#allocation108_spill] sm:$0xff] %v6821_v43  ;;  %v10447_v43 = vld [vmem:[#allocation33_spill] sm:$0xff] }
 0x130   : > { %1062 = vrot.lane.b32.xlu1 %v6320_v48, %s6035_s25  ;;  %1060 = vrot.lane.b32.xlu0 %v6323_v49, %s6035_s25 }
 0x132   : > { %v6827_v44 = vpop.permute.xlu1 %822  ;;  %v6829_v45 = vpop.permute.xlu0 %820 }
 0x133   : > { %10417 = vst [vmem:[#allocation109_spill] sm:$0xff] %v6827_v44  ;;  %10418 = vst [vmem:[#allocation110_spill] sm:$0xff] %v6829_v45  ;;  %v10439_v45 = vld [vmem:[#allocation25_spill] sm:$0xff] }
 0x134   : > { %1066 = vrot.lane.b32.xlu1 %v6330_v50, %s6035_s25  ;;  %1064 = vrot.lane.b32.xlu0 %v6333_v51, %s6035_s25 }
 0x136   : > { %v6835_v46 = vpop.permute.xlu1 %826  ;;  %v6837_v47 = vpop.permute.xlu0 %824 }
 0x137   : > { %10419 = vst [vmem:[#allocation111_spill] sm:$0xff] %v6835_v46  ;;  %10420 = vst [vmem:[#allocation112_spill] sm:$0xff] %v6837_v47  ;;  %v10435_v47 = vld [vmem:[#allocation21_spill] sm:$0xff]  ;;  %v10436_v46 = vld [vmem:[#allocation22_spill] sm:$0xff] }
 0x138   : > { %1070 = vrot.lane.b32.xlu1 %v6340_v52, %s6035_s25  ;;  %1068 = vrot.lane.b32.xlu0 %v6343_v53, %s6035_s25 }
 0x13a   : > { %v6843_v48 = vpop.permute.xlu1 %830  ;;  %v6845_v49 = vpop.permute.xlu0 %828 }
 0x13b   : > { %10421 = vst [vmem:[#allocation113_spill] sm:$0xff] %v6843_v48  ;;  %10422 = vst [vmem:[#allocation114_spill] sm:$0xff] %v6845_v49  ;;  %v10432_v48 = vld [vmem:[#allocation18_spill] sm:$0xff] }
 0x13c   : > { %1074 = vrot.lane.b32.xlu1 %v6350_v54, %s6035_s25  ;;  %1072 = vrot.lane.b32.xlu0 %v6353_v55, %s6035_s25 }
 0x13e   : > { %v6851_v50 = vpop.permute.xlu1 %834  ;;  %v6853_v51 = vpop.permute.xlu0 %832 }
 0x13f   : > { %10423 = vst [vmem:[#allocation115_spill] sm:$0xff] %v6851_v50  ;;  %10424 = vst [vmem:[#allocation116_spill] sm:$0xff] %v6853_v51  ;;  %v10427_v51 = vld [vmem:[#allocation5_spill] sm:$0xff] }
 0x140   : > { %1078 = vrot.lane.b32.xlu1 %v6360_v56, %s6035_s25  ;;  %1076 = vrot.lane.b32.xlu0 %v6363_v57, %s6035_s25  ;;  %v10428_v56 = vld [vmem:[#allocation6_spill] sm:$0xff] }
 0x141   : > { %v6887_v50 = vld [vmem:[%s6089_s20 + $0x182] sm:$0xff] }
 0x142   : > { %v6859_v52 = vpop.permute.xlu1 %838  ;;  %v6861_v53 = vpop.permute.xlu0 %836 }
 0x143   : > { %10425 = vst [vmem:[#allocation117_spill] sm:$0xff] %v6859_v52  ;;  %10426 = vst [vmem:[#allocation118_spill] sm:$0xff] %v6861_v53  ;;  %v10429_v53 = vld [vmem:[#allocation9_spill] sm:$0xff] }
 0x144   : > { %1082 = vrot.lane.b32.xlu1 %v6370_v58, %s6035_s25  ;;  %1080 = vrot.lane.b32.xlu0 %v6373_v59, %s6035_s25  ;;  %v10430_v58 = vld [vmem:[#allocation10_spill] sm:$0xff] }
 0x145   : > { %v6884_v59 = vld [vmem:[%s6089_s20 + $0x18a] sm:$0xff] }
 0x146   : > { %v6867_v54 = vpop.permute.xlu1 %906  ;;  %v6869_v55 = vpop.permute.xlu0 %904 }
 0x148   : > { %1086 = vrot.lane.b32.xlu1 %v10427_v51, %s6035_s25  ;;  %1084 = vrot.lane.b32.xlu0 %v10428_v56, %s6035_s25 }
 0x14a   : > { %v6875_v57 = vpop.permute.xlu1 %910  ;;  %v6877_v52 = vpop.permute.xlu0 %908 }
 0x14c   : > { %1090 = vrot.lane.b32.xlu1 %v10429_v53, %s6035_s25  ;;  %1088 = vrot.lane.b32.xlu0 %v10430_v58, %s6035_s25  ;;  %v10431_v58 = vld [vmem:[#allocation17_spill] sm:$0xff] }
 0x14e   : > { %v6889_v49 = vpop.permute.xlu1 %914  ;;  %v6891_v51 = vpop.permute.xlu0 %912 }
 0x150   : > { %1094 = vrot.lane.b32.xlu1 %v6884_v59, %s6035_s25  ;;  %1092 = vrot.lane.b32.xlu0 %v6887_v50, %s6035_s25 }
 0x152   : > { %v6897_v56 = vpop.permute.xlu1 %918  ;;  %v6899_v53 = vpop.permute.xlu0 %916 }
 0x154   : > { %1162 = vrot.lane.b32.xlu1 %v10431_v58, %s6036_s26  ;;  %1160 = vrot.lane.b32.xlu0 %v10432_v48, %s6036_s26  ;;  %v10440_v58 = vld [vmem:[#allocation26_spill] sm:$0xff] }
 0x156   : > { %v6905_v17 = vpop.permute.xlu1 %922  ;;  %v6907_v16 = vpop.permute.xlu0 %920 }
 0x157   : > { %10433 = vst [vmem:[#allocation5_spill] sm:$0xff] %v6905_v17  ;;  %10434 = vst [vmem:[#allocation6_spill] sm:$0xff] %v6907_v16  ;;  %v10562_v16 = vld [vmem:[#allocation16_spill] sm:$0xff]  ;;  %v10563_v17 = vld [vmem:[#allocation19_spill] sm:$0xff] }
 0x158   : > { %1166 = vrot.lane.b32.xlu1 %v10435_v47, %s6036_s26  ;;  %1164 = vrot.lane.b32.xlu0 %v10436_v46, %s6036_s26  ;;  %v10444_v47 = vld [vmem:[#allocation30_spill] sm:$0xff] }
 0x15a   : > { %v6913_v15 = vpop.permute.xlu1 %926  ;;  %v6915_v14 = vpop.permute.xlu0 %924 }
 0x15b   : > { %10437 = vst [vmem:[#allocation9_spill] sm:$0xff] %v6913_v15  ;;  %10438 = vst [vmem:[#allocation10_spill] sm:$0xff] %v6915_v14 }
 0x15c   : > { %1170 = vrot.lane.b32.xlu1 %v10439_v45, %s6036_s26  ;;  %1168 = vrot.lane.b32.xlu0 %v10440_v58, %s6036_s26  ;;  %v10448_v45 = vld [vmem:[#allocation34_spill] sm:$0xff] }
 0x15e   : > { %v6921_v48 = vpop.permute.xlu1 %930  ;;  %v6923_v44 = vpop.permute.xlu0 %928 }
 0x15f   : > { %10441 = vst [vmem:[#allocation17_spill] sm:$0xff] %v6921_v48  ;;  %10442 = vst [vmem:[#allocation18_spill] sm:$0xff] %v6923_v44  ;;  %v5359_v48 = vld [vmem:[%s6089_s20 + $0x7a] sm:$0xff] }
 0x160   : > { %1174 = vrot.lane.b32.xlu1 %v10443_v13, %s6036_s26  ;;  %1172 = vrot.lane.b32.xlu0 %v10444_v47, %s6036_s26  ;;  %v10452_v13 = vld [vmem:[#allocation38_spill] sm:$0xff] }
 0x162   : > { %v6929_v46 = vpop.permute.xlu1 %934  ;;  %v6931_v12 = vpop.permute.xlu0 %932 }
 0x163   : > { %10445 = vst [vmem:[#allocation21_spill] sm:$0xff] %v6929_v46  ;;  %10446 = vst [vmem:[#allocation22_spill] sm:$0xff] %v6931_v12 }
 0x164   : > { %1178 = vrot.lane.b32.xlu1 %v10447_v43, %s6036_s26  ;;  %1176 = vrot.lane.b32.xlu0 %v10448_v45, %s6036_s26  ;;  %v10456_v43 = vld [vmem:[#allocation42_spill] sm:$0xff] }
 0x166   : > { %v6937_v58 = vpop.permute.xlu1 %938  ;;  %v6939_v42 = vpop.permute.xlu0 %936 }
 0x167   : > { %10449 = vst [vmem:[#allocation25_spill] sm:$0xff] %v6937_v58  ;;  %10450 = vst [vmem:[#allocation26_spill] sm:$0xff] %v6939_v42  ;;  %v5325_v58 = vld [vmem:[%s6089_s20 + $0x61] sm:$0xff] }
 0x168   : > { %1182 = vrot.lane.b32.xlu1 %v10451_v11, %s6036_s26  ;;  %1180 = vrot.lane.b32.xlu0 %v10452_v13, %s6036_s26  ;;  %v10460_v11 = vld [vmem:[#allocation46_spill] sm:$0xff] }
 0x16a   : > { %v6945_v47 = vpop.permute.xlu1 %942  ;;  %v6947_v10 = vpop.permute.xlu0 %940 }
 0x16b   : > { %10453 = vst [vmem:[#allocation29_spill] sm:$0xff] %v6945_v47  ;;  %10454 = vst [vmem:[#allocation30_spill] sm:$0xff] %v6947_v10  ;;  %v10463_v10 = vld [vmem:[#allocation49_spill] sm:$0xff] }
 0x16c   : > { %1186 = vrot.lane.b32.xlu1 %v10455_v41, %s6036_s26  ;;  %1184 = vrot.lane.b32.xlu0 %v10456_v43, %s6036_s26  ;;  %v10464_v41 = vld [vmem:[#allocation50_spill] sm:$0xff] }
 0x16e   : > { %v6953_v45 = vpop.permute.xlu1 %946  ;;  %v6955_v40 = vpop.permute.xlu0 %944 }
 0x16f   : > { %10457 = vst [vmem:[#allocation33_spill] sm:$0xff] %v6953_v45  ;;  %10458 = vst [vmem:[#allocation34_spill] sm:$0xff] %v6955_v40  ;;  %v10467_v40 = vld [vmem:[#allocation53_spill] sm:$0xff] }
 0x170   : > { %1190 = vrot.lane.b32.xlu1 %v10459_v9, %s6036_s26  ;;  %1188 = vrot.lane.b32.xlu0 %v10460_v11, %s6036_s26  ;;  %v10468_v9 = vld [vmem:[#allocation54_spill] sm:$0xff] }
 0x172   : > { %v6961_v13 = vpop.permute.xlu1 %950  ;;  %v6963_v47 = vpop.permute.xlu0 %948 }
 0x173   : > { %10461 = vst [vmem:[#allocation37_spill] sm:$0xff] %v6961_v13  ;;  %10462 = vst [vmem:[#allocation38_spill] sm:$0xff] %v6963_v47  ;;  %v10471_v47 = vld [vmem:[#allocation57_spill] sm:$0xff] }
 0x174   : > { %1194 = vrot.lane.b32.xlu1 %v10463_v10, %s6036_s26  ;;  %1192 = vrot.lane.b32.xlu0 %v10464_v41, %s6036_s26  ;;  %v10472_v10 = vld [vmem:[#allocation58_spill] sm:$0xff] }
 0x176   : > { %v6969_v43 = vpop.permute.xlu1 %954  ;;  %v6971_v45 = vpop.permute.xlu0 %952 }
 0x177   : > { %10465 = vst [vmem:[#allocation41_spill] sm:$0xff] %v6969_v43  ;;  %10466 = vst [vmem:[#allocation42_spill] sm:$0xff] %v6971_v45 }
 0x178   : > { %1198 = vrot.lane.b32.xlu1 %v10467_v40, %s6036_s26  ;;  %1196 = vrot.lane.b32.xlu0 %v10468_v9, %s6036_s26  ;;  %v10475_v40 = vld [vmem:[#allocation61_spill] sm:$0xff]  ;;  %v10476_v9 = vld [vmem:[#allocation62_spill] sm:$0xff] }
 0x17a   : > { %v6977_v11 = vpop.permute.xlu1 %958  ;;  %v6979_v13 = vpop.permute.xlu0 %956 }
 0x17b   : > { %10469 = vst [vmem:[#allocation45_spill] sm:$0xff] %v6977_v11  ;;  %10470 = vst [vmem:[#allocation46_spill] sm:$0xff] %v6979_v13 }
 0x17c   : > { %1202 = vrot.lane.b32.xlu1 %v10471_v47, %s6036_s26  ;;  %1200 = vrot.lane.b32.xlu0 %v10472_v10, %s6036_s26  ;;  %v10479_v47 = vld [vmem:[#allocation65_spill] sm:$0xff]  ;;  %v10480_v10 = vld [vmem:[#allocation66_spill] sm:$0xff] }
 0x17e   : > { %v6985_v41 = vpop.permute.xlu1 %962  ;;  %v6987_v45 = vpop.permute.xlu0 %960 }
 0x17f   : > { %10473 = vst [vmem:[#allocation49_spill] sm:$0xff] %v6985_v41  ;;  %10474 = vst [vmem:[#allocation50_spill] sm:$0xff] %v6987_v45 }
 0x180   : > { %1206 = vrot.lane.b32.xlu1 %v10475_v40, %s6036_s26  ;;  %1204 = vrot.lane.b32.xlu0 %v10476_v9, %s6036_s26 }
 0x182   : > { %v6993_v11 = vpop.permute.xlu1 %966  ;;  %v6995_v13 = vpop.permute.xlu0 %964 }
 0x183   : > { %10477 = vst [vmem:[#allocation53_spill] sm:$0xff] %v6993_v11  ;;  %10478 = vst [vmem:[#allocation54_spill] sm:$0xff] %v6995_v13  ;;  %v5321_v11 = vld [vmem:[%s6089_s20 + $0x31] sm:$0xff] }
 0x184   : > { %1210 = vrot.lane.b32.xlu1 %v10479_v47, %s6036_s26  ;;  %1208 = vrot.lane.b32.xlu0 %v10480_v10, %s6036_s26  ;;  %v5320_v47 = vld [vmem:[%s6089_s20 + $0x1a0] sm:$0xff]  ;;  %v5319_v10 = vld [vmem:[%s6089_s20 + $0x198] sm:$0xff] }
 0x186   : > { %v7001_v45 = vpop.permute.xlu1 %1034  ;;  %v7003_v41 = vpop.permute.xlu0 %1032 }
 0x188   : > { %1214 = vrot.lane.b32.xlu1 %v6606_v33, %s6036_s26  ;;  %1212 = vrot.lane.b32.xlu0 %v6609_v61, %s6036_s26  ;;  %v5322_v61 = vld [vmem:[%s6089_s20 + $0x39] sm:$0xff] }
 0x18a   : > { %v7009_v40 = vpop.permute.xlu1 %1038  ;;  %v7011_v9 = vpop.permute.xlu0 %1036 }
 0x18c   : > { %1218 = vrot.lane.b32.xlu1 %v6616_v3, %s6036_s26  ;;  %1216 = vrot.lane.b32.xlu0 %v6619_v60, %s6036_s26  ;;  %v5324_v60 = vld [vmem:[%s6089_s20 + $0x51] sm:$0xff] }
 0x18e   : > { %v7019_v13 = vpop.permute.xlu1 %1042  ;;  %v7021_v33 = vpop.permute.xlu0 %1040 }
 0x190   : > { %1222 = vrot.lane.b32.xlu1 %v5320_v47, %s6036_s26  ;;  %1220 = vrot.lane.b32.xlu0 %v5319_v10, %s6036_s26  ;;  %v5326_v10 = vld [vmem:[%s6089_s20 + $0x69] sm:$0xff] }
 0x192   : > { %v7027_v43 = vpop.permute.xlu1 %1046  ;;  %v7029_v3 = vpop.permute.xlu0 %1044 }
 0x194   : > { %1290 = vrot.lane.b32.xlu1 %v5322_v61, %s6037_s27  ;;  %1288 = vrot.lane.b32.xlu0 %v5321_v11, %s6037_s27  ;;  %v5328_v11 = vld [vmem:[%s6089_s20 + $0x81] sm:$0xff] }
 0x196   : > { %v7035_v42 = vpop.permute.xlu1 %1050  ;;  %v7037_v47 = vpop.permute.xlu0 %1048 }
 0x197   : > { %10481 = vst [vmem:[#allocation57_spill] sm:$0xff] %v7035_v42  ;;  %10482 = vst [vmem:[#allocation58_spill] sm:$0xff] %v7037_v47  ;;  %v5987_v47 = vld [vmem:[%s6089_s20 + $0x68] sm:$0xff]  ;;  %v5988_v42 = vld [vmem:[%s6089_s20 + $0x60] sm:$0xff] }
 0x198   : > { %1294 = vrot.lane.b32.xlu1 %v5324_v60, %s6037_s27  ;;  %1292 = vrot.lane.b32.xlu0 %v5323_v8, %s6037_s27  ;;  %v5330_v8 = vld [vmem:[%s6089_s20 + $0x99] sm:$0xff] }
 0x19a   : > { %v7043_v39 = vpop.permute.xlu1 %1054  ;;  %v7045_v61 = vpop.permute.xlu0 %1052 }
 0x19b   : > { %10483 = vst [vmem:[#allocation61_spill] sm:$0xff] %v7043_v39  ;;  %10484 = vst [vmem:[#allocation62_spill] sm:$0xff] %v7045_v61 }
 0x19c   : > { %1298 = vrot.lane.b32.xlu1 %v5326_v10, %s6037_s27  ;;  %1296 = vrot.lane.b32.xlu0 %v5325_v58, %s6037_s27  ;;  %v5332_v58 = vld [vmem:[%s6089_s20 + $0xb1] sm:$0xff]  ;;  %v5331_v10 = vld [vmem:[%s6089_s20 + $0xa9] sm:$0xff] }
 0x19e   : > { %v7051_v7 = vpop.permute.xlu1 %1058  ;;  %v7053_v60 = vpop.permute.xlu0 %1056 }
 0x19f   : > { %10485 = vst [vmem:[#allocation65_spill] sm:$0xff] %v7051_v7  ;;  %10486 = vst [vmem:[#allocation66_spill] sm:$0xff] %v7053_v60  ;;  %v5357_v7 = vld [vmem:[%s6089_s20 + $0x62] sm:$0xff] }
 0x1a0   : > { %1302 = vrot.lane.b32.xlu1 %v5328_v11, %s6037_s27  ;;  %1300 = vrot.lane.b32.xlu0 %v5327_v38, %s6037_s27  ;;  %v5334_v38 = vld [vmem:[%s6089_s20 + $0xc9] sm:$0xff]  ;;  %v5333_v11 = vld [vmem:[%s6089_s20 + $0xc1] sm:$0xff] }
 0x1a2   : > { %v7059_v12 = vpop.permute.xlu1 %1062  ;;  %v7061_v46 = vpop.permute.xlu0 %1060 }
 0x1a3   : > { %10487 = vst [vmem:[#allocation119_spill] sm:$0xff] %v7059_v12  ;;  %10488 = vst [vmem:[#allocation120_spill] sm:$0xff] %v7061_v46 }
 0x1a4   : > { %1306 = vrot.lane.b32.xlu1 %v5330_v8, %s6037_s27  ;;  %1304 = vrot.lane.b32.xlu0 %v5329_v6, %s6037_s27  ;;  %v1776_v6 = vld [vmem:[%s10128_s1] sm:$0xff]  ;;  %v1777_v8 = vld [vmem:[%s10128_s1 + $0x8] sm:$0xff] }
 0x1a6   : > { %v7067_v37 = vpop.permute.xlu1 %1066  ;;  %v7069_v36 = vpop.permute.xlu0 %1064 }
 0x1a7   : > { %10489 = vst [vmem:[#allocation121_spill] sm:$0xff] %v7067_v37  ;;  %10490 = vst [vmem:[#allocation122_spill] sm:$0xff] %v7069_v36  ;;  %v5715_v36 = vpack.c.bf16 %v1777_v8, %v1776_v6  ;;  %v1778_v37 = vld [vmem:[%s10128_s1 + $0x10] sm:$0xff]  ;;  %v1779_v6 = vld [vmem:[%s10128_s1 + $0x18] sm:$0xff] }
 0x1a8   : > { %1310 = vrot.lane.b32.xlu1 %v5332_v58, %s6037_s27  ;;  %1308 = vrot.lane.b32.xlu0 %v5331_v10, %s6037_s27  ;;  %v5336_v58 = vld [vmem:[%s6089_s20 + $0xe1] sm:$0xff]  ;;  %v5335_v10 = vld [vmem:[%s6089_s20 + $0xd9] sm:$0xff] }
 0x1a9   : > { %5716 = vmatprep.subr.bf16.mxu0 %v5715_v36  ;;  %v5337_v8 = vld [vmem:[%s6089_s20 + $0xf1] sm:$0xff] }
 0x1aa   : > { %v7075_v12 = vpop.permute.xlu1 %1070  ;;  %v7077_v46 = vpop.permute.xlu0 %1068  ;;  %5718 = vmatpush3.bf16.msra.mxu0 %v5715_v36 }
 0x1ab   : > { %10491 = vst [vmem:[#allocation123_spill] sm:$0xff] %v7075_v12  ;;  %10492 = vst [vmem:[#allocation124_spill] sm:$0xff] %v7077_v46 }
 0x1ac   : > { %1314 = vrot.lane.b32.xlu1 %v5334_v38, %s6037_s27  ;;  %1312 = vrot.lane.b32.xlu0 %v5333_v11, %s6037_s27  ;;  %v5719_v38 = vpack.c.bf16 %v1779_v6, %v1778_v37  ;;  %v5338_v11 = vld [vmem:[%s6089_s20 + $0xf9] sm:$0xff]  ;;  %v1781_v37 = vld [vmem:[%s10128_s1 + $0x28] sm:$0xff] }
 0x1ad   : > { %v5339_v6 = vld [vmem:[%s6089_s20 + $0x109] sm:$0xff] }
 0x1ae   : > { %v7089_v12 = vpop.permute.xlu1 %1074  ;;  %v7091_v46 = vpop.permute.xlu0 %1072  ;;  %5720 = vmatprep.subr.bf16.mxu0 %v5719_v38 }
 0x1af   : > { %10493 = vst [vmem:[#allocation125_spill] sm:$0xff] %v7089_v12  ;;  %10494 = vst [vmem:[#allocation126_spill] sm:$0xff] %v7091_v46  ;;  %5722 = vmatpush3.bf16.msra.mxu0 %v5719_v38  ;;  %v1780_v12 = vld [vmem:[%s10128_s1 + $0x20] sm:$0xff] }
 0x1b0   : > { %1318 = vrot.lane.b32.xlu1 %v5336_v58, %s6037_s27  ;;  %1316 = vrot.lane.b32.xlu0 %v5335_v10, %s6037_s27  ;;  %v5723_v58 = vpack.c.bf16 %v1781_v37, %v1780_v12  ;;  %v5340_v10 = vld [vmem:[%s6089_s20 + $0x111] sm:$0xff]  ;;  %v5341_v37 = vld [vmem:[%s6089_s20 + $0x121] sm:$0xff] }
 0x1b1   : > { %v1783_v12 = vld [vmem:[%s10128_s1 + $0x38] sm:$0xff] }
 0x1b2   : > { %v7103_v46 = vpop.permute.xlu1 %1078  ;;  %v7105_v36 = vpop.permute.xlu0 %1076  ;;  %5724 = vmatprep.subr.bf16.mxu0 %v5723_v58 }
 0x1b3   : > { %10495 = vst [vmem:[#allocation127_spill] sm:$0xff] %v7103_v46  ;;  %10496 = vst [vmem:[#allocation128_spill] sm:$0xff] %v7105_v36  ;;  %5726 = vmatpush3.bf16.msra.mxu0 %v5723_v58  ;;  %v1782_v46 = vld [vmem:[%s10128_s1 + $0x30] sm:$0xff] }
 0x1b4   : > { %1322 = vrot.lane.b32.xlu1 %v5338_v11, %s6037_s27  ;;  %1320 = vrot.lane.b32.xlu0 %v5337_v8, %s6037_s27  ;;  %v5727_v11 = vpack.c.bf16 %v1783_v12, %v1782_v46  ;;  %v5342_v8 = vld [vmem:[%s6089_s20 + $0x129] sm:$0xff]  ;;  %v5343_v12 = vld [vmem:[%s6089_s20 + $0x139] sm:$0xff] }
 0x1b5   : > { %v1785_v46 = vld [vmem:[%s10128_s1 + $0x48] sm:$0xff] }
 0x1b6   : > { %v7117_v36 = vpop.permute.xlu1 %1082  ;;  %v7119_v38 = vpop.permute.xlu0 %1080  ;;  %5728 = vmatprep.subr.bf16.mxu0 %v5727_v11 }
 0x1b7   : > { %10497 = vst [vmem:[#allocation129_spill] sm:$0xff] %v7117_v36  ;;  %10498 = vst [vmem:[#allocation130_spill] sm:$0xff] %v7119_v38  ;;  %5730 = vmatpush3.bf16.msra.mxu0 %v5727_v11  ;;  %v1784_v36 = vld [vmem:[%s10128_s1 + $0x40] sm:$0xff] }
 0x1b8   : > { %1326 = vrot.lane.b32.xlu1 %v5340_v10, %s6037_s27  ;;  %1324 = vrot.lane.b32.xlu0 %v5339_v6, %s6037_s27  ;;  %v5731_v10 = vpack.c.bf16 %v1785_v46, %v1784_v36  ;;  %v5344_v6 = vld [vmem:[%s6089_s20 + $0x141] sm:$0xff]  ;;  %v1787_v36 = vld [vmem:[%s10128_s1 + $0x58] sm:$0xff] }
 0x1b9   : > { %v5345_v46 = vld [vmem:[%s6089_s20 + $0x151] sm:$0xff] }
 0x1ba   : > { %v7131_v38 = vpop.permute.xlu1 %1086  ;;  %v7133_v58 = vpop.permute.xlu0 %1084  ;;  %5732 = vmatprep.subr.bf16.mxu0 %v5731_v10 }
 0x1bb   : > { %10499 = vst [vmem:[#allocation131_spill] sm:$0xff] %v7131_v38  ;;  %10500 = vst [vmem:[#allocation132_spill] sm:$0xff] %v7133_v58  ;;  %5734 = vmatpush3.bf16.msra.mxu0 %v5731_v10  ;;  %v1786_v38 = vld [vmem:[%s10128_s1 + $0x50] sm:$0xff] }
 0x1bc   : > { %1330 = vrot.lane.b32.xlu1 %v5342_v8, %s6037_s27  ;;  %1328 = vrot.lane.b32.xlu0 %v5341_v37, %s6037_s27  ;;  %v5735_v8 = vpack.c.bf16 %v1787_v36, %v1786_v38  ;;  %v5346_v37 = vld [vmem:[%s6089_s20 + $0x159] sm:$0xff]  ;;  %v1789_v38 = vld [vmem:[%s10128_s1 + $0x68] sm:$0xf] }
 0x1bd   : > { %v5347_v36 = vld [vmem:[%s6089_s20 + $0x169] sm:$0xff] }
 0x1be   : > { %v7145_v58 = vpop.permute.xlu1 %1090  ;;  %v7147_v11 = vpop.permute.xlu0 %1088  ;;  %5736 = vmatprep.subr.bf16.mxu0 %v5735_v8 }
 0x1bf   : > { %10501 = vst [vmem:[#allocation133_spill] sm:$0xff] %v7145_v58  ;;  %10502 = vst [vmem:[#allocation134_spill] sm:$0xff] %v7147_v11  ;;  %5738 = vmatpush3.bf16.msra.mxu0 %v5735_v8  ;;  %v1788_v58 = vld [vmem:[%s10128_s1 + $0x60] sm:$0xff] }
 0x1c0   : > { %1334 = vrot.lane.b32.xlu1 %v5344_v6, %s6037_s27  ;;  %1332 = vrot.lane.b32.xlu0 %v5343_v12, %s6037_s27  ;;  %v5739_v6 = vpack.c.bf16 %v1789_v38, %v1788_v58  ;;  %v5348_v12 = vld [vmem:[%s6089_s20 + $0x171] sm:$0xff]  ;;  %v5351_v38 = vld [vmem:[%s6089_s20 + $0x199] sm:$0xff] }
 0x1c2   : > { %v7159_v11 = vpop.permute.xlu1 %1094  ;;  %v7161_v10 = vpop.permute.xlu0 %1092  ;;  %5741 = vmatprep.subr.msk.bf16.mxu0 %vm5740_vm2, %v5739_v6 }
 0x1c3   : > { %10503 = vst [vmem:[#allocation135_spill] sm:$0xff] %v7159_v11  ;;  %10504 = vst [vmem:[#allocation136_spill] sm:$0xff] %v7161_v10  ;;  %5744 = vmatpush3.bf16.msk.msra.mxu0 %vm5740_vm2, %v5739_v6  ;;  %vm4158_vm2 = vcmask 457728  }
 0x1c4   : > { %1338 = vrot.lane.b32.xlu1 %v5346_v37, %s6037_s27  ;;  %1336 = vrot.lane.b32.xlu0 %v5345_v46, %s6037_s27  ;;  %v5352_v46 = vld [vmem:[%s6089_s20 + $0x1a1] sm:$0xff] }
 0x1c6   : > { %v7173_v8 = vpop.permute.xlu1 %1162  ;;  %v7175_v10 = vpop.permute.xlu0 %1160 }
 0x1c8   : > { %1342 = vrot.lane.b32.xlu1 %v5348_v12, %s6037_s27  ;;  %1340 = vrot.lane.b32.xlu0 %v5347_v36, %s6037_s27  ;;  %v5354_v12 = vld [vmem:[%s6089_s20 + $0x3a] sm:$0xff]  ;;  %v5353_v36 = vld [vmem:[%s6089_s20 + $0x32] sm:$0xff] }
 0x1ca   : > { %v7179_v58 = vpop.permute.xlu1 %1166  ;;  %v7181_v37 = vpop.permute.xlu0 %1164 }
 0x1cc   : > { %1346 = vrot.lane.b32.xlu1 %v6750_v26, %s6037_s27  ;;  %1344 = vrot.lane.b32.xlu0 %v6753_v27, %s6037_s27  ;;  %v5356_v27 = vld [vmem:[%s6089_s20 + $0x52] sm:$0xff] }
 0x1ce   : > { %v7189_v11 = vpop.permute.xlu1 %1170  ;;  %v7191_v6 = vpop.permute.xlu0 %1168 }
 0x1d0   : > { %1350 = vrot.lane.b32.xlu1 %v5352_v46, %s6037_s27  ;;  %1348 = vrot.lane.b32.xlu0 %v5351_v38, %s6037_s27  ;;  %v5358_v38 = vld [vmem:[%s6089_s20 + $0x6a] sm:$0xff] }
 0x1d2   : > { %v7197_v5 = vpop.permute.xlu1 %1174  ;;  %v7199_v26 = vpop.permute.xlu0 %1172 }
 0x1d4   : > { %1418 = vrot.lane.b32.xlu1 %v5354_v12, %s6039_s10  ;;  %1416 = vrot.lane.b32.xlu0 %v5353_v36, %s6039_s10  ;;  %v5360_v36 = vld [vmem:[%s6089_s20 + $0x82] sm:$0xff] }
 0x1d6   : > { %v7205_v60 = vpop.permute.xlu1 %1178  ;;  %v7207_v46 = vpop.permute.xlu0 %1176 }
 0x1d7   : > { %10505 = vst [vmem:[#allocation137_spill] sm:$0xff] %v7205_v60  ;;  %10506 = vst [vmem:[#allocation138_spill] sm:$0xff] %v7207_v46  ;;  %v10554_v46 = vld [vmem:[#allocation8_spill] sm:$0xff]  ;;  %v10555_v60 = vld [vmem:[#allocation11_spill] sm:$0xff] }
 0x1d8   : > { %1422 = vrot.lane.b32.xlu1 %v5356_v27, %s6039_s10  ;;  %1420 = vrot.lane.b32.xlu0 %v5355_v4, %s6039_s10  ;;  %v5362_v4 = vld [vmem:[%s6089_s20 + $0x9a] sm:$0xff] }
 0x1da   : > { %v7213_v44 = vpop.permute.xlu1 %1182  ;;  %v7215_v12 = vpop.permute.xlu0 %1180 }
 0x1db   : > { %10507 = vst [vmem:[#allocation139_spill] sm:$0xff] %v7213_v44  ;;  %10508 = vst [vmem:[#allocation140_spill] sm:$0xff] %v7215_v12 }
 0x1dc   : > { %1426 = vrot.lane.b32.xlu1 %v5358_v38, %s6039_s10  ;;  %1424 = vrot.lane.b32.xlu0 %v5357_v7, %s6039_s10  ;;  %v5364_v7 = vld [vmem:[%s6089_s20 + $0xb2] sm:$0xff] }
 0x1de   : > { %v7221_v35 = vpop.permute.xlu1 %1186  ;;  %v7223_v27 = vpop.permute.xlu0 %1184 }
 0x1df   : > { %10509 = vst [vmem:[#allocation141_spill] sm:$0xff] %v7221_v35  ;;  %10510 = vst [vmem:[#allocation142_spill] sm:$0xff] %v7223_v27  ;;  %v5363_v35 = vld [vmem:[%s6089_s20 + $0xaa] sm:$0xff] }
 0x1e0   : > { %1430 = vrot.lane.b32.xlu1 %v5360_v36, %s6039_s10  ;;  %1428 = vrot.lane.b32.xlu0 %v5359_v48, %s6039_s10  ;;  %v5366_v48 = vld [vmem:[%s6089_s20 + $0xca] sm:$0xff] }
 0x1e2   : > { %v7229_v12 = vpop.permute.xlu1 %1190  ;;  %v7231_v38 = vpop.permute.xlu0 %1188 }
 0x1e3   : > { %10511 = vst [vmem:[#allocation143_spill] sm:$0xff] %v7229_v12  ;;  %10512 = vst [vmem:[#allocation144_spill] sm:$0xff] %v7231_v38  ;;  %v5365_v12 = vld [vmem:[%s6089_s20 + $0xc2] sm:$0xff] }
 0x1e4   : > { %1434 = vrot.lane.b32.xlu1 %v5362_v4, %s6039_s10  ;;  %1432 = vrot.lane.b32.xlu0 %v5361_v34, %s6039_s10  ;;  %v5368_v34 = vld [vmem:[%s6089_s20 + $0xe2] sm:$0xff] }
 0x1e6   : > { %v7237_v27 = vpop.permute.xlu1 %1194  ;;  %v7239_v36 = vpop.permute.xlu0 %1192 }
 0x1e7   : > { %10513 = vst [vmem:[#allocation145_spill] sm:$0xff] %v7237_v27  ;;  %10514 = vst [vmem:[#allocation146_spill] sm:$0xff] %v7239_v36  ;;  %v5367_v27 = vld [vmem:[%s6089_s20 + $0xda] sm:$0xff] }
 0x1e8   : > { %1438 = vrot.lane.b32.xlu1 %v5364_v7, %s6039_s10  ;;  %1436 = vrot.lane.b32.xlu0 %v5363_v35, %s6039_s10  ;;  %v5370_v35 = vld [vmem:[%s6089_s20 + $0xfa] sm:$0xff] }
 0x1ea   : > { %v7245_v38 = vpop.permute.xlu1 %1198  ;;  %v7247_v4 = vpop.permute.xlu0 %1196 }
 0x1eb   : > { %10515 = vst [vmem:[#allocation147_spill] sm:$0xff] %v7245_v38  ;;  %10516 = vst [vmem:[#allocation148_spill] sm:$0xff] %v7247_v4  ;;  %v5369_v38 = vld [vmem:[%s6089_s20 + $0xf2] sm:$0xff] }
 0x1ec   : > { %1442 = vrot.lane.b32.xlu1 %v5366_v48, %s6039_s10  ;;  %1440 = vrot.lane.b32.xlu0 %v5365_v12, %s6039_s10  ;;  %v5372_v12 = vld [vmem:[%s6089_s20 + $0x112] sm:$0xff] }
 0x1ee   : > { %v7253_v36 = vpop.permute.xlu1 %1202  ;;  %v7255_v7 = vpop.permute.xlu0 %1200 }
 0x1ef   : > { %10517 = vst [vmem:[#allocation149_spill] sm:$0xff] %v7253_v36  ;;  %10518 = vst [vmem:[#allocation150_spill] sm:$0xff] %v7255_v7  ;;  %v5371_v36 = vld [vmem:[%s6089_s20 + $0x10a] sm:$0xff] }
 0x1f0   : > { %1446 = vrot.lane.b32.xlu1 %v5368_v34, %s6039_s10  ;;  %1444 = vrot.lane.b32.xlu0 %v5367_v27, %s6039_s10  ;;  %v5374_v27 = vld [vmem:[%s6089_s20 + $0x12a] sm:$0xff] }
 0x1f2   : > { %v7261_v4 = vpop.permute.xlu1 %1206  ;;  %v7263_v48 = vpop.permute.xlu0 %1204 }
 0x1f3   : > { %10519 = vst [vmem:[#allocation151_spill] sm:$0xff] %v7261_v4  ;;  %10520 = vst [vmem:[#allocation152_spill] sm:$0xff] %v7263_v48  ;;  %v5373_v4 = vld [vmem:[%s6089_s20 + $0x122] sm:$0xff] }
 0x1f4   : > { %1450 = vrot.lane.b32.xlu1 %v5370_v35, %s6039_s10  ;;  %1448 = vrot.lane.b32.xlu0 %v5369_v38, %s6039_s10  ;;  %v5376_v38 = vld [vmem:[%s6089_s20 + $0x142] sm:$0xff] }
 0x1f6   : > { %v7269_v7 = vpop.permute.xlu1 %1210  ;;  %v7271_v34 = vpop.permute.xlu0 %1208 }
 0x1f7   : > { %10521 = vst [vmem:[#allocation153_spill] sm:$0xff] %v7269_v7  ;;  %10522 = vst [vmem:[#allocation154_spill] sm:$0xff] %v7271_v34  ;;  %v5375_v7 = vld [vmem:[%s6089_s20 + $0x13a] sm:$0xff] }
 0x1f8   : > { %1454 = vrot.lane.b32.xlu1 %v5372_v12, %s6039_s10  ;;  %1452 = vrot.lane.b32.xlu0 %v5371_v36, %s6039_s10  ;;  %v5378_v36 = vld [vmem:[%s6089_s20 + $0x15a] sm:$0xff]  ;;  %v5377_v12 = vld [vmem:[%s6089_s20 + $0x152] sm:$0xff] }
 0x1fa   : > { %v7277_v48 = vpop.permute.xlu1 %1214  ;;  %v7279_v35 = vpop.permute.xlu0 %1212 }
 0x1fb   : > { %10523 = vst [vmem:[#allocation155_spill] sm:$0xff] %v7277_v48  ;;  %10524 = vst [vmem:[#allocation156_spill] sm:$0xff] %v7279_v35 }
 0x1fc   : > { %1458 = vrot.lane.b32.xlu1 %v5374_v27, %s6039_s10  ;;  %1456 = vrot.lane.b32.xlu0 %v5373_v4, %s6039_s10  ;;  %v5380_v4 = vld [vmem:[%s6089_s20 + $0x172] sm:$0xff]  ;;  %v5379_v27 = vld [vmem:[%s6089_s20 + $0x16a] sm:$0xff] }
 0x1fe   : > { %v7285_v34 = vpop.permute.xlu1 %1218  ;;  %v7287_v44 = vpop.permute.xlu0 %1216 }
 0x1ff   : > { %10525 = vst [vmem:[#allocation157_spill] sm:$0xff] %v7285_v34  ;;  %10526 = vst [vmem:[#allocation158_spill] sm:$0xff] %v7287_v44 }
 0x200   : > { %1462 = vrot.lane.b32.xlu1 %v5376_v38, %s6039_s10  ;;  %1460 = vrot.lane.b32.xlu0 %v5375_v7, %s6039_s10 }
 0x202   : > { %v7293_v35 = vpop.permute.xlu1 %1222  ;;  %v7295_v48 = vpop.permute.xlu0 %1220 }
 0x203   : > { %10527 = vst [vmem:[#allocation159_spill] sm:$0xff] %v7293_v35  ;;  %10528 = vst [vmem:[#allocation160_spill] sm:$0xff] %v7295_v48 }
 0x204   : > { %1466 = vrot.lane.b32.xlu1 %v5378_v36, %s6039_s10  ;;  %1464 = vrot.lane.b32.xlu0 %v5377_v12, %s6039_s10  ;;  %v5384_v36 = vld [vmem:[%s6089_s20 + $0x1a2] sm:$0xff]  ;;  %v5383_v12 = vld [vmem:[%s6089_s20 + $0x19a] sm:$0xff] }
 0x206   : > { %v7301_v34 = vpop.permute.xlu1 %1290  ;;  %v7303_v44 = vpop.permute.xlu0 %1288 }
 0x208   : > { %1470 = vrot.lane.b32.xlu1 %v5380_v4, %s6039_s10  ;;  %1468 = vrot.lane.b32.xlu0 %v5379_v27, %s6039_s10 }
 0x20a   : > { %v7307_v7 = vpop.permute.xlu1 %1294  ;;  %v7309_v38 = vpop.permute.xlu0 %1292 }
 0x20c   : > { %1474 = vrot.lane.b32.xlu1 %v6884_v59, %s6039_s10  ;;  %1472 = vrot.lane.b32.xlu0 %v6887_v50, %s6039_s10 }
 0x20e   : > { %v7317_v48 = vpop.permute.xlu1 %1298  ;;  %v7319_v35 = vpop.permute.xlu0 %1296 }
 0x210   : > { %1478 = vrot.lane.b32.xlu1 %v5384_v36, %s6039_s10  ;;  %1476 = vrot.lane.b32.xlu0 %v5383_v12, %s6039_s10  ;;  %s6045_s10 = smov 40  }
 0x212   : > { %v7323_v4 = vpop.permute.xlu1 %1302  ;;  %v7325_v27 = vpop.permute.xlu0 %1300 }
 0x213   : > { %10529 = vst [vmem:[#allocation161_spill] sm:$0xff] %v7323_v4  ;;  %10530 = vst [vmem:[#allocation162_spill] sm:$0xff] %v7325_v27  ;;  %v5991_v27 = vld [vmem:[%s6089_s20 + $0x98] sm:$0xff]  ;;  %v10566_v4 = vld [vmem:[#allocation23_spill] sm:$0xff] }
 0x216   : > { %v7327_v2 = vpop.permute.xlu1 %1306  ;;  %v7329_v59 = vpop.permute.xlu0 %1304 }
 0x217   : > { %10531 = vst [vmem:[#allocation163_spill] sm:$0xff] %v7327_v2  ;;  %10532 = vst [vmem:[#allocation164_spill] sm:$0xff] %v7329_v59 }
 0x21a   : > { %v7331_v0 = vpop.permute.xlu1 %1310  ;;  %v7333_v50 = vpop.permute.xlu0 %1308 }
 0x21b   : > { %10533 = vst [vmem:[#allocation165_spill] sm:$0xff] %v7331_v0  ;;  %10534 = vst [vmem:[#allocation166_spill] sm:$0xff] %v7333_v50 }
 0x21e   : > { %v7335_v61 = vpop.permute.xlu1 %1314  ;;  %v7337_v39 = vpop.permute.xlu0 %1312 }
 0x21f   : > { %10535 = vst [vmem:[#allocation167_spill] sm:$0xff] %v7335_v61  ;;  %10536 = vst [vmem:[#allocation168_spill] sm:$0xff] %v7337_v39 }
 0x222   : > { %v7339_v36 = vpop.permute.xlu1 %1318  ;;  %v7341_v12 = vpop.permute.xlu0 %1316 }
 0x223   : > { %10537 = vst [vmem:[#allocation169_spill] sm:$0xff] %v7339_v36  ;;  %10538 = vst [vmem:[#allocation170_spill] sm:$0xff] %v7341_v12  ;;  %v5982_v36 = vld [vmem:[%s6089_s20 + $0x20] sm:$0xff] }
 0x224   : > { %v1516_v19 = vsel %vm1512_vm3, %v5982_v36, %v10553_v18  ;;  %v5986_v36 = vld [vmem:[%s6089_s20 + $0x48] sm:$0xff] }
 0x226   : > { %v7343_v14 = vpop.permute.xlu1 %1322  ;;  %v7345_v15 = vpop.permute.xlu0 %1320 }
 0x227   : > { %10539 = vst [vmem:[#allocation171_spill] sm:$0xff] %v7343_v14  ;;  %10540 = vst [vmem:[#allocation172_spill] sm:$0xff] %v7345_v15  ;;  %v198_v15 = vld [vmem:[%s6089_s20] sm:$0xff] }
 0x22a   : > { %v7347_v59 = vpop.permute.xlu1 %1326  ;;  %v7349_v0 = vpop.permute.xlu0 %1324 }
 0x22b   : > { %10541 = vst [vmem:[#allocation173_spill] sm:$0xff] %v7347_v59  ;;  %10542 = vst [vmem:[#allocation174_spill] sm:$0xff] %v7349_v0  ;;  %v199_v59 = vld [vmem:[%s6089_s20 + $0x8] sm:$0xff] }
 0x22e   : > { %v7351_v50 = vpop.permute.xlu1 %1330  ;;  %v7353_v61 = vpop.permute.xlu0 %1328 }
 0x22f   : > { %10543 = vst [vmem:[#allocation175_spill] sm:$0xff] %v7351_v50  ;;  %10544 = vst [vmem:[#allocation176_spill] sm:$0xff] %v7353_v61  ;;  %v10551_v61 = vld [vmem:[#allocation3_spill] sm:$0xff] }
 0x232   : > { %v7355_v2 = vpop.permute.xlu1 %1334  ;;  %v7357_v39 = vpop.permute.xlu0 %1332 }
 0x233   : > { %10545 = vst [vmem:[#allocation177_spill] sm:$0xff] %v7355_v2  ;;  %10546 = vst [vmem:[#allocation178_spill] sm:$0xff] %v7357_v39  ;;  %v5981_v2 = vld [vmem:[%s6089_s20 + $0x18] sm:$0xff] }
 0x234   : > { %v1515_v39 = vsel %vm1512_vm3, %v5981_v2, %v10551_v61  ;;  %v10556_v2 = vld [vmem:[#allocation12_spill] sm:$0xff]  ;;  %v5985_v61 = vld [vmem:[%s6089_s20 + $0x50] sm:$0xff] }
 0x236   : > { %v7359_v12 = vpop.permute.xlu1 %1338  ;;  %v7361_v14 = vpop.permute.xlu0 %1336 }
 0x237   : > { %10547 = vst [vmem:[#allocation179_spill] sm:$0xff] %v7359_v12  ;;  %10548 = vst [vmem:[#allocation180_spill] sm:$0xff] %v7361_v14  ;;  %v10552_v12 = vld [vmem:[#allocation4_spill] sm:$0xff] }
 0x238   : > { %v1513_v14 = vsel %vm1512_vm3, %v198_v15, %v10552_v12  ;;  %v7387_v15 = vsel %vm1512_vm3, %v5984_v1, %v10556_v2  ;;  %v10557_v12 = vld [vmem:[#allocation13_spill] sm:$0xff]  ;;  %v10561_v1 = vld [vmem:[#allocation15_spill] sm:$0xff] }
 0x239   : > { %v7392_v18 = vsel %vm1512_vm3, %v5985_v61, %v10557_v12  ;;  %v7406_v2 = vsel %vm1512_vm3, %v5987_v47, %v10561_v1  ;;  %v7411_v61 = vsel %vm1512_vm3, %v5988_v42, %v10562_v16  ;;  %v5989_v12 = vld [vmem:[%s6089_s20 + $0x80] sm:$0xff]  ;;  %v7426_v47 = vsel %vm1512_vm3, %v5991_v27, %v10566_v4  ;;  %v5992_v1 = vld [vmem:[%s6089_s20 + $0x90] sm:$0xff]  ;;  %v10573_v27 = vld [vmem:[#allocation64_spill] sm:$0xff] }
 0x23a   : > { %v7365_v0 = vpop.permute.xlu1 %1342  ;;  %v7367_v50 = vpop.permute.xlu0 %1340  ;;  %10567 = vst [vmem:[#allocation8_spill] sm:$0xff] %v7426_v47  ;;  %v7431_v16 = vsel %vm1512_vm3, %v5992_v1, %v10568_v20  ;;  %v5993_v42 = vld [vmem:[%s6089_s20 + $0xb0] sm:$0xff]  ;;  %v1546_v47 = vsel %vm1545_vm4, %v1513_v14, %v10573_v27  ;;  %v5995_v20 = vld [vmem:[%s6089_s20 + $0xc8] sm:$0xff] }
 0x23b   : > { %10549 = vst [vmem:[#allocation181_spill] sm:$0xff] %v7365_v0  ;;  %10550 = vst [vmem:[#allocation182_spill] sm:$0xff] %v7367_v50  ;;  %v1514_v0 = vsel %vm1512_vm3, %v199_v59, %v10554_v46  ;;  %v5983_v50 = vld [vmem:[%s6089_s20 + $0x38] sm:$0xff]  ;;  %v10558_v46 = vld [vmem:[#allocation14_spill] sm:$0xff] }
 0x23c   : > { %v7382_v63 = vsel %vm1512_vm3, %v5983_v50, %v10555_v60  ;;  %v7397_v59 = vsel %vm1512_vm3, %v5986_v36, %v10558_v46  ;;  %v7416_v36 = vsel %vm1512_vm3, %v5989_v12, %v10563_v17  ;;  %v5990_v46 = vld [vmem:[%s6089_s20 + $0x78] sm:$0xff]  ;;  %10569 = vst [vmem:[#allocation11_spill] sm:$0xff] %v7431_v16  ;;  %v7436_v17 = vsel %vm1512_vm3, %v5993_v42, %v10570_v31  ;;  %v5994_v12 = vld [vmem:[%s6089_s20 + $0xa8] sm:$0xff]  ;;  %v10574_v1 = vld [vmem:[#allocation31_spill] sm:$0xff] }
 0x23d   : > { %v7450_v16 = vsel %vm1512_vm3, %v5995_v20, %v10574_v1  ;;  %v1579_v42 = vsel %vm1578_vm5, %v1546_v47, %v6735_v23  ;;  %v10577_v1 = vld [vmem:[#allocation68_spill] sm:$0xff] }
 0x23e   : > { %v7399_v60 = vpop.permute.xlu1 %1346  ;;  %v7401_v50 = vpop.permute.xlu0 %1344  ;;  %v1612_v20 = vsel %vm1611_vm6, %v1579_v42, %v6869_v55 }
 0x23f   : > { %10559 = vst [vmem:[#allocation3_spill] sm:$0xff] %v7399_v60  ;;  %10560 = vst [vmem:[#allocation4_spill] sm:$0xff] %v7401_v50  ;;  %v10564_v60 = vld [vmem:[#allocation20_spill] sm:$0xff] }
 0x240   : > { %v7421_v50 = vsel %vm1512_vm3, %v5990_v46, %v10564_v60  ;;  %v10571_v60 = vld [vmem:[#allocation28_spill] sm:$0xff] }
 0x241   : > { %10565 = vst [vmem:[#allocation7_spill] sm:$0xff] %v7421_v50  ;;  %v7441_v46 = vsel %vm1512_vm3, %v5994_v12, %v10571_v60  ;;  %v10572_v50 = vld [vmem:[#allocation63_spill] sm:$0xff] }
 0x242   : > { %v1547_v4 = vsel %vm1545_vm4, %v1514_v0, %v10572_v50  ;;  %v7456_v12 = vpop.permute.xlu1 %1350  ;;  %v7458_v60 = vpop.permute.xlu0 %1348  ;;  %v5996_v0 = vld [vmem:[%s6089_s20 + $0xc0] sm:$0xff]  ;;  %v10575_v50 = vld [vmem:[#allocation32_spill] sm:$0xff] }
 0x243   : > { %v1580_v31 = vsel %vm1578_vm5, %v1547_v4, %v6733_v22  ;;  %v7463_v14 = vsel %vm1512_vm3, %v5996_v0, %v10575_v50  ;;  %v10576_v22 = vld [vmem:[#allocation67_spill] sm:$0xff]  ;;  %v1645_v4 = vsel %vm1644_vm7, %v1612_v20, %v7003_v41  ;;  %v1548_v0 = vsel %vm1545_vm4, %v1515_v39, %v10577_v1  ;;  %v5997_v50 = vld [vmem:[%s6089_s20 + $0xe0] sm:$0xff] }
 0x244   : > { %v1613_v27 = vsel %vm1611_vm6, %v1580_v31, %v6867_v54  ;;  %v1549_v23 = vsel %vm1545_vm4, %v1516_v19, %v10576_v22  ;;  %v1678_v19 = vsel %vm1677_vm8, %v1645_v4, %v7175_v10  ;;  %v10582_v22 = vld [vmem:[#allocation70_spill] sm:$0xff] }
 0x245   : > { %v1646_v47 = vsel %vm1644_vm7, %v1613_v27, %v7001_v45  ;;  %v1582_v54 = vsel %vm1578_vm5, %v1549_v23, %v6741_v24  ;;  %v1581_v45 = vsel %vm1578_vm5, %v1548_v0, %v6743_v25  ;;  %v1711_v31 = vsel %vm1710_vm9, %v1678_v19, %v7303_v44 }
 0x246   : > { %v1679_v55 = vsel %vm1677_vm8, %v1646_v47, %v7173_v8  ;;  %v1419_v42 = vpop.permute.xlu1 %1418  ;;  %v1417_v39 = vpop.permute.xlu0 %1416  ;;  %v1615_v24 = vsel %vm1611_vm6, %v1582_v54, %v6875_v57  ;;  %v1614_v8 = vsel %vm1611_vm6, %v1581_v45, %v6877_v52  ;;  %v10581_v52 = vld [vmem:[#allocation69_spill] sm:$0xff]  ;;  %v1550_v23 = vsel %vm1545_vm4, %v7387_v15, %v10582_v22  ;;  %v10585_v54 = vld [vmem:[#allocation36_spill] sm:$0xff]  ;;  %v10594_v22 = vld [vmem:[#allocation162_spill] sm:$0xff] }
 0x247   : > { %v1712_v41 = vsel %vm1710_vm9, %v1679_v55, %v7301_v34  ;;  %v7497_v25 = vsel %vm1743_vm10, %v1711_v31, %v1417_v39  ;;  %v10580_v34 = vld [vmem:[#allocation35_spill] sm:$0xff]  ;;  %v1648_v44 = vsel %vm1644_vm7, %v1615_v24, %v7009_v40  ;;  %v1647_v57 = vsel %vm1644_vm7, %v1614_v8, %v7011_v9  ;;  %v10587_v45 = vld [vmem:[#allocation72_spill] sm:$0xff] }
 0x248   : > { %v7494_v10 = vsel %vm1743_vm10, %v1712_v41, %v1419_v42  ;;  %10579 = vst [vmem:[#allocation13_spill] sm:$0xff] %v7497_v25  ;;  %v7502_v27 = vsel %vm1512_vm3, %v5997_v50, %v10580_v34  ;;  %2315 = vrot.lane.b32.xlu0 %v7497_v25, %s6037_s27  ;;  %v1551_v20 = vsel %vm1545_vm4, %v7382_v63, %v10581_v52  ;;  %v10590_v8 = vld [vmem:[#allocation39_spill] sm:$0xff]  ;;  %v10592_v52 = vld [vmem:[#allocation96_spill] sm:$0xff] }
 0x249   : > { %10578 = vst [vmem:[#allocation12_spill] sm:$0xff] %v7494_v10  ;;  %2317 = vrot.lane.b32.xlu1 %v7494_v10, %s6037_s27  ;;  %v1681_v40 = vsel %vm1677_vm8, %v1648_v44, %v7179_v58  ;;  %v1680_v9 = vsel %vm1677_vm8, %v1647_v57, %v7181_v37  ;;  %5601 = vmatprep.mubr.msk.f32.mxu0 %vm1797_vm11, %v7497_v25  ;;  %v10591_v44 = vld [vmem:[#allocation95_spill] sm:$0xff] }
 0x24a   : > { %v1584_v47 = vsel %vm1578_vm5, %v1551_v20, %v6755_v21  ;;  %v1583_v63 = vsel %vm1578_vm5, %v1550_v23, %v6757_v28  ;;  %v1714_v4 = vsel %vm1710_vm9, %v1681_v40, %v7307_v7  ;;  %v1713_v15 = vsel %vm1710_vm9, %v1680_v9, %v7309_v38  ;;  %5602 = vmatmul.mubr.msk.f32.vlgmr.msra.gmra.mrb[0].mxu0 %vm1797_vm11, %v7494_v10  ;;  %v1423_v58 = vpop.permute.xlu1 %1422  ;;  %v1421_v37 = vpop.permute.xlu0 %1420  ;;  %v5998_v7 = vld [vmem:[%s6089_s20 + $0xd8] sm:$0xff]  ;;  %v10596_v40 = vld [vmem:[#allocation6_spill] sm:$0xff] }
 0x24b   : > { %v1617_v1 = vsel %vm1611_vm6, %v1584_v47, %v6889_v49  ;;  %v1616_v21 = vsel %vm1611_vm6, %v1583_v63, %v6891_v51  ;;  %v7539_v0 = vsel %vm1743_vm10, %v1714_v4, %v1423_v58  ;;  %v7542_v28 = vsel %vm1743_vm10, %v1713_v15, %v1421_v37  ;;  %v10586_v51 = vld [vmem:[#allocation71_spill] sm:$0xff]  ;;  %v10599_v15 = vld [vmem:[#allocation40_spill] sm:$0xff]  ;;  %v10600_v37 = vld [vmem:[#allocation57_spill] sm:$0xff] }
 0x24c   : > { %10583 = vst [vmem:[#allocation14_spill] sm:$0xff] %v7539_v0  ;;  %10584 = vst [vmem:[#allocation15_spill] sm:$0xff] %v7542_v28  ;;  %v7547_v38 = vsel %vm1512_vm3, %v5998_v7, %v10585_v54  ;;  %v1650_v55 = vsel %vm1644_vm7, %v1617_v1, %v7019_v13  ;;  %v1649_v49 = vsel %vm1644_vm7, %v1616_v21, %v7021_v33  ;;  %2319 = vrot.lane.b32.xlu0 %v7542_v28, %s6037_s27  ;;  %v6000_v4 = vld [vmem:[%s6089_s20 + $0xf0] sm:$0xff]  ;;  %v10601_v21 = vld [vmem:[#allocation58_spill] sm:$0xff] }
 0x24d   : > { %2321 = vrot.lane.b32.xlu1 %v7539_v0, %s6037_s27  ;;  %v1553_v19 = vsel %vm1545_vm4, %v7392_v18, %v10586_v51  ;;  %v1552_v41 = vsel %vm1545_vm4, %v7397_v59, %v10587_v45  ;;  %v1683_v13 = vsel %vm1677_vm8, %v1650_v55, %v7189_v11  ;;  %v1682_v33 = vsel %vm1677_vm8, %v1649_v49, %v7191_v6  ;;  %v10602_v54 = vld [vmem:[#allocation73_spill] sm:$0xff]  ;;  %v10603_v49 = vld [vmem:[#allocation74_spill] sm:$0xff]  ;;  %v10604_v51 = vld [vmem:[#allocation7_spill] sm:$0xff] }
 0x24e   : > { %5604 = vmatprep.mubr.msk.f32.mxu0 %vm1797_vm11, %v7542_v28  ;;  %v1586_v31 = vsel %vm1578_vm5, %v1553_v19, %v6763_v29  ;;  %v1585_v18 = vsel %vm1578_vm5, %v1552_v41, %v6765_v30  ;;  %v1716_v42 = vsel %vm1710_vm9, %v1683_v13, %v7317_v48  ;;  %v1715_v59 = vsel %vm1710_vm9, %v1682_v33, %v7319_v35  ;;  %v1427_v11 = vpop.permute.xlu1 %1426  ;;  %v1425_v6 = vpop.permute.xlu0 %1424  ;;  %v5999_v48 = vld [vmem:[%s6089_s20 + $0xf8] sm:$0xff]  ;;  %v10605_v45 = vld [vmem:[#allocation137_spill] sm:$0xff]  ;;  %v10606_v13 = vld [vmem:[#allocation138_spill] sm:$0xff] }
 0x24f   : > { %5605 = vmatmul.mubr.msk.f32.gmra.mrb[2].mxu0 %vm1797_vm11, %v7539_v0  ;;  %v1619_v39 = vsel %vm1611_vm6, %v1586_v31, %v6897_v56  ;;  %v1618_v29 = vsel %vm1611_vm6, %v1585_v18, %v6899_v53  ;;  %v7584_v24 = vsel %vm1743_vm10, %v1716_v42, %v1427_v11  ;;  %v7587_v30 = vsel %vm1743_vm10, %v1715_v59, %v1425_v6  ;;  %v10607_v31 = vld [vmem:[#allocation97_spill] sm:$0xff]  ;;  %v10608_v42 = vld [vmem:[#allocation98_spill] sm:$0xff]  ;;  %v10609_v59 = vld [vmem:[#allocation163_spill] sm:$0xff] }
 0x250   : > { %10588 = vst [vmem:[#allocation16_spill] sm:$0xff] %v7584_v24  ;;  %10589 = vst [vmem:[#allocation19_spill] sm:$0xff] %v7587_v30  ;;  %v7592_v35 = vsel %vm1512_vm3, %v5999_v48, %v10590_v8  ;;  %v1652_v50 = vsel %vm1644_vm7, %v1619_v39, %v7027_v43  ;;  %v1651_v56 = vsel %vm1644_vm7, %v1618_v29, %v7029_v3  ;;  %2323 = vrot.lane.b32.xlu0 %v7587_v30, %s6037_s27  ;;  %v10610_v6 = vld [vmem:[#allocation164_spill] sm:$0xff]  ;;  %v10611_v8 = vld [vmem:[#allocation9_spill] sm:$0xff] }
 0x251   : > { %2325 = vrot.lane.b32.xlu1 %v7584_v24, %s6037_s27  ;;  %v1555_v53 = vsel %vm1545_vm4, %v7406_v2, %v6637_v32  ;;  %v1554_v34 = vsel %vm1545_vm4, %v7411_v61, %v6639_v62  ;;  %v1685_v43 = vsel %vm1677_vm8, %v1652_v50, %v7197_v5  ;;  %v1684_v3 = vsel %vm1677_vm8, %v1651_v56, %v7199_v26  ;;  %v10593_v2 = vld [vmem:[#allocation161_spill] sm:$0xff]  ;;  %v10612_v56 = vld [vmem:[#allocation10_spill] sm:$0xff] }
 0x252   : > { %5607 = vmatprep.mubr.msk.f32.mxu0 %vm1797_vm11, %v7587_v30  ;;  %v1588_v57 = vsel %vm1578_vm5, %v1555_v53, %v10591_v44  ;;  %v1587_v32 = vsel %vm1578_vm5, %v1554_v34, %v10592_v52  ;;  %v1718_v20 = vsel %vm1710_vm9, %v1685_v43, %v10593_v2  ;;  %v1717_v62 = vsel %vm1710_vm9, %v1684_v3, %v10594_v22  ;;  %v1431_v5 = vpop.permute.xlu1 %1430  ;;  %v1429_v26 = vpop.permute.xlu0 %1428  ;;  %v10595_v61 = vld [vmem:[#allocation5_spill] sm:$0xff]  ;;  %v6001_v3 = vld [vmem:[%s6089_s20 + $0x110] sm:$0xff]  ;;  %v10617_v2 = vld [vmem:[#allocation62_spill] sm:$0xff] }
 0x253   : > { %5608 = vmatmul.mubr.msk.f32.gmra.mrb[4].mxu0 %vm1797_vm11, %v7584_v24  ;;  %v1621_v23 = vsel %vm1611_vm6, %v1588_v57, %v10595_v61  ;;  %v1620_v9 = vsel %vm1611_vm6, %v1587_v32, %v10596_v40  ;;  %v7629_v47 = vsel %vm1743_vm10, %v1718_v20, %v1431_v5  ;;  %v7632_v63 = vsel %vm1743_vm10, %v1717_v62, %v1429_v26  ;;  %v10615_v44 = vld [vmem:[#allocation43_spill] sm:$0xff]  ;;  %v10616_v52 = vld [vmem:[#allocation61_spill] sm:$0xff]  ;;  %v10619_v62 = vld [vmem:[#allocation8_spill] sm:$0xff] }
 0x254   : > { %10597 = vst [vmem:[#allocation20_spill] sm:$0xff] %v7629_v47  ;;  %10598 = vst [vmem:[#allocation23_spill] sm:$0xff] %v7632_v63  ;;  %v7637_v58 = vsel %vm1512_vm3, %v6000_v4, %v10599_v15  ;;  %v1654_v1 = vsel %vm1644_vm7, %v1621_v23, %v10600_v37  ;;  %v1653_v7 = vsel %vm1644_vm7, %v1620_v9, %v10601_v21  ;;  %2327 = vrot.lane.b32.xlu0 %v7632_v63, %s6037_s27  ;;  %v10618_v22 = vld [vmem:[#allocation75_spill] sm:$0xff]  ;;  %v10620_v26 = vld [vmem:[#allocation76_spill] sm:$0xff] }
 0x255   : > { %2329 = vrot.lane.b32.xlu1 %v7629_v47, %s6037_s27  ;;  %v1557_v55 = vsel %vm1545_vm4, %v7416_v36, %v10602_v54  ;;  %v1556_v19 = vsel %vm1545_vm4, %v10604_v51, %v10603_v49  ;;  %v1687_v41 = vsel %vm1677_vm8, %v1654_v1, %v10605_v45  ;;  %v1686_v33 = vsel %vm1677_vm8, %v1653_v7, %v10606_v13  ;;  %v10621_v61 = vld [vmem:[#allocation11_spill] sm:$0xff]  ;;  %v10623_v4 = vld [vmem:[#allocation140_spill] sm:$0xff]  ;;  %v10626_v54 = vld [vmem:[#allocation165_spill] sm:$0xff] }
 0x256   : > { %5610 = vmatprep.mubr.msk.f32.mxu0 %vm1797_vm11, %v7632_v63  ;;  %v1590_v18 = vsel %vm1578_vm5, %v1557_v55, %v10607_v31  ;;  %v1589_v36 = vsel %vm1578_vm5, %v1556_v19, %v10608_v42  ;;  %v1720_v11 = vsel %vm1710_vm9, %v1687_v41, %v10609_v59  ;;  %v1719_v39 = vsel %vm1710_vm9, %v1686_v33, %v10610_v6  ;;  %v1435_v29 = vpop.permute.xlu1 %1434  ;;  %v1433_v48 = vpop.permute.xlu0 %1432  ;;  %v10622_v40 = vld [vmem:[#allocation139_spill] sm:$0xff]  ;;  %v10625_v21 = vld [vmem:[#allocation100_spill] sm:$0xff]  ;;  %v10627_v49 = vld [vmem:[#allocation166_spill] sm:$0xff] }
 0x257   : > { %5611 = vmatmul.mubr.msk.f32.gmra.mrb[6].mxu0 %vm1797_vm11, %v7629_v47  ;;  %v1623_v50 = vsel %vm1611_vm6, %v1590_v18, %v10611_v8  ;;  %v1622_v53 = vsel %vm1611_vm6, %v1589_v36, %v10612_v56  ;;  %v7674_v34 = vsel %vm1743_vm10, %v1720_v11, %v1435_v29  ;;  %v7677_v43 = vsel %vm1743_vm10, %v1719_v39, %v1433_v48  ;;  %v10624_v37 = vld [vmem:[#allocation99_spill] sm:$0xff]  ;;  %v10628_v41 = vld [vmem:[#allocation17_spill] sm:$0xff]  ;;  %v10629_v33 = vld [vmem:[#allocation18_spill] sm:$0xff] }
 0x258   : > { %10613 = vst [vmem:[#allocation24_spill] sm:$0xff] %v7674_v34  ;;  %10614 = vst [vmem:[#allocation27_spill] sm:$0xff] %v7677_v43  ;;  %v7682_v57 = vsel %vm1512_vm3, %v6001_v3, %v10615_v44  ;;  %v1656_v32 = vsel %vm1644_vm7, %v1623_v50, %v10616_v52  ;;  %v1655_v20 = vsel %vm1644_vm7, %v1622_v53, %v10617_v2  ;;  %2331 = vrot.lane.b32.xlu0 %v7677_v43, %s6037_s27  ;;  %v6002_v36 = vld [vmem:[%s6089_s20 + $0x108] sm:$0xff]  ;;  %v10632_v59 = vld [vmem:[#allocation44_spill] sm:$0xff] }
 0x259   : > { %2333 = vrot.lane.b32.xlu1 %v7674_v34, %s6037_s27  ;;  %v1559_v5 = vsel %vm1545_vm4, %v10619_v62, %v10618_v22  ;;  %v1558_v23 = vsel %vm1545_vm4, %v10621_v61, %v10620_v26  ;;  %v1689_v9 = vsel %vm1677_vm8, %v1656_v32, %v10622_v40  ;;  %v1688_v15 = vsel %vm1677_vm8, %v1655_v20, %v10623_v4  ;;  %v10633_v6 = vld [vmem:[#allocation65_spill] sm:$0xff]  ;;  %v10634_v29 = vld [vmem:[#allocation66_spill] sm:$0xff]  ;;  %v10641_v62 = vld [vmem:[#allocation167_spill] sm:$0xff] }
 0x25a   : > { %5613 = vmatprep.mubr.msk.f32.mxu0 %vm1797_vm11, %v7677_v43  ;;  %v1592_v1 = vsel %vm1578_vm5, %v1559_v5, %v10624_v37  ;;  %v1591_v7 = vsel %vm1578_vm5, %v1558_v23, %v10625_v21  ;;  %v1722_v55 = vsel %vm1710_vm9, %v1689_v9, %v10626_v54  ;;  %v1721_v51 = vsel %vm1710_vm9, %v1688_v15, %v10627_v49  ;;  %v1439_v19 = vpop.permute.xlu1 %1438  ;;  %v1437_v45 = vpop.permute.xlu0 %1436  ;;  %v10635_v8 = vld [vmem:[#allocation77_spill] sm:$0xff]  ;;  %v10636_v56 = vld [vmem:[#allocation78_spill] sm:$0xff]  ;;  %v10642_v26 = vld [vmem:[#allocation168_spill] sm:$0xff] }
 0x25b   : > { %5614 = vmatmul.mubr.msk.f32.gmra.mrb[8].mxu0 %vm1797_vm11, %v7674_v34  ;;  %v1625_v13 = vsel %vm1611_vm6, %v1592_v1, %v10628_v41  ;;  %v1624_v31 = vsel %vm1611_vm6, %v1591_v7, %v10629_v33  ;;  %v7719_v18 = vsel %vm1743_vm10, %v1722_v55, %v1439_v19  ;;  %v7722_v42 = vsel %vm1743_vm10, %v1721_v51, %v1437_v45  ;;  %v10637_v3 = vld [vmem:[#allocation141_spill] sm:$0xff]  ;;  %v10638_v52 = vld [vmem:[#allocation142_spill] sm:$0xff]  ;;  %v10647_v7 = vld [vmem:[#allocation47_spill] sm:$0xff] }
 0x25c   : > { %10630 = vst [vmem:[#allocation28_spill] sm:$0xff] %v7719_v18  ;;  %10631 = vst [vmem:[#allocation63_spill] sm:$0xff] %v7722_v42  ;;  %v7727_v11 = vsel %vm1512_vm3, %v6002_v36, %v10632_v59  ;;  %v1658_v39 = vsel %vm1644_vm7, %v1625_v13, %v10633_v6  ;;  %v1657_v48 = vsel %vm1644_vm7, %v1624_v31, %v10634_v29  ;;  %2335 = vrot.lane.b32.xlu0 %v7722_v42, %s6037_s27  ;;  %v10639_v2 = vld [vmem:[#allocation101_spill] sm:$0xff]  ;;  %v10640_v22 = vld [vmem:[#allocation102_spill] sm:$0xff] }
 0x25d   : > { %2337 = vrot.lane.b32.xlu1 %v7719_v18, %s6037_s27  ;;  %v1561_v50 = vsel %vm1545_vm4, %v7436_v17, %v10635_v8  ;;  %v1560_v53 = vsel %vm1545_vm4, %v7441_v46, %v10636_v56  ;;  %v1691_v44 = vsel %vm1677_vm8, %v1658_v39, %v10637_v3  ;;  %v1690_v32 = vsel %vm1677_vm8, %v1657_v48, %v10638_v52  ;;  %v10643_v40 = vld [vmem:[#allocation21_spill] sm:$0xff]  ;;  %v10644_v4 = vld [vmem:[#allocation22_spill] sm:$0xff]  ;;  %v10648_v55 = vld [vmem:[#allocation119_spill] sm:$0xff] }
 0x25e   : > { %5616 = vmatprep.mubr.msk.f32.mxu0 %vm1797_vm11, %v7722_v42  ;;  %v1594_v20 = vsel %vm1578_vm5, %v1561_v50, %v10639_v2  ;;  %v1593_v17 = vsel %vm1578_vm5, %v1560_v53, %v10640_v22  ;;  %v1724_v5 = vsel %vm1710_vm9, %v1691_v44, %v10641_v62  ;;  %v1723_v46 = vsel %vm1710_vm9, %v1690_v32, %v10642_v26  ;;  %v1443_v61 = vpop.permute.xlu1 %1442  ;;  %v1441_v23 = vpop.permute.xlu0 %1440  ;;  %v6003_v21 = vld [vmem:[%s6089_s20 + $0x128] sm:$0xff]  ;;  %v10649_v51 = vld [vmem:[#allocation120_spill] sm:$0xff]  ;;  %v10650_v45 = vld [vmem:[#allocation79_spill] sm:$0xff] }
 0x25f   : > { %5617 = vmatmul.mubr.msk.f32.gmra.mrb[10].mxu0 %vm1797_vm11, %v7719_v18  ;;  %v1627_v9 = vsel %vm1611_vm6, %v1594_v20, %v10643_v40  ;;  %v1626_v15 = vsel %vm1611_vm6, %v1593_v17, %v10644_v4  ;;  %v7764_v37 = vsel %vm1743_vm10, %v1724_v5, %v1443_v61  ;;  %v7767_v1 = vsel %vm1743_vm10, %v1723_v46, %v1441_v23  ;;  %v10651_v13 = vld [vmem:[#allocation80_spill] sm:$0xff]  ;;  %v10652_v31 = vld [vmem:[#allocation143_spill] sm:$0xff]  ;;  %v10656_v8 = vld [vmem:[#allocation169_spill] sm:$0xff] }
 0x260   : > { %10645 = vst [vmem:[#allocation64_spill] sm:$0xff] %v7764_v37  ;;  %10646 = vst [vmem:[#allocation31_spill] sm:$0xff] %v7767_v1  ;;  %v7772_v54 = vsel %vm1512_vm3, %v6003_v21, %v10647_v7  ;;  %v1660_v49 = vsel %vm1644_vm7, %v1627_v9, %v10648_v55  ;;  %v1659_v19 = vsel %vm1644_vm7, %v1626_v15, %v10649_v51  ;;  %2339 = vrot.lane.b32.xlu0 %v7767_v1, %s6037_s27  ;;  %v10653_v59 = vld [vmem:[#allocation144_spill] sm:$0xff]  ;;  %v10654_v39 = vld [vmem:[#allocation103_spill] sm:$0xff] }
 0x261   : > { %2341 = vrot.lane.b32.xlu1 %v7764_v37, %s6037_s27  ;;  %v1563_v41 = vsel %vm1545_vm4, %v7450_v16, %v10650_v45  ;;  %v1562_v33 = vsel %vm1545_vm4, %v7463_v14, %v10651_v13  ;;  %v1693_v36 = vsel %vm1677_vm8, %v1660_v49, %v10652_v31  ;;  %v1692_v6 = vsel %vm1677_vm8, %v1659_v19, %v10653_v59  ;;  %v10655_v48 = vld [vmem:[#allocation104_spill] sm:$0xff]  ;;  %v10657_v56 = vld [vmem:[#allocation170_spill] sm:$0xff]  ;;  %v10658_v44 = vld [vmem:[#allocation25_spill] sm:$0xff] }
 0x262   : > { %5619 = vmatprep.mubr.msk.f32.mxu0 %vm1797_vm11, %v7767_v1  ;;  %v1596_v29 = vsel %vm1578_vm5, %v1563_v41, %v10654_v39  ;;  %v1595_v16 = vsel %vm1578_vm5, %v1562_v33, %v10655_v48  ;;  %v1726_v50 = vsel %vm1710_vm9, %v1693_v36, %v10656_v8  ;;  %v1725_v14 = vsel %vm1710_vm9, %v1692_v6, %v10657_v56  ;;  %v1447_v53 = vpop.permute.xlu1 %1446  ;;  %v1445_v3 = vpop.permute.xlu0 %1444  ;;  %v10659_v32 = vld [vmem:[#allocation26_spill] sm:$0xff]  ;;  %v6004_v17 = vld [vmem:[%s6089_s20 + $0x120] sm:$0xff]  ;;  %v10662_v62 = vld [vmem:[#allocation48_spill] sm:$0xff] }
 0x263   : > { %5620 = vmatmul.mubr.msk.f32.gmra.mrb[12].mxu0 %vm1797_vm11, %v7764_v37  ;;  %v1629_v52 = vsel %vm1611_vm6, %v1596_v29, %v10658_v44  ;;  %v1628_v2 = vsel %vm1611_vm6, %v1595_v16, %v10659_v32  ;;  %v7809_v20 = vsel %vm1743_vm10, %v1726_v50, %v1447_v53  ;;  %v7812_v22 = vsel %vm1743_vm10, %v1725_v14, %v1445_v3  ;;  %v10663_v26 = vld [vmem:[#allocation121_spill] sm:$0xff]  ;;  %v10664_v61 = vld [vmem:[#allocation122_spill] sm:$0xff]  ;;  %v10671_v41 = vld [vmem:[#allocation171_spill] sm:$0xff] }
 0x264   : > { %10660 = vst [vmem:[#allocation32_spill] sm:$0xff] %v7809_v20  ;;  %10661 = vst [vmem:[#allocation67_spill] sm:$0xff] %v7812_v22  ;;  %v7817_v5 = vsel %vm1512_vm3, %v6004_v17, %v10662_v62  ;;  %v1662_v46 = vsel %vm1644_vm7, %v1629_v52, %v10663_v26  ;;  %v1661_v23 = vsel %vm1644_vm7, %v1628_v2, %v10664_v61  ;;  %2343 = vrot.lane.b32.xlu0 %v7812_v22, %s6037_s27  ;;  %v10665_v40 = vld [vmem:[#allocation81_spill] sm:$0xff]  ;;  %v10666_v4 = vld [vmem:[#allocation82_spill] sm:$0xff] }
 0x265   : > { %2345 = vrot.lane.b32.xlu1 %v7809_v20, %s6037_s27  ;;  %v1565_v9 = vsel %vm1545_vm4, %v7502_v27, %v10665_v40  ;;  %v1564_v15 = vsel %vm1545_vm4, %v7547_v38, %v10666_v4  ;;  %v10667_v21 = vld [vmem:[#allocation145_spill] sm:$0xff]  ;;  %v10668_v55 = vld [vmem:[#allocation146_spill] sm:$0xff]  ;;  %5622 = vmatprep.mubr.msk.f32.mxu0 %vm1797_vm11, %v7812_v22  ;;  %v10672_v33 = vld [vmem:[#allocation172_spill] sm:$0xff] }
 0x266   : > { %v1695_v7 = vsel %vm1677_vm8, %v1662_v46, %v10667_v21  ;;  %v1694_v49 = vsel %vm1677_vm8, %v1661_v23, %v10668_v55  ;;  %v10669_v51 = vld [vmem:[#allocation105_spill] sm:$0xff]  ;;  %v10670_v45 = vld [vmem:[#allocation106_spill] sm:$0xff]  ;;  %v1451_v31 = vpop.permute.xlu1 %1450  ;;  %v1449_v36 = vpop.permute.xlu0 %1448  ;;  %v10677_v50 = vld [vmem:[#allocation51_spill] sm:$0xff] }
 0x267   : > { %v1598_v19 = vsel %vm1578_vm5, %v1565_v9, %v10669_v51  ;;  %v1597_v27 = vsel %vm1578_vm5, %v1564_v15, %v10670_v45  ;;  %v1728_v13 = vsel %vm1710_vm9, %v1695_v7, %v10671_v41  ;;  %v1727_v38 = vsel %vm1710_vm9, %v1694_v49, %v10672_v33  ;;  %5623 = vmatmul.mubr.msk.f32.gmra.mrb[14].mxu0 %vm1797_vm11, %v7809_v20  ;;  %v10673_v59 = vld [vmem:[#allocation29_spill] sm:$0xff]  ;;  %v10674_v39 = vld [vmem:[#allocation30_spill] sm:$0xff]  ;;  %v10678_v14 = vld [vmem:[#allocation123_spill] sm:$0xff] }
 0x268   : > { %v1631_v6 = vsel %vm1611_vm6, %v1598_v19, %v10673_v59  ;;  %v1630_v29 = vsel %vm1611_vm6, %v1597_v27, %v10674_v39  ;;  %v7854_v48 = vsel %vm1743_vm10, %v1728_v13, %v1451_v31  ;;  %v7857_v16 = vsel %vm1743_vm10, %v1727_v38, %v1449_v36  ;;  %v6005_v8 = vld [vmem:[%s6089_s20 + $0x140] sm:$0xff]  ;;  %v10679_v3 = vld [vmem:[#allocation124_spill] sm:$0xff]  ;;  %v10680_v52 = vld [vmem:[#allocation83_spill] sm:$0xff] }
 0x269   : > { %10675 = vst [vmem:[#allocation68_spill] sm:$0xff] %v7854_v48  ;;  %10676 = vst [vmem:[#allocation35_spill] sm:$0xff] %v7857_v16  ;;  %v7862_v56 = vsel %vm1512_vm3, %v6005_v8, %v10677_v50  ;;  %v1664_v53 = vsel %vm1644_vm7, %v1631_v6, %v10678_v14  ;;  %v1663_v44 = vsel %vm1644_vm7, %v1630_v29, %v10679_v3  ;;  %2349 = vrot.lane.b32.xlu1 %v7854_v48, %s6037_s27  ;;  %v10681_v2 = vld [vmem:[#allocation84_spill] sm:$0xff]  ;;  %v10682_v62 = vld [vmem:[#allocation147_spill] sm:$0xff] }
 0x26a   : > { %2347 = vrot.lane.b32.xlu0 %v7857_v16, %s6037_s27  ;;  %v1567_v32 = vsel %vm1545_vm4, %v7592_v35, %v10680_v52  ;;  %v1566_v17 = vsel %vm1545_vm4, %v7637_v58, %v10681_v2  ;;  %v1697_v26 = vsel %vm1677_vm8, %v1664_v53, %v10682_v62  ;;  %v10683_v46 = vld [vmem:[#allocation148_spill] sm:$0xff]  ;;  %5625 = vmatprep.mubr.msk.f32.mxu0 %vm1797_vm11, %v7857_v16  ;;  %v10684_v23 = vld [vmem:[#allocation107_spill] sm:$0xff]  ;;  %v10686_v4 = vld [vmem:[#allocation173_spill] sm:$0xff]  ;;  %v1455_v7 = vpop.permute.xlu1 %1454  ;;  %v1453_v55 = vpop.permute.xlu0 %1452 }
 0x26b   : > { %v1696_v61 = vsel %vm1677_vm8, %v1663_v44, %v10683_v46  ;;  %v1600_v40 = vsel %vm1578_vm5, %v1567_v32, %v10684_v23  ;;  %v10685_v9 = vld [vmem:[#allocation108_spill] sm:$0xff]  ;;  %v1730_v15 = vsel %vm1710_vm9, %v1697_v26, %v10686_v4  ;;  %v10687_v21 = vld [vmem:[#allocation174_spill] sm:$0xff]  ;;  %5626 = vmatmul.mubr.msk.f32.gmra.mrb[16].mxu0 %vm1797_vm11, %v7854_v48  ;;  %v10688_v49 = vld [vmem:[#allocation33_spill] sm:$0xff] }
 0x26c   : > { %v1599_v35 = vsel %vm1578_vm5, %v1566_v17, %v10685_v9  ;;  %v1729_v58 = vsel %vm1710_vm9, %v1696_v61, %v10687_v21  ;;  %v1633_v51 = vsel %vm1611_vm6, %v1600_v40, %v10688_v49  ;;  %v10689_v19 = vld [vmem:[#allocation34_spill] sm:$0xff]  ;;  %v7899_v27 = vsel %vm1743_vm10, %v1730_v15, %v1455_v7  ;;  %v6006_v13 = vld [vmem:[%s6089_s20 + $0x138] sm:$0xff]  ;;  %v10693_v31 = vld [vmem:[#allocation125_spill] sm:$0xff] }
 0x26d   : > { %v1632_v45 = vsel %vm1611_vm6, %v1599_v35, %v10689_v19  ;;  %10690 = vst [vmem:[#allocation69_spill] sm:$0xff] %v7899_v27  ;;  %v7902_v41 = vsel %vm1743_vm10, %v1729_v58, %v1453_v55  ;;  %v10692_v33 = vld [vmem:[#allocation52_spill] sm:$0xff]  ;;  %v1666_v36 = vsel %vm1644_vm7, %v1633_v51, %v10693_v31  ;;  %v10694_v59 = vld [vmem:[#allocation126_spill] sm:$0xff]  ;;  %2353 = vrot.lane.b32.xlu1 %v7899_v27, %s6037_s27  ;;  %v10695_v39 = vld [vmem:[#allocation85_spill] sm:$0xff] }
 0x26e   : > { %10691 = vst [vmem:[#allocation70_spill] sm:$0xff] %v7902_v41  ;;  %v1539_v38 = vsel %vm1512_vm3, %v6006_v13, %v10692_v33  ;;  %v1665_v6 = vsel %vm1644_vm7, %v1632_v45, %v10694_v59  ;;  %2351 = vrot.lane.b32.xlu0 %v7902_v41, %s6037_s27  ;;  %v1569_v29 = vsel %vm1545_vm4, %v7682_v57, %v10695_v39  ;;  %v10696_v8 = vld [vmem:[#allocation86_spill] sm:$0xff]  ;;  %v10697_v14 = vld [vmem:[#allocation149_spill] sm:$0xff]  ;;  %v10701_v17 = vld [vmem:[#allocation175_spill] sm:$0xff]  ;;  %v1459_v46 = vpop.permute.xlu1 %1458  ;;  %v1457_v61 = vpop.permute.xlu0 %1456 }
 0x26f   : > { %v1568_v50 = vsel %vm1545_vm4, %v7727_v11, %v10696_v8  ;;  %v1699_v53 = vsel %vm1677_vm8, %v1666_v36, %v10697_v14  ;;  %v10698_v3 = vld [vmem:[#allocation150_spill] sm:$0xff]  ;;  %5628 = vmatprep.mubr.msk.f32.mxu0 %vm1797_vm11, %v7902_v41  ;;  %v10699_v52 = vld [vmem:[#allocation109_spill] sm:$0xff]  ;;  %v10702_v26 = vld [vmem:[#allocation176_spill] sm:$0xff] }
 0x270   : > { %v1698_v44 = vsel %vm1677_vm8, %v1665_v6, %v10698_v3  ;;  %v1602_v32 = vsel %vm1578_vm5, %v1569_v29, %v10699_v52  ;;  %v10700_v2 = vld [vmem:[#allocation110_spill] sm:$0xff]  ;;  %v1732_v62 = vsel %vm1710_vm9, %v1699_v53, %v10701_v17  ;;  %5629 = vmatmul.mubr.msk.f32.gmra.mrb[18].mxu0 %vm1797_vm11, %v7899_v27  ;;  %v10703_v23 = vld [vmem:[#allocation37_spill] sm:$0xff]  ;;  %v6007_v21 = vld [vmem:[%s6089_s20 + $0x158] sm:$0xff] }
 0x271   : > { %v1601_v57 = vsel %vm1578_vm5, %v1568_v50, %v10700_v2  ;;  %v1731_v11 = vsel %vm1710_vm9, %v1698_v44, %v10702_v26  ;;  %v1635_v40 = vsel %vm1611_vm6, %v1602_v32, %v10703_v23  ;;  %v10704_v9 = vld [vmem:[#allocation38_spill] sm:$0xff]  ;;  %v7942_v4 = vsel %vm1743_vm10, %v1732_v62, %v1459_v46  ;;  %v10707_v58 = vld [vmem:[#allocation55_spill] sm:$0xff]  ;;  %v10709_v51 = vld [vmem:[#allocation128_spill] sm:$0xff] }
 0x272   : > { %v1634_v35 = vsel %vm1611_vm6, %v1601_v57, %v10704_v9  ;;  %10705 = vst [vmem:[#allocation36_spill] sm:$0xff] %v7942_v4  ;;  %v7945_v15 = vsel %vm1743_vm10, %v1731_v11, %v1457_v61  ;;  %v1542_v7 = vsel %vm1512_vm3, %v6007_v21, %v10707_v58  ;;  %v10708_v55 = vld [vmem:[#allocation127_spill] sm:$0xff]  ;;  %2357 = vrot.lane.b32.xlu1 %v7942_v4, %s6037_s27  ;;  %v10711_v33 = vld [vmem:[#allocation88_spill] sm:$0xff]  ;;  %v10716_v14 = vld [vmem:[#allocation177_spill] sm:$0xff]  ;;  %v1463_v44 = vpop.permute.xlu1 %1462  ;;  %v1461_v52 = vpop.permute.xlu0 %1460 }
 0x273   : > { %10706 = vst [vmem:[#allocation71_spill] sm:$0xff] %v7945_v15  ;;  %v1668_v49 = vsel %vm1644_vm7, %v1635_v40, %v10708_v55  ;;  %v1667_v19 = vsel %vm1644_vm7, %v1634_v35, %v10709_v51  ;;  %2355 = vrot.lane.b32.xlu0 %v7945_v15, %s6037_s27  ;;  %v10710_v45 = vld [vmem:[#allocation87_spill] sm:$0xff]  ;;  %v1570_v31 = vsel %vm1545_vm4, %v7817_v5, %v10711_v33  ;;  %v10713_v6 = vld [vmem:[#allocation152_spill] sm:$0xff]  ;;  %v10717_v3 = vld [vmem:[#allocation178_spill] sm:$0xff] }
 0x274   : > { %v1571_v13 = vsel %vm1545_vm4, %v7772_v54, %v10710_v45  ;;  %v10712_v36 = vld [vmem:[#allocation151_spill] sm:$0xff]  ;;  %v1700_v39 = vsel %vm1677_vm8, %v1667_v19, %v10713_v6  ;;  %5631 = vmatprep.mubr.msk.f32.mxu0 %vm1797_vm11, %v7945_v15  ;;  %v10715_v50 = vld [vmem:[#allocation112_spill] sm:$0xff]  ;;  %v10718_v32 = vld [vmem:[#allocation41_spill] sm:$0xff] }
 0x275   : > { %v1701_v59 = vsel %vm1677_vm8, %v1668_v49, %v10712_v36  ;;  %v10714_v29 = vld [vmem:[#allocation111_spill] sm:$0xff]  ;;  %v1603_v54 = vsel %vm1578_vm5, %v1570_v31, %v10715_v50  ;;  %v1733_v5 = vsel %vm1710_vm9, %v1700_v39, %v10717_v3  ;;  %5632 = vmatmul.mubr.msk.f32.gmra.mrb[20].mxu0 %vm1797_vm11, %v7942_v4  ;;  %v10719_v57 = vld [vmem:[#allocation42_spill] sm:$0xff]  ;;  %v10722_v46 = vld [vmem:[#allocation56_spill] sm:$0xff] }
 0x276   : > { %v1604_v8 = vsel %vm1578_vm5, %v1571_v13, %v10714_v29  ;;  %v1734_v53 = vsel %vm1710_vm9, %v1701_v59, %v10716_v14  ;;  %v1636_v17 = vsel %vm1611_vm6, %v1603_v54, %v10719_v57  ;;  %v7988_v26 = vsel %vm1743_vm10, %v1733_v5, %v1461_v52  ;;  %v6008_v11 = vld [vmem:[%s6089_s20 + $0x150] sm:$0xff]  ;;  %v10723_v23 = vld [vmem:[#allocation129_spill] sm:$0xff]  ;;  %v10724_v9 = vld [vmem:[#allocation130_spill] sm:$0xff]  ;;  %v1467_v29 = vpop.permute.xlu1 %1466 }
 0x277   : > { %v1637_v2 = vsel %vm1611_vm6, %v1604_v8, %v10718_v32  ;;  %v7985_v62 = vsel %vm1743_vm10, %v1734_v53, %v1463_v44  ;;  %10721 = vst [vmem:[#allocation39_spill] sm:$0xff] %v7988_v26  ;;  %v1541_v61 = vsel %vm1512_vm3, %v6008_v11, %v10722_v46  ;;  %v1669_v35 = vsel %vm1644_vm7, %v1636_v17, %v10724_v9  ;;  %v10725_v21 = vld [vmem:[#allocation89_spill] sm:$0xff]  ;;  %v10726_v55 = vld [vmem:[#allocation90_spill] sm:$0xff]  ;;  %v10732_v39 = vld [vmem:[#allocation180_spill] sm:$0xff]  ;;  %v1465_v8 = vpop.permute.xlu0 %1464 }
 0x278   : > { %10720 = vst [vmem:[#allocation72_spill] sm:$0xff] %v7985_v62  ;;  %v1670_v40 = vsel %vm1644_vm7, %v1637_v2, %v10723_v23  ;;  %2361 = vrot.lane.b32.xlu1 %v7985_v62, %s6037_s27  ;;  %2359 = vrot.lane.b32.xlu0 %v7988_v26, %s6037_s27  ;;  %v1573_v58 = vsel %vm1545_vm4, %v7862_v56, %v10725_v21  ;;  %v10727_v51 = vld [vmem:[#allocation153_spill] sm:$0xff]  ;;  %v10728_v45 = vld [vmem:[#allocation154_spill] sm:$0xff]  ;;  %v10731_v56 = vld [vmem:[#allocation179_spill] sm:$0xff] }
 0x279   : > { %v1572_v49 = vsel %vm1545_vm4, %v1539_v38, %v10726_v55  ;;  %v1703_v19 = vsel %vm1677_vm8, %v1670_v40, %v10727_v51  ;;  %v1702_v13 = vsel %vm1677_vm8, %v1669_v35, %v10728_v45  ;;  %5634 = vmatprep.mubr.msk.f32.mxu0 %vm1797_vm11, %v7988_v26  ;;  %v10729_v33 = vld [vmem:[#allocation113_spill] sm:$0xff]  ;;  %v10730_v36 = vld [vmem:[#allocation114_spill] sm:$0xff]  ;;  %v6009_v44 = vld [vmem:[%s6089_s20 + $0x170] sm:$0xff] }
 0x27a   : > { %v1606_v31 = vsel %vm1578_vm5, %v1573_v58, %v10729_v33  ;;  %v1605_v59 = vsel %vm1578_vm5, %v1572_v49, %v10730_v36  ;;  %v1736_v6 = vsel %vm1710_vm9, %v1703_v19, %v10731_v56  ;;  %v1735_v38 = vsel %vm1710_vm9, %v1702_v13, %v10732_v39  ;;  %5635 = vmatmul.mubr.msk.f32.gmra.mrb[22].mxu0 %vm1797_vm11, %v7985_v62  ;;  %v10733_v50 = vld [vmem:[#allocation45_spill] sm:$0xff]  ;;  %v10734_v14 = vld [vmem:[#allocation46_spill] sm:$0xff]  ;;  %v10737_v52 = vld [vmem:[#allocation59_spill] sm:$0xff] }
 0x27b   : > { %v1639_v54 = vsel %vm1611_vm6, %v1606_v31, %v10733_v50  ;;  %v1638_v53 = vsel %vm1611_vm6, %v1605_v59, %v10734_v14  ;;  %v8027_v3 = vsel %vm1743_vm10, %v1736_v6, %v1467_v29  ;;  %v8030_v5 = vsel %vm1743_vm10, %v1735_v38, %v1465_v8  ;;  %v10738_v2 = vld [vmem:[#allocation131_spill] sm:$0xff]  ;;  %v10739_v17 = vld [vmem:[#allocation132_spill] sm:$0xff]  ;;  %v10747_v33 = vld [vmem:[#allocation182_spill] sm:$0xff]  ;;  %v1471_v31 = vpop.permute.xlu1 %1470  ;;  %v1469_v36 = vpop.permute.xlu0 %1468 }
 0x27c   : > { %10735 = vst [vmem:[#allocation95_spill] sm:$0xff] %v8027_v3  ;;  %10736 = vst [vmem:[#allocation96_spill] sm:$0xff] %v8030_v5  ;;  %v1544_v32 = vsel %vm1512_vm3, %v6009_v44, %v10737_v52  ;;  %v1672_v57 = vsel %vm1644_vm7, %v1639_v54, %v10738_v2  ;;  %v1671_v11 = vsel %vm1644_vm7, %v1638_v53, %v10739_v17  ;;  %2365 = vrot.lane.b32.xlu1 %v8027_v3, %s6037_s27  ;;  %v10740_v46 = vld [vmem:[#allocation91_spill] sm:$0xff]  ;;  %v10741_v40 = vld [vmem:[#allocation92_spill] sm:$0xff] }
 0x27d   : > { %2363 = vrot.lane.b32.xlu0 %v8030_v5, %s6037_s27  ;;  %v1575_v23 = vsel %vm1545_vm4, %v1542_v7, %v10740_v46  ;;  %v1574_v9 = vsel %vm1545_vm4, %v1541_v61, %v10741_v40  ;;  %v10742_v35 = vld [vmem:[#allocation155_spill] sm:$0xff]  ;;  %v10743_v58 = vld [vmem:[#allocation156_spill] sm:$0xff]  ;;  %5637 = vmatprep.mubr.msk.f32.mxu0 %vm1797_vm11, %v8030_v5  ;;  %v10746_v7 = vld [vmem:[#allocation181_spill] sm:$0xff] }
 0x27e   : > { %v1705_v21 = vsel %vm1677_vm8, %v1672_v57, %v10742_v35  ;;  %v1704_v55 = vsel %vm1677_vm8, %v1671_v11, %v10743_v58  ;;  %v10744_v49 = vld [vmem:[#allocation115_spill] sm:$0xff]  ;;  %v10745_v19 = vld [vmem:[#allocation116_spill] sm:$0xff]  ;;  %5638 = vmatmul.mubr.msk.f32.gmra.mrb[24].mxu0 %vm1797_vm11, %v8027_v3  ;;  %v10748_v59 = vld [vmem:[#allocation49_spill] sm:$0xff] }
 0x27f   : > { %v1608_v51 = vsel %vm1578_vm5, %v1575_v23, %v10744_v49  ;;  %v1607_v45 = vsel %vm1578_vm5, %v1574_v9, %v10745_v19  ;;  %v1738_v13 = vsel %vm1710_vm9, %v1705_v21, %v10746_v7  ;;  %v1737_v61 = vsel %vm1710_vm9, %v1704_v55, %v10747_v33  ;;  %v10749_v6 = vld [vmem:[#allocation50_spill] sm:$0xff]  ;;  %v10752_v50 = vld [vmem:[#allocation60_spill] sm:$0xff]  ;;  %v10753_v14 = vld [vmem:[#allocation133_spill] sm:$0xff]  ;;  %v1473_v7 = vpop.permute.xlu0 %1472 }
 0x280   : > { %v1641_v56 = vsel %vm1611_vm6, %v1608_v51, %v10748_v59  ;;  %v1640_v39 = vsel %vm1611_vm6, %v1607_v45, %v10749_v6  ;;  %v8068_v38 = vsel %vm1743_vm10, %v1738_v13, %v1471_v31  ;;  %v8071_v29 = vsel %vm1743_vm10, %v1737_v61, %v1469_v36  ;;  %v6010_v8 = vld [vmem:[%s6089_s20 + $0x168] sm:$0xff]  ;;  %v10755_v2 = vld [vmem:[#allocation93_spill] sm:$0xff]  ;;  %v10761_v49 = vld [vmem:[#allocation3_spill] sm:$0xff]  ;;  %v1475_v45 = vpop.permute.xlu1 %1474 }
 0x281   : > { %10750 = vst [vmem:[#allocation161_spill] sm:$0xff] %v8068_v38  ;;  %10751 = vst [vmem:[#allocation162_spill] sm:$0xff] %v8071_v29  ;;  %v1543_v54 = vsel %vm1512_vm3, %v6010_v8, %v10752_v50  ;;  %v1674_v53 = vsel %vm1644_vm7, %v1641_v56, %v10753_v14  ;;  %v10754_v44 = vld [vmem:[#allocation134_spill] sm:$0xff]  ;;  %2369 = vrot.lane.b32.xlu1 %v8068_v38, %s6037_s27  ;;  %2367 = vrot.lane.b32.xlu0 %v8071_v29, %s6037_s27  ;;  %v10757_v46 = vld [vmem:[#allocation157_spill] sm:$0xff]  ;;  %vm4191_vm3 = vcmask 523264  }
 0x282   : > { %v1673_v52 = vsel %vm1644_vm7, %v1640_v39, %v10754_v44  ;;  %v1577_v57 = vsel %vm1545_vm4, %v1544_v32, %v10755_v2  ;;  %v10756_v17 = vld [vmem:[#allocation94_spill] sm:$0xff]  ;;  %v1707_v23 = vsel %vm1677_vm8, %v1674_v53, %v10757_v46  ;;  %5640 = vmatprep.mubr.msk.f32.mxu0 %vm1797_vm11, %v8071_v29  ;;  %v10759_v35 = vld [vmem:[#allocation117_spill] sm:$0xff]  ;;  %v10762_v51 = vld [vmem:[#allocation4_spill] sm:$0xff] }
 0x283   : > { %v1576_v11 = vsel %vm1545_vm4, %v1543_v54, %v10756_v17  ;;  %v10758_v40 = vld [vmem:[#allocation158_spill] sm:$0xff]  ;;  %v1610_v21 = vsel %vm1578_vm5, %v1577_v57, %v10759_v35  ;;  %v1740_v32 = vsel %vm1710_vm9, %v1707_v23, %v10761_v49  ;;  %5641 = vmatmul.mubr.msk.f32.gmra.mrb[26].mxu0 %vm1797_vm11, %v8068_v38  ;;  %v10763_v13 = vld [vmem:[#allocation53_spill] sm:$0xff]  ;;  %v10767_v56 = vld [vmem:[#allocation135_spill] sm:$0xff]  ;;  %v1477_v57 = vpop.permute.xlu0 %1476 }
 0x284   : > { %v1706_v9 = vsel %vm1677_vm8, %v1673_v52, %v10758_v40  ;;  %v10760_v58 = vld [vmem:[#allocation118_spill] sm:$0xff]  ;;  %v1643_v33 = vsel %vm1611_vm6, %v1610_v21, %v10763_v13  ;;  %v8109_v36 = vsel %vm1743_vm10, %v1740_v32, %v1475_v45  ;;  %v10768_v39 = vld [vmem:[#allocation136_spill] sm:$0xff]  ;;  %v10769_v50 = vld [vmem:[#allocation159_spill] sm:$0xff]  ;;  %v1479_v2 = vpop.permute.xlu1 %1478 }
 0x285   : > { %v1609_v55 = vsel %vm1578_vm5, %v1576_v11, %v10760_v58  ;;  %v1739_v19 = vsel %vm1710_vm9, %v1706_v9, %v10762_v51  ;;  %v10764_v61 = vld [vmem:[#allocation54_spill] sm:$0xff]  ;;  %10765 = vst [vmem:[#allocation5_spill] sm:$0xff] %v8109_v36  ;;  %v1676_v6 = vsel %vm1644_vm7, %v1643_v33, %v10767_v56  ;;  %2373 = vrot.lane.b32.xlu1 %v8109_v36, %s6037_s27  ;;  %v10770_v14 = vld [vmem:[#allocation160_spill] sm:$0xff] }
 0x286   : > { %v1642_v31 = vsel %vm1611_vm6, %v1609_v55, %v10764_v61  ;;  %v8112_v59 = vsel %vm1743_vm10, %v1739_v19, %v1473_v7  ;;  %v1709_v54 = vsel %vm1677_vm8, %v1676_v6, %v10769_v50 }
 0x287   : > { %10766 = vst [vmem:[#allocation6_spill] sm:$0xff] %v8112_v59  ;;  %v1675_v8 = vsel %vm1644_vm7, %v1642_v31, %v10768_v39  ;;  %2371 = vrot.lane.b32.xlu0 %v8112_v59, %s6037_s27  ;;  %5643 = vmatprep.mubr.msk.f32.mxu0 %vm1797_vm11, %v8112_v59  ;;  %v1742_v44 = vsel %vm1710_vm9, %v1709_v54, %v7456_v12  ;;  %v8151_v12 = vld [vmem:[%s10130_s3] ss:$0 sm:$0xff] }
 0x288   : > { %v1708_v53 = vsel %vm1677_vm8, %v1675_v8, %v10770_v14  ;;  %5644 = vmatmul.mubr.msk.f32.gmra.mrb[28].mxu0 %vm1797_vm11, %v8109_v36  ;;  %v8135_v17 = vsel %vm1743_vm10, %v1742_v44, %v1479_v2 }
 0x289   : > { %v1741_v52 = vsel %vm1710_vm9, %v1708_v53, %v7458_v60  ;;  %10771 = vst [vmem:[#allocation40_spill] sm:$0xff] %v8135_v17  ;;  %2377 = vrot.lane.b32.xlu1 %v8135_v17, %s6037_s27 }
 0x28a   : > { %v8138_v11 = vsel %vm1743_vm10, %v1741_v52, %v1477_v57 }
 0x28b   : > { %10772 = vst [vmem:[#allocation57_spill] sm:$0xff] %v8138_v11  ;;  %2375 = vrot.lane.b32.xlu0 %v8138_v11, %s6037_s27  ;;  %5646 = vmatprep.mubr.msk.f32.mxu0 %vm1797_vm11, %v8138_v11  ;;  %s6041_s27 = smov 120  }
 0x28c   : > { %5647 = vmatmul.mubr.msk.f32.gmra.mrb[30].mxu0 %vm1797_vm11, %v8135_v17 }
 0x2ba   : > { %v8158_v9 = vpop.permute.xlu0 %2315 }
 0x2bb   : > { %v8153_v60 = vpop.permute.xlu1 %2317 }
 0x2be   : > { %v8174_v7 = vpop.permute.xlu0 %2319 }
 0x2bf   : > { %v8165_v49 = vpop.permute.xlu1 %2321 }
 0x2c2   : > { %v8190_v53 = vpop.permute.xlu0 %2323 }
 0x2c3   : > { %v8183_v6 = vpop.permute.xlu1 %2325 }
 0x31d   : > { %v5603_v46 = vpop.f32.mrb[0].mxu0 }
 0x31e   : > { %v8156_v23 = vadd.f32 %v5603_v46, %v8151_v12  ;;  %v1964_v40 = vpop.f32.mrb[1].mxu0 }
 0x31f   : > { %v8161_v35 = vadd.f32 %v8151_v12, %v1964_v40 }
 0x320   : > { %10773 = vst [vmem:[#allocation58_spill] sm:$0xff] %v8156_v23  ;;  %v5420_v21 = vmul.f32 -1.442695, %v8156_v23 }
 0x321   : > { %10774 = vst [vmem:[#allocation73_spill] sm:$0xff] %v8161_v35  ;;  %v5419_v58 = vmul.f32 -1.442695, %v8161_v35 }
 0x322   : > { %v5606_v55 = vpop.f32.mrb[2].mxu0  ;;  %5789 = vpow2.f32 %v5420_v21 }
 0x323   : > { %v8168_v32 = vadd.f32 %v5606_v55, %v8151_v12  ;;  %v1974_v51 = vpop.f32.mrb[3].mxu0  ;;  %5791 = vpow2.f32 %v5419_v58  ;;  %v8197_v58 = vpop.permute.xlu1 %2329 }
 0x324   : > { %v8171_v19 = vadd.f32 %v8151_v12, %v1974_v51 }
 0x325   : > { %10775 = vst [vmem:[#allocation74_spill] sm:$0xff] %v8168_v32  ;;  %v5422_v45 = vmul.f32 -1.442695, %v8168_v32 }
 0x326   : > { %10776 = vst [vmem:[#allocation7_spill] sm:$0xff] %v8171_v19  ;;  %v5421_v13 = vmul.f32 -1.442695, %v8171_v19  ;;  %v5609_v33 = vpop.f32.mrb[4].mxu0 }
 0x327   : > { %5793 = vpow2.f32 %v5422_v45  ;;  %v8178_v61 = vadd.f32 %v5609_v33, %v8151_v12  ;;  %v1984_v31 = vpop.f32.mrb[5].mxu0 }
 0x328   : > { %5795 = vpow2.f32 %v5421_v13  ;;  %v8181_v56 = vadd.f32 %v8151_v12, %v1984_v31  ;;  %v6040_v13 = vmov 0.0  }
 0x329   : > { %10777 = vst [vmem:[#allocation137_spill] sm:$0xff] %v8178_v61  ;;  %v5424_v39 = vmul.f32 -1.442695, %v8178_v61  ;;  %2445 = vst.msk [vmem:[#allocation2 + $0x8] sm:$0xff] %vm2443_vm12, %v6040_v13 }
 0x32a   : > { %10778 = vst [vmem:[#allocation138_spill] sm:$0xff] %v8181_v56  ;;  %v5423_v8 = vmul.f32 -1.442695, %v8181_v56  ;;  %v5612_v50 = vpop.f32.mrb[6].mxu0  ;;  %2447 = vst.msk [vmem:[#allocation2 + $0x10] sm:$0x3] %vm2446_vm13, %v6040_v13 }
 0x32b   : > { %5797 = vpow2.f32 %v5424_v39  ;;  %v8188_v54 = vadd.f32 %v5612_v50, %v8151_v12  ;;  %v1994_v14 = vpop.f32.mrb[7].mxu0  ;;  %2444 = vst.msk [vmem:[#allocation2] sm:$0xff] %vm2443_vm12, %v6040_v13  ;;  %2449 = vst.msk [vmem:[#allocation2 + $0x198] sm:$0xff] %vm2443_vm12, %v6040_v13  ;;  %v8210_v50 = vpop.permute.xlu0 %2327 }
 0x32c   : > { %5799 = vpow2.f32 %v5423_v8  ;;  %v8193_v44 = vadd.f32 %v8151_v12, %v1994_v14  ;;  %v5790_v52 = vpop.eup %5789  ;;  %2450 = vst.msk [vmem:[#allocation2 + $0x1a0] sm:$0xff] %vm2443_vm12, %v6040_v13 }
 0x32d   : > { %10779 = vst [vmem:[#allocation97_spill] sm:$0xff] %v8188_v54  ;;  %v5426_v2 = vmul.f32 -1.442695, %v8188_v54  ;;  %v5792_v57 = vpop.eup %5791  ;;  %v2220_v46 = vadd.f32 1.0, %v5790_v52  ;;  %2451 = vst.msk [vmem:[#allocation2 + $0x1a8] sm:$0x3] %vm2446_vm13, %v6040_v13 }
 0x32e   : > { %10780 = vst [vmem:[#allocation98_spill] sm:$0xff] %v8193_v44  ;;  %v5425_v40 = vmul.f32 -1.442695, %v8193_v44  ;;  %v5615_v21 = vpop.f32.mrb[8].mxu0  ;;  %v2219_v55 = vadd.f32 1.0, %v5792_v57 }
 0x32f   : > { %5801 = vpow2.f32 %v5426_v2  ;;  %v8200_v51 = vadd.f32 %v5615_v21, %v8151_v12  ;;  %v2004_v45 = vpop.f32.mrb[9].mxu0  ;;  %2471 = vst.msk [vmem:[#allocation2 + $0x11] sm:$0x1] %vm2452_vm14, %v6040_v13  ;;  %2453 = vst.msk [vmem:[#allocation2] sm:$0x1] %vm2452_vm14, %v6040_v13 }
 0x330   : > { %5803 = vrcp.f32 %v2220_v46  ;;  %v8207_v33 = vadd.f32 %v8151_v12, %v2004_v45  ;;  %2454 = vst.msk [vmem:[#allocation2 + $0x18] sm:$0x1] %vm2452_vm14, %v6040_v13  ;;  %2455 = vst.msk [vmem:[#allocation2 + $0x30] sm:$0x1] %vm2452_vm14, %v6040_v13  ;;  %v8255_v45 = vpop.permute.xlu1 %2333 }
 0x331   : > { %10781 = vst [vmem:[#allocation163_spill] sm:$0xff] %v8200_v51  ;;  %v5794_v31 = vpop.eup %5793  ;;  %5805 = vrcp.f32 %v2219_v55  ;;  %v5428_v39 = vmul.f32 -1.442695, %v8200_v51  ;;  %2456 = vst.msk [vmem:[#allocation2 + $0x48] sm:$0x1] %vm2452_vm14, %v6040_v13 }
 0x332   : > { %10782 = vst [vmem:[#allocation164_spill] sm:$0xff] %v8207_v33  ;;  %v5796_v8 = vpop.eup %5795  ;;  %v2222_v14 = vadd.f32 1.0, %v5794_v31  ;;  %5807 = vpow2.f32 %v5425_v40  ;;  %v5427_v52 = vmul.f32 -1.442695, %v8207_v33  ;;  %v5618_v2 = vpop.f32.mrb[10].mxu0 }
 0x333   : > { %v2221_v57 = vadd.f32 1.0, %v5796_v8  ;;  %5809 = vpow2.f32 %v5428_v39  ;;  %v8214_v46 = vadd.f32 %v5618_v2, %v8151_v12  ;;  %v2014_v21 = vpop.f32.mrb[11].mxu0  ;;  %2457 = vst.msk [vmem:[#allocation2 + $0x60] sm:$0x1] %vm2452_vm14, %v6040_v13  ;;  %2458 = vst.msk [vmem:[#allocation2 + $0x78] sm:$0x1] %vm2452_vm14, %v6040_v13 }
 0x334   : > { %2459 = vst.msk [vmem:[#allocation2 + $0x90] sm:$0x1] %vm2452_vm14, %v6040_v13  ;;  %2460 = vst.msk [vmem:[#allocation2 + $0xa8] sm:$0x1] %vm2452_vm14, %v6040_v13  ;;  %5811 = vrcp.f32 %v2222_v14  ;;  %v8253_v40 = vadd.f32 %v8151_v12, %v2014_v21  ;;  %v8262_v21 = vpop.permute.xlu0 %2331 }
 0x335   : > { %10783 = vst [vmem:[#allocation9_spill] sm:$0xff] %v8214_v46  ;;  %2461 = vst.msk [vmem:[#allocation2 + $0xc0] sm:$0x1] %vm2452_vm14, %v6040_v13  ;;  %v5798_v55 = vpop.eup %5797  ;;  %5813 = vrcp.f32 %v2221_v57  ;;  %v5430_v31 = vmul.f32 -1.442695, %v8214_v46  ;;  %v8273_v46 = vpop.permute.xlu1 %2337 }
 0x336   : > { %2462 = vst.msk [vmem:[#allocation2 + $0xd8] sm:$0x1] %vm2452_vm14, %v6040_v13  ;;  %2463 = vst.msk [vmem:[#allocation2 + $0xf0] sm:$0x1] %vm2452_vm14, %v6040_v13  ;;  %v5800_v39 = vpop.eup %5799  ;;  %v2224_v8 = vadd.f32 1.0, %v5798_v55  ;;  %5815 = vpow2.f32 %v5427_v52  ;;  %v5621_v33 = vpop.f32.mrb[12].mxu0 }
 0x337   : > { %2464 = vst.msk [vmem:[#allocation2 + $0x108] sm:$0x1] %vm2452_vm14, %v6040_v13  ;;  %2465 = vst.msk [vmem:[#allocation2 + $0x120] sm:$0x1] %vm2452_vm14, %v6040_v13  ;;  %v5429_v2 = vmul.f32 -1.442695, %v8253_v40  ;;  %5817 = vpow2.f32 %v5430_v31 }
 0x338   : > { %2466 = vst.msk [vmem:[#allocation2 + $0x138] sm:$0x1] %vm2452_vm14, %v6040_v13  ;;  %2467 = vst.msk [vmem:[#allocation2 + $0x150] sm:$0x1] %vm2452_vm14, %v6040_v13  ;;  %v2223_v51 = vadd.f32 1.0, %v5800_v39  ;;  %v2024_v14 = vpop.f32.mrb[13].mxu0  ;;  %5819 = vrcp.f32 %v2224_v8  ;;  %v8289_v54 = vpop.permute.xlu0 %2335 }
 0x339   : > { %2468 = vst.msk [vmem:[#allocation2 + $0x168] sm:$0x1] %vm2452_vm14, %v6040_v13  ;;  %2469 = vst.msk [vmem:[#allocation2 + $0x180] sm:$0x1] %vm2452_vm14, %v6040_v13  ;;  %v8265_v44 = vadd.f32 %v8151_v12, %v2024_v14  ;;  %v5802_v57 = vpop.eup %5801  ;;  %v2715_v61 = vld [vmem:[#allocation2 + $0xa] sm:$0xff] }
 0x33a   : > { %2470 = vst.msk [vmem:[#allocation2 + $0x198] sm:$0x1] %vm2452_vm14, %v6040_v13  ;;  %2472 = vst.msk [vmem:[#allocation2 + $0x29] sm:$0x1] %vm2452_vm14, %v6040_v13  ;;  %5821 = vrcp.f32 %v2223_v51  ;;  %v8268_v52 = vpop.eup %5803  ;;  %v5624_v39 = vpop.f32.mrb[14].mxu0 }
 0x33b   : > { %2473 = vst.msk [vmem:[#allocation2 + $0x41] sm:$0x1] %vm2452_vm14, %v6040_v13  ;;  %2474 = vst.msk [vmem:[#allocation2 + $0x59] sm:$0x1] %vm2452_vm14, %v6040_v13  ;;  %5823 = vpow2.f32 %v5429_v2  ;;  %v5431_v31 = vmul.f32 -1.442695, %v8265_v44  ;;  %v8276_v8 = vadd.f32 %v5624_v39, %v8151_v12  ;;  %v2412_v51 = vmul.f32 %v8268_v52, %v8153_v60 }
 0x33c   : > { %2475 = vst.msk [vmem:[#allocation2 + $0x71] sm:$0x1] %vm2452_vm14, %v6040_v13  ;;  %2476 = vst.msk [vmem:[#allocation2 + $0x89] sm:$0x1] %vm2452_vm14, %v6040_v13  ;;  %v2034_v14 = vpop.f32.mrb[15].mxu0 }
 0x33d   : > { %2477 = vst.msk [vmem:[#allocation2 + $0xa1] sm:$0x1] %vm2452_vm14, %v6040_v13  ;;  %2478 = vst.msk [vmem:[#allocation2 + $0xb9] sm:$0x1] %vm2452_vm14, %v6040_v13  ;;  %2523 = vrot.lane.b32.xlu1 %v2412_v51, %s6041_s27 }
 0x33e   : > { %2479 = vst.msk [vmem:[#allocation2 + $0xd1] sm:$0x1] %vm2452_vm14, %v6040_v13  ;;  %2480 = vst.msk [vmem:[#allocation2 + $0xe9] sm:$0x1] %vm2452_vm14, %v6040_v13 }
 0x33f   : > { %2481 = vst.msk [vmem:[#allocation2 + $0x101] sm:$0x1] %vm2452_vm14, %v6040_v13  ;;  %2482 = vst.msk [vmem:[#allocation2 + $0x119] sm:$0x1] %vm2452_vm14, %v6040_v13 }
 0x340   : > { %2483 = vst.msk [vmem:[#allocation2 + $0x131] sm:$0x1] %vm2452_vm14, %v6040_v13  ;;  %2484 = vst.msk [vmem:[#allocation2 + $0x149] sm:$0x1] %vm2452_vm14, %v6040_v13 }
 0x341   : > { %2485 = vst.msk [vmem:[#allocation2 + $0x161] sm:$0x1] %vm2452_vm14, %v6040_v13  ;;  %2486 = vst.msk [vmem:[#allocation2 + $0x179] sm:$0x1] %vm2452_vm14, %v6040_v13 }
 0x342   : > { %2487 = vst.msk [vmem:[#allocation2 + $0x191] sm:$0x1] %vm2452_vm14, %v6040_v13  ;;  %2488 = vst.msk [vmem:[#allocation2 + $0x1a9] sm:$0x1] %vm2452_vm14, %v6040_v13  ;;  %v8260_v13 = vadd.f32 %v5621_v33, %v8151_v12  ;;  %v8271_v33 = vpop.eup %5805 }
 0x343   : > { %10784 = vst [vmem:[#allocation10_spill] sm:$0xff] %v8253_v40  ;;  %10786 = vst [vmem:[#allocation61_spill] sm:$0xff] %v8265_v44  ;;  %v2226_v40 = vadd.f32 1.0, %v5802_v57  ;;  %v8281_v57 = vadd.f32 %v8151_v12, %v2034_v14  ;;  %v2411_v2 = vmul.f32 %v8271_v33, %v8158_v9  ;;  %v5627_v14 = vpop.f32.mrb[16].mxu0 }
 0x344   : > { %10785 = vst [vmem:[#allocation43_spill] sm:$0xff] %v8260_v13  ;;  %v5432_v55 = vmul.f32 -1.442695, %v8260_v13  ;;  %10787 = vst [vmem:[#allocation62_spill] sm:$0xff] %v8268_v52  ;;  %v5808_v13 = vpop.eup %5807  ;;  %v8296_v9 = vadd.f32 %v5627_v14, %v8151_v12 }
 0x345   : > { %10788 = vst [vmem:[#allocation75_spill] sm:$0xff] %v8271_v33  ;;  %10789 = vst [vmem:[#allocation8_spill] sm:$0xff] %v8276_v8  ;;  %v5810_v44 = vpop.eup %5809  ;;  %v2225_v11 = vadd.f32 1.0, %v5808_v13  ;;  %2521 = vrot.lane.b32.xlu0 %v2411_v2, %s6041_s27  ;;  %v2044_v13 = vpop.f32.mrb[17].mxu0 }
 0x346   : > { %5825 = vpow2.f32 %v5432_v55  ;;  %10790 = vst [vmem:[#allocation76_spill] sm:$0xff] %v8281_v57  ;;  %v5434_v55 = vmul.f32 -1.442695, %v8276_v8  ;;  %v8287_v39 = vpop.eup %5811  ;;  %v2228_v60 = vadd.f32 1.0, %v5810_v44  ;;  %10793 = vst [vmem:[#allocation140_spill] sm:$0xff] %v8296_v9  ;;  %v8301_v33 = vadd.f32 %v8151_v12, %v2044_v13  ;;  %v8305_v2 = vpop.permute.xlu1 %2341 }
 0x347   : > { %5827 = vrcp.f32 %v2226_v40  ;;  %10791 = vst [vmem:[#allocation11_spill] sm:$0xff] %v8287_v39  ;;  %v5433_v40 = vmul.f32 -1.442695, %v8281_v57  ;;  %v8293_v52 = vpop.eup %5813  ;;  %v5630_v13 = vpop.f32.mrb[18].mxu0 }
 0x348   : > { %5829 = vpow2.f32 %v5431_v31  ;;  %10792 = vst [vmem:[#allocation139_spill] sm:$0xff] %v8293_v52  ;;  %v2414_v31 = vmul.f32 %v8287_v39, %v8165_v49  ;;  %v5816_v51 = vpop.eup %5815  ;;  %10794 = vst [vmem:[#allocation99_spill] sm:$0xff] %v8301_v33  ;;  %v2413_v44 = vmul.f32 %v8293_v52, %v8174_v7  ;;  %v8316_v7 = vadd.f32 %v5630_v13, %v8151_v12  ;;  %v8320_v52 = vpop.permute.xlu0 %2339 }
 0x349   : > { %5831 = vrcp.f32 %v2225_v11  ;;  %v5818_v57 = vpop.eup %5817  ;;  %v2227_v8 = vadd.f32 1.0, %v5816_v51  ;;  %v5436_v11 = vmul.f32 -1.442695, %v8296_v9 }
 0x34a   : > { %5833 = vrcp.f32 %v2228_v60  ;;  %2527 = vrot.lane.b32.xlu1 %v2414_v31, %s6041_s27  ;;  %v8309_v14 = vpop.eup %5819  ;;  %v2230_v49 = vadd.f32 1.0, %v5818_v57  ;;  %v5435_v60 = vmul.f32 -1.442695, %v8301_v33  ;;  %2525 = vrot.lane.b32.xlu0 %v2413_v44, %s6041_s27  ;;  %10797 = vst [vmem:[#allocation166_spill] sm:$0xff] %v8316_v7 }
 0x34b   : > { %5835 = vpow2.f32 %v5434_v55  ;;  %10795 = vst [vmem:[#allocation100_spill] sm:$0xff] %v8309_v14  ;;  %v8313_v39 = vpop.eup %5821  ;;  %v2054_v55 = vpop.f32.mrb[19].mxu0  ;;  %v2416_v51 = vmul.f32 %v8309_v14, %v8183_v6 }
 0x34c   : > { %5837 = vpow2.f32 %v5433_v40  ;;  %10796 = vst [vmem:[#allocation165_spill] sm:$0xff] %v8313_v39  ;;  %v5824_v31 = vpop.eup %5823  ;;  %v8323_v57 = vadd.f32 %v8151_v12, %v2054_v55  ;;  %v2415_v40 = vmul.f32 %v8313_v39, %v8190_v53  ;;  %v5633_v14 = vpop.f32.mrb[20].mxu0 }
 0x34d   : > { %5839 = vrcp.f32 %v2227_v8  ;;  %v2229_v33 = vadd.f32 1.0, %v5824_v31  ;;  %v5438_v8 = vmul.f32 -1.442695, %v8316_v7  ;;  %v8332_v55 = vpop.permute.xlu1 %2345  ;;  %v8336_v31 = vadd.f32 %v5633_v14, %v8151_v12  ;;  %v8349_v14 = vpop.permute.xlu0 %2343 }
 0x34e   : > { %5841 = vrcp.f32 %v2230_v49  ;;  %10798 = vst [vmem:[#allocation17_spill] sm:$0xff] %v8323_v57  ;;  %2531 = vrot.lane.b32.xlu1 %v2416_v51, %s6041_s27  ;;  %2529 = vrot.lane.b32.xlu0 %v2415_v40, %s6041_s27  ;;  %v5437_v53 = vmul.f32 -1.442695, %v8323_v57 }
 0x34f   : > { %5843 = vpow2.f32 %v5436_v11  ;;  %10800 = vst [vmem:[#allocation44_spill] sm:$0xff] %v8336_v31  ;;  %v2064_v11 = vpop.f32.mrb[21].mxu0  ;;  %v5440_v40 = vmul.f32 -1.442695, %v8336_v31 }
 0x350   : > { %v5826_v44 = vpop.eup %5825  ;;  %5845 = vpow2.f32 %v5435_v60  ;;  %v8341_v60 = vadd.f32 %v8151_v12, %v2064_v11 }
 0x351   : > { %v8329_v13 = vpop.eup %5827  ;;  %v2232_v6 = vadd.f32 1.0, %v5826_v44  ;;  %5847 = vrcp.f32 %v2229_v33 }
 0x352   : > { %10799 = vst [vmem:[#allocation18_spill] sm:$0xff] %v8329_v13  ;;  %v5830_v49 = vpop.eup %5829  ;;  %v2418_v51 = vmul.f32 %v8329_v13, %v8197_v58  ;;  %10801 = vst [vmem:[#allocation65_spill] sm:$0xff] %v8341_v60  ;;  %v5439_v57 = vmul.f32 -1.442695, %v8341_v60  ;;  %v5636_v58 = vpop.f32.mrb[22].mxu0 }
 0x353   : > { %5849 = vrcp.f32 %v2232_v6  ;;  %v2231_v39 = vadd.f32 1.0, %v5830_v49  ;;  %v8343_v44 = vpop.eup %5831  ;;  %v8355_v11 = vadd.f32 %v5636_v58, %v8151_v12 }
 0x354   : > { %10802 = vst [vmem:[#allocation66_spill] sm:$0xff] %v8343_v44  ;;  %5851 = vpow2.f32 %v5438_v8  ;;  %2535 = vrot.lane.b32.xlu1 %v2418_v51, %s6041_s27  ;;  %v8347_v33 = vpop.eup %5833  ;;  %v2417_v6 = vmul.f32 %v8343_v44, %v8210_v50  ;;  %v2074_v8 = vpop.f32.mrb[23].mxu0 }
 0x355   : > { %10803 = vst [vmem:[#allocation77_spill] sm:$0xff] %v8347_v33  ;;  %5853 = vrcp.f32 %v2231_v39  ;;  %v5836_v49 = vpop.eup %5835  ;;  %10804 = vst [vmem:[#allocation78_spill] sm:$0xff] %v8355_v11  ;;  %v2420_v51 = vmul.f32 %v8347_v33, %v8255_v45  ;;  %v8361_v39 = vadd.f32 %v8151_v12, %v2074_v8  ;;  %v8365_v50 = vpop.permute.xlu1 %2349  ;;  %v5442_v58 = vmul.f32 -1.442695, %v8355_v11 }
 0x356   : > { %5855 = vpow2.f32 %v5437_v53  ;;  %v5838_v13 = vpop.eup %5837  ;;  %v2234_v31 = vadd.f32 1.0, %v5836_v49  ;;  %2533 = vrot.lane.b32.xlu0 %v2417_v6, %s6041_s27 }
 0x357   : > { %5857 = vpow2.f32 %v5440_v40  ;;  %10805 = vst [vmem:[#allocation141_spill] sm:$0xff] %v8361_v39  ;;  %v8363_v60 = vpop.eup %5839  ;;  %v2233_v53 = vadd.f32 1.0, %v5838_v13  ;;  %v5441_v45 = vmul.f32 -1.442695, %v8361_v39  ;;  %v5639_v40 = vpop.f32.mrb[24].mxu0 }
 0x358   : > { %10806 = vst [vmem:[#allocation142_spill] sm:$0xff] %v8363_v60  ;;  %5859 = vpow2.f32 %v5439_v57  ;;  %2539 = vrot.lane.b32.xlu1 %v2420_v51, %s6041_s27  ;;  %v8369_v44 = vpop.eup %5841  ;;  %v2419_v6 = vmul.f32 %v8363_v60, %v8262_v21  ;;  %v8375_v8 = vadd.f32 %v5639_v40, %v8151_v12  ;;  %v2084_v13 = vpop.f32.mrb[25].mxu0 }
 0x359   : > { %10807 = vst [vmem:[#allocation101_spill] sm:$0xff] %v8369_v44  ;;  %5861 = vrcp.f32 %v2234_v31  ;;  %v5844_v49 = vpop.eup %5843  ;;  %v2422_v57 = vmul.f32 %v8369_v44, %v8273_v46  ;;  %v8379_v51 = vpop.permute.xlu0 %2347  ;;  %v8383_v31 = vadd.f32 %v8151_v12, %v2084_v13 }
 0x35a   : > { %5863 = vrcp.f32 %v2233_v53  ;;  %10808 = vst [vmem:[#allocation102_spill] sm:$0xff] %v8375_v8  ;;  %v5846_v33 = vpop.eup %5845  ;;  %v2236_v11 = vadd.f32 1.0, %v5844_v49  ;;  %2537 = vrot.lane.b32.xlu0 %v2419_v6, %s6041_s27  ;;  %v5444_v40 = vmul.f32 -1.442695, %v8375_v8  ;;  %v5642_v49 = vpop.f32.mrb[26].mxu0 }
 0x35b   : > { %5865 = vpow2.f32 %v5442_v58  ;;  %10809 = vst [vmem:[#allocation167_spill] sm:$0xff] %v8383_v31  ;;  %v8385_v21 = vpop.eup %5847  ;;  %v2235_v53 = vadd.f32 1.0, %v5846_v33  ;;  %v5443_v46 = vmul.f32 -1.442695, %v8383_v31  ;;  %v8394_v13 = vpop.permute.xlu1 %2353  ;;  %v8397_v33 = vadd.f32 %v5642_v49, %v8151_v12 }
 0x35c   : > { %10810 = vst [vmem:[#allocation168_spill] sm:$0xff] %v8385_v21  ;;  %5867 = vpow2.f32 %v5441_v45  ;;  %2543 = vrot.lane.b32.xlu1 %v2422_v57, %s6041_s27  ;;  %v2421_v58 = vmul.f32 %v8385_v21, %v8289_v54  ;;  %v2094_v45 = vpop.f32.mrb[27].mxu0 }
 0x35d   : > { %v8389_v60 = vpop.eup %5849  ;;  %5869 = vrcp.f32 %v2236_v11  ;;  %10812 = vst [vmem:[#allocation22_spill] sm:$0xff] %v8397_v33  ;;  %v8405_v31 = vadd.f32 %v8151_v12, %v2094_v45 }
 0x35e   : > { %10811 = vst [vmem:[#allocation21_spill] sm:$0xff] %v8389_v60  ;;  %v5852_v6 = vpop.eup %5851  ;;  %5871 = vrcp.f32 %v2235_v53  ;;  %v2424_v57 = vmul.f32 %v8389_v60, %v8305_v2  ;;  %2541 = vrot.lane.b32.xlu0 %v2421_v58, %s6041_s27  ;;  %v5446_v53 = vmul.f32 -1.442695, %v8397_v33  ;;  %v8411_v2 = vpop.permute.xlu0 %2351 }
 0x35f   : > { %v8401_v44 = vpop.eup %5853  ;;  %v2238_v11 = vadd.f32 1.0, %v5852_v6  ;;  %5873 = vpow2.f32 %v5444_v40  ;;  %10814 = vst [vmem:[#allocation119_spill] sm:$0xff] %v8405_v31  ;;  %v5645_v40 = vpop.f32.mrb[28].mxu0  ;;  %v5445_v45 = vmul.f32 -1.442695, %v8405_v31 }
 0x360   : > { %10813 = vst [vmem:[#allocation47_spill] sm:$0xff] %v8401_v44  ;;  %v5856_v54 = vpop.eup %5855  ;;  %5875 = vpow2.f32 %v5443_v46  ;;  %2547 = vrot.lane.b32.xlu1 %v2424_v57, %s6041_s27  ;;  %v2423_v49 = vmul.f32 %v8401_v44, %v8320_v52  ;;  %v8415_v46 = vadd.f32 %v5645_v40, %v8151_v12  ;;  %v2104_v33 = vpop.f32.mrb[29].mxu0 }
 0x361   : > { %v5858_v21 = vpop.eup %5857  ;;  %5877 = vrcp.f32 %v2238_v11  ;;  %v2237_v6 = vadd.f32 1.0, %v5856_v54  ;;  %v8421_v52 = vadd.f32 %v8151_v12, %v2104_v33  ;;  %v2358_v54 = vpop.permute.xlu1 %2357 }
 0x362   : > { %v5860_v60 = vpop.eup %5859  ;;  %v2240_v58 = vadd.f32 1.0, %v5858_v21  ;;  %5879 = vpow2.f32 %v5446_v53  ;;  %10815 = vst [vmem:[#allocation120_spill] sm:$0xff] %v8415_v46  ;;  %2545 = vrot.lane.b32.xlu0 %v2423_v49, %s6041_s27  ;;  %v5448_v21 = vmul.f32 -1.442695, %v8415_v46  ;;  %v5648_v44 = vpop.f32.mrb[30].mxu0 }
 0x363   : > { %v8417_v8 = vpop.eup %5861  ;;  %5881 = vrcp.f32 %v2237_v6  ;;  %v2239_v57 = vadd.f32 1.0, %v5860_v60  ;;  %10817 = vst [vmem:[#allocation80_spill] sm:$0xff] %v8421_v52  ;;  %v5447_v33 = vmul.f32 -1.442695, %v8421_v52  ;;  %v2114_v46 = vpop.f32.mrb[31].mxu0 }
 0x364   : > { %10816 = vst [vmem:[#allocation79_spill] sm:$0xff] %v8417_v8  ;;  %v8423_v11 = vpop.eup %5863  ;;  %5883 = vrcp.f32 %v2240_v58  ;;  %v2426_v53 = vmul.f32 %v8417_v8, %v8332_v55  ;;  %v8433_v58 = vadd.f32 %v5648_v44, %v8151_v12  ;;  %v2356_v55 = vpop.permute.xlu0 %2355 }
 0x365   : > { %10818 = vst [vmem:[#allocation143_spill] sm:$0xff] %v8423_v11  ;;  %v5866_v40 = vpop.eup %5865  ;;  %5885 = vrcp.f32 %v2239_v57  ;;  %v2425_v60 = vmul.f32 %v8423_v11, %v8349_v14  ;;  %v8439_v14 = vadd.f32 %v8151_v12, %v2114_v46 }
 0x366   : > { %v5868_v6 = vpop.eup %5867  ;;  %v2242_v49 = vadd.f32 1.0, %v5866_v40  ;;  %5887 = vpow2.f32 %v5445_v45  ;;  %2551 = vrot.lane.b32.xlu1 %v2426_v53, %s6041_s27  ;;  %10819 = vst [vmem:[#allocation144_spill] sm:$0xff] %v8433_v58  ;;  %v5450_v45 = vmul.f32 -1.442695, %v8433_v58 }
 0x367   : > { %v8435_v31 = vpop.eup %5869  ;;  %v2241_v8 = vadd.f32 1.0, %v5868_v6  ;;  %5889 = vpow2.f32 %v5448_v21  ;;  %2549 = vrot.lane.b32.xlu0 %v2425_v60, %s6041_s27  ;;  %10821 = vst [vmem:[#allocation104_spill] sm:$0xff] %v8439_v14  ;;  %v2362_v21 = vpop.permute.xlu1 %2361  ;;  %v5449_v12 = vmul.f32 -1.442695, %v8439_v14 }
 0x368   : > { %10820 = vst [vmem:[#allocation103_spill] sm:$0xff] %v8435_v31  ;;  %v8441_v57 = vpop.eup %5871  ;;  %5891 = vrcp.f32 %v2242_v49  ;;  %v2428_v44 = vmul.f32 %v8435_v31, %v8365_v50  ;;  %v2360_v49 = vpop.permute.xlu0 %2359 }
 0x369   : > { %10822 = vst [vmem:[#allocation169_spill] sm:$0xff] %v8441_v57  ;;  %v5874_v53 = vpop.eup %5873  ;;  %5893 = vrcp.f32 %v2241_v8  ;;  %v2427_v40 = vmul.f32 %v8441_v57, %v8379_v51 }
 0x36a   : > { %v5876_v6 = vpop.eup %5875  ;;  %v2244_v11 = vadd.f32 1.0, %v5874_v53  ;;  %5895 = vpow2.f32 %v5447_v33  ;;  %2555 = vrot.lane.b32.xlu1 %v2428_v44, %s6041_s27 }
 0x36b   : > { %v8450_v46 = vpop.eup %5877  ;;  %v2243_v60 = vadd.f32 1.0, %v5876_v6  ;;  %5897 = vpow2.f32 %v5450_v45  ;;  %2553 = vrot.lane.b32.xlu0 %v2427_v40, %s6041_s27 }
 0x36c   : > { %10823 = vst [vmem:[#allocation170_spill] sm:$0xff] %v8450_v46  ;;  %v5880_v50 = vpop.eup %5879  ;;  %5899 = vrcp.f32 %v2244_v11  ;;  %v2430_v8 = vmul.f32 %v8450_v46, %v8394_v13  ;;  %v2366_v13 = vpop.permute.xlu1 %2365 }
 0x36d   : > { %v8455_v51 = vpop.eup %5881  ;;  %5901 = vrcp.f32 %v2243_v60  ;;  %v2246_v33 = vadd.f32 1.0, %v5880_v50 }
 0x36e   : > { %10824 = vst [vmem:[#allocation25_spill] sm:$0xff] %v8455_v51  ;;  %v8457_v53 = vpop.eup %5883  ;;  %5903 = vpow2.f32 %v5449_v12  ;;  %2559 = vrot.lane.b32.xlu1 %v2430_v8, %s6041_s27  ;;  %v2429_v45 = vmul.f32 %v8455_v51, %v8411_v2  ;;  %v2364_v2 = vpop.permute.xlu0 %2363 }
 0x36f   : > { %10825 = vst [vmem:[#allocation26_spill] sm:$0xff] %v8457_v53  ;;  %v8462_v44 = vpop.eup %5885  ;;  %5905 = vrcp.f32 %v2246_v33  ;;  %v2432_v11 = vmul.f32 %v8457_v53, %v2358_v54 }
 0x370   : > { %10826 = vst [vmem:[#allocation48_spill] sm:$0xff] %v8462_v44  ;;  %v5888_v40 = vpop.eup %5887  ;;  %2557 = vrot.lane.b32.xlu0 %v2429_v45, %s6041_s27  ;;  %v2431_v6 = vmul.f32 %v8462_v44, %v2356_v55  ;;  %v2370_v53 = vpop.permute.xlu1 %2369 }
 0x371   : > { %v5890_v60 = vpop.eup %5889  ;;  %v2245_v50 = vadd.f32 1.0, %v5888_v40 }
 0x372   : > { %v8467_v46 = vpop.eup %5891  ;;  %v2248_v12 = vadd.f32 1.0, %v5890_v60  ;;  %2563 = vrot.lane.b32.xlu1 %v2432_v11, %s6041_s27 }
 0x373   : > { %10827 = vst [vmem:[#allocation121_spill] sm:$0xff] %v8467_v46  ;;  %v8470_v8 = vpop.eup %5893  ;;  %5907 = vrcp.f32 %v2245_v50  ;;  %v2434_v33 = vmul.f32 %v8467_v46, %v2362_v21 }
 0x374   : > { %10828 = vst [vmem:[#allocation122_spill] sm:$0xff] %v8470_v8  ;;  %v5896_v54 = vpop.eup %5895  ;;  %5909 = vrcp.f32 %v2248_v12  ;;  %2561 = vrot.lane.b32.xlu0 %v2431_v6, %s6041_s27  ;;  %v2433_v45 = vmul.f32 %v8470_v8, %v2360_v49  ;;  %v2368_v12 = vpop.permute.xlu0 %2367 }
 0x375   : > { %v5898_v55 = vpop.eup %5897  ;;  %v2247_v44 = vadd.f32 1.0, %v5896_v54 }
 0x376   : > { %v8475_v40 = vpop.eup %5899  ;;  %v2250_v60 = vadd.f32 1.0, %v5898_v55  ;;  %2567 = vrot.lane.b32.xlu1 %v2434_v33, %s6041_s27  ;;  %v2374_v33 = vpop.permute.xlu1 %2373 }
 0x377   : > { %10829 = vst [vmem:[#allocation81_spill] sm:$0xff] %v8475_v40  ;;  %v8478_v11 = vpop.eup %5901  ;;  %5911 = vrcp.f32 %v2247_v44  ;;  %v2436_v50 = vmul.f32 %v8475_v40, %v2366_v13 }
 0x378   : > { %10830 = vst [vmem:[#allocation82_spill] sm:$0xff] %v8478_v11  ;;  %v5904_v21 = vpop.eup %5903  ;;  %5913 = vrcp.f32 %v2250_v60  ;;  %2565 = vrot.lane.b32.xlu0 %v2433_v45, %s6041_s27  ;;  %v2435_v6 = vmul.f32 %v8478_v11, %v2364_v2  ;;  %v2372_v45 = vpop.permute.xlu0 %2371 }
 0x379   : > { %v8483_v49 = vpop.eup %5905  ;;  %v2249_v54 = vadd.f32 1.0, %v5904_v21 }
 0x37a   : > { %10831 = vst [vmem:[#allocation145_spill] sm:$0xff] %v8483_v49  ;;  %2571 = vrot.lane.b32.xlu1 %v2436_v50, %s6041_s27  ;;  %v2438_v55 = vmul.f32 %v8483_v49, %v2370_v53  ;;  %v2378_v21 = vpop.permute.xlu1 %2377 }
 0x37b   : > { %5915 = vrcp.f32 %v2249_v54 }
 0x37c   : > { %2569 = vrot.lane.b32.xlu0 %v2435_v6, %s6041_s27 }
 0x37d   : > { %v8488_v44 = vpop.eup %5907 }
 0x37e   : > { %10832 = vst [vmem:[#allocation146_spill] sm:$0xff] %v8488_v44  ;;  %v8490_v13 = vpop.eup %5909  ;;  %2575 = vrot.lane.b32.xlu1 %v2438_v55, %s6041_s27  ;;  %v2437_v2 = vmul.f32 %v8488_v44, %v2368_v12  ;;  %v2376_v12 = vpop.permute.xlu0 %2375 }
 0x37f   : > { %10833 = vst [vmem:[#allocation105_spill] sm:$0xff] %v8490_v13  ;;  %v2440_v60 = vmul.f32 %v8490_v13, %v2374_v33  ;;  %v2682_v13 = vld [vmem:[#allocation2 + $0x1] sm:$0xff] }
 0x380   : > { %2573 = vrot.lane.b32.xlu0 %v2437_v2, %s6041_s27  ;;  %v2683_v2 = vld [vmem:[#allocation2 + $0x9] sm:$0xff] }
 0x381   : > { %v8496_v50 = vpop.eup %5911 }
 0x382   : > { %10834 = vst [vmem:[#allocation106_spill] sm:$0xff] %v8496_v50  ;;  %v8498_v53 = vpop.eup %5913  ;;  %2579 = vrot.lane.b32.xlu1 %v2440_v60, %s6041_s27  ;;  %v2439_v6 = vmul.f32 %v8496_v50, %v2372_v45 }
 0x383   : > { %10835 = vst [vmem:[#allocation171_spill] sm:$0xff] %v8498_v53  ;;  %v2442_v54 = vmul.f32 %v8498_v53, %v2378_v21 }
 0x384   : > { %2577 = vrot.lane.b32.xlu0 %v2439_v6, %s6041_s27 }
 0x385   : > { %v8504_v55 = vpop.eup %5915 }
 0x386   : > { %10836 = vst [vmem:[#allocation172_spill] sm:$0xff] %v8504_v55  ;;  %2583 = vrot.lane.b32.xlu1 %v2442_v54, %s6041_s27  ;;  %v2441_v33 = vmul.f32 %v8504_v55, %v2376_v12 }
 0x388   : > { %2581 = vrot.lane.b32.xlu0 %v2441_v33, %s6041_s27  ;;  %s6046_s27 = smov 56  }
 0x38a   : > { %2973 = vrot.lane.b32.xlu1 %v2683_v2, %s6042_s12 }
 0x38c   : > { %2971 = vrot.lane.b32.xlu0 %v2682_v13, %s6042_s12 }
 0x3af   : > { %v2524_v45 = vpop.permute.xlu1 %2523 }
 0x3b0   : > { %2619 = vst.msk [vmem:[#allocation2 + $0x21] sm:$0xff] %vm2443_vm12, %v2524_v45 }
 0x3b7   : > { %v2522_v60 = vpop.permute.xlu0 %2521  ;;  %v8515_v12 = vld [vmem:[#allocation2 + $0x21] sm:$0xff] }
 0x3b8   : > { %2618 = vst.msk [vmem:[#allocation2 + $0x19] sm:$0xff] %vm2443_vm12, %v2522_v60  ;;  %2977 = vrot.lane.b32.xlu1 %v8515_v12, %s6042_s12 }
 0x3bc   : > { %v2528_v21 = vpop.permute.xlu1 %2527  ;;  %v2526_v6 = vpop.permute.xlu0 %2525 }
 0x3bd   : > { %2621 = vst.msk [vmem:[#allocation2 + $0x39] sm:$0xff] %vm2443_vm12, %v2528_v21  ;;  %2620 = vst.msk [vmem:[#allocation2 + $0x31] sm:$0xff] %vm2443_vm12, %v2526_v6 }
 0x3bf   : > { %v8520_v33 = vld [vmem:[#allocation2 + $0x19] sm:$0xff] }
 0x3c0   : > { %v2532_v54 = vpop.permute.xlu1 %2531  ;;  %v2530_v13 = vpop.permute.xlu0 %2529  ;;  %2975 = vrot.lane.b32.xlu0 %v8520_v33, %s6042_s12  ;;  %v8735_v20 = vld [vmem:[#allocation2 + $0x18] sm:$0xff] }
 0x3c1   : > { %2623 = vst.msk [vmem:[#allocation2 + $0x51] sm:$0xff] %vm2443_vm12, %v2532_v54  ;;  %2622 = vst.msk [vmem:[#allocation2 + $0x49] sm:$0xff] %vm2443_vm12, %v2530_v13 }
 0x3c2   : > { %10851 = vst [vmem:[#allocation34_spill] sm:$0xff] %v8735_v20 }
 0x3c4   : > { %v8525_v45 = vld [vmem:[#allocation2 + $0x39] sm:$0xff]  ;;  %v8530_v60 = vld [vmem:[#allocation2 + $0x31] sm:$0xff] }
 0x3c5   : > { %2981 = vrot.lane.b32.xlu1 %v8525_v45, %s6042_s12  ;;  %2979 = vrot.lane.b32.xlu0 %v8530_v60, %s6042_s12  ;;  %v8747_v1 = vld [vmem:[#allocation2 + $0x30] sm:$0xff] }
 0x3c6   : > { %v2536_v2 = vpop.permute.xlu1 %2535 }
 0x3c7   : > { %2625 = vst.msk [vmem:[#allocation2 + $0x69] sm:$0xff] %vm2443_vm12, %v2536_v2 }
 0x3c8   : > { %v2534_v21 = vpop.permute.xlu0 %2533  ;;  %v8535_v54 = vld [vmem:[#allocation2 + $0x51] sm:$0xff]  ;;  %v8540_v13 = vld [vmem:[#allocation2 + $0x49] sm:$0xff] }
 0x3c9   : > { %2624 = vst.msk [vmem:[#allocation2 + $0x61] sm:$0xff] %vm2443_vm12, %v2534_v21  ;;  %2985 = vrot.lane.b32.xlu1 %v8535_v54, %s6042_s12  ;;  %2983 = vrot.lane.b32.xlu0 %v8540_v13, %s6042_s12  ;;  %v8751_v37 = vld [vmem:[#allocation2 + $0x50] sm:$0xff]  ;;  %v8759_v43 = vld [vmem:[#allocation2 + $0x48] sm:$0xff] }
 0x3ca   : > { %v2540_v6 = vpop.permute.xlu1 %2539 }
 0x3cb   : > { %2627 = vst.msk [vmem:[#allocation2 + $0x81] sm:$0xff] %vm2443_vm12, %v2540_v6 }
 0x3cc   : > { %v2538_v2 = vpop.permute.xlu0 %2537 }
 0x3cd   : > { %2626 = vst.msk [vmem:[#allocation2 + $0x79] sm:$0xff] %vm2443_vm12, %v2538_v2 }
 0x3ce   : > { %v2544_v55 = vpop.permute.xlu1 %2543  ;;  %v8545_v53 = vld [vmem:[#allocation2 + $0x69] sm:$0xff] }
 0x3cf   : > { %2629 = vst.msk [vmem:[#allocation2 + $0x99] sm:$0xff] %vm2443_vm12, %v2544_v55  ;;  %2989 = vrot.lane.b32.xlu1 %v8545_v53, %s6042_s12 }
 0x3d0   : > { %v2542_v21 = vpop.permute.xlu0 %2541  ;;  %v8550_v6 = vld [vmem:[#allocation2 + $0x61] sm:$0xff] }
 0x3d1   : > { %2628 = vst.msk [vmem:[#allocation2 + $0x91] sm:$0xff] %vm2443_vm12, %v2542_v21  ;;  %2987 = vrot.lane.b32.xlu0 %v8550_v6, %s6042_s12  ;;  %v8763_v34 = vld [vmem:[#allocation2 + $0x68] sm:$0xff]  ;;  %v8771_v30 = vld [vmem:[#allocation2 + $0x60] sm:$0xff] }
 0x3d2   : > { %v2548_v50 = vpop.permute.xlu1 %2547  ;;  %v8555_v44 = vld [vmem:[#allocation2 + $0x81] sm:$0xff] }
 0x3d3   : > { %2631 = vst.msk [vmem:[#allocation2 + $0xb1] sm:$0xff] %vm2443_vm12, %v2548_v50  ;;  %2993 = vrot.lane.b32.xlu1 %v8555_v44, %s6042_s12 }
 0x3d4   : > { %v2546_v55 = vpop.permute.xlu0 %2545  ;;  %v8560_v2 = vld [vmem:[#allocation2 + $0x79] sm:$0xff] }
 0x3d5   : > { %2630 = vst.msk [vmem:[#allocation2 + $0xa9] sm:$0xff] %vm2443_vm12, %v2546_v55  ;;  %2991 = vrot.lane.b32.xlu0 %v8560_v2, %s6042_s12  ;;  %v8677_v36 = vld [vmem:[#allocation2 + $0x7a] sm:$0xff] }
 0x3d6   : > { %v8565_v21 = vld [vmem:[#allocation2 + $0x99] sm:$0xff] }
 0x3d7   : > { %2997 = vrot.lane.b32.xlu1 %v8565_v21, %s6042_s12  ;;  %v8681_v19 = vld [vmem:[#allocation2 + $0x9a] sm:$0xff] }
 0x3d8   : > { %v2552_v49 = vpop.permute.xlu1 %2551  ;;  %v8570_v11 = vld [vmem:[#allocation2 + $0x91] sm:$0xff]  ;;  %10837 = vst [vmem:[#allocation29_spill] sm:$0xff] %v8681_v19  ;;  %v8775_v24 = vld [vmem:[#allocation2 + $0x80] sm:$0xff] }
 0x3d9   : > { %2633 = vst.msk [vmem:[#allocation2 + $0xc9] sm:$0xff] %vm2443_vm12, %v2552_v49  ;;  %v2550_v50 = vpop.permute.xlu0 %2549  ;;  %2995 = vrot.lane.b32.xlu0 %v8570_v11, %s6042_s12  ;;  %v8685_v29 = vld [vmem:[#allocation2 + $0x92] sm:$0xff] }
 0x3da   : > { %2632 = vst.msk [vmem:[#allocation2 + $0xc1] sm:$0xff] %vm2443_vm12, %v2550_v50  ;;  %v8575_v55 = vld [vmem:[#allocation2 + $0xb1] sm:$0xff]  ;;  %10838 = vst [vmem:[#allocation30_spill] sm:$0xff] %v8685_v29 }
 0x3db   : > { %3001 = vrot.lane.b32.xlu1 %v8575_v55, %s6042_s12  ;;  %v8689_v32 = vld [vmem:[#allocation2 + $0xb2] sm:$0xff] }
 0x3dc   : > { %v2556_v40 = vpop.permute.xlu1 %2555  ;;  %v8580_v46 = vld [vmem:[#allocation2 + $0xa9] sm:$0xff]  ;;  %10839 = vst [vmem:[#allocation51_spill] sm:$0xff] %v8689_v32  ;;  %v8781_v0 = vld [vmem:[#allocation2 + $0x78] sm:$0xff] }
 0x3dd   : > { %2635 = vst.msk [vmem:[#allocation2 + $0xe1] sm:$0xff] %vm2443_vm12, %v2556_v40  ;;  %v2554_v8 = vpop.permute.xlu0 %2553  ;;  %2999 = vrot.lane.b32.xlu0 %v8580_v46, %s6042_s12  ;;  %v8693_v38 = vld [vmem:[#allocation2 + $0xaa] sm:$0xff]  ;;  %v8787_v10 = vld [vmem:[#allocation2 + $0x98] sm:$0xff] }
 0x3de   : > { %2634 = vst.msk [vmem:[#allocation2 + $0xd9] sm:$0xff] %vm2443_vm12, %v2554_v8  ;;  %10840 = vst [vmem:[#allocation123_spill] sm:$0xff] %v8693_v38 }
 0x3e0   : > { %v2560_v49 = vpop.permute.xlu1 %2559  ;;  %v8585_v50 = vld [vmem:[#allocation2 + $0xc9] sm:$0xff] }
 0x3e1   : > { %2637 = vst.msk [vmem:[#allocation2 + $0xf9] sm:$0xff] %vm2443_vm12, %v2560_v49  ;;  %3005 = vrot.lane.b32.xlu1 %v8585_v50, %s6042_s12  ;;  %v8590_v51 = vld [vmem:[#allocation2 + $0xc1] sm:$0xff]  ;;  %v2731_v35 = vld [vmem:[#allocation2 + $0xca] sm:$0xff] }
 0x3e2   : > { %v2558_v57 = vpop.permute.xlu0 %2557  ;;  %3003 = vrot.lane.b32.xlu0 %v8590_v51, %s6042_s12  ;;  %v2730_v5 = vld [vmem:[#allocation2 + $0xc2] sm:$0xff] }
 0x3e3   : > { %2636 = vst.msk [vmem:[#allocation2 + $0xf1] sm:$0xff] %vm2443_vm12, %v2558_v57 }
 0x3e4   : > { %v2564_v8 = vpop.permute.xlu1 %2563  ;;  %v8595_v40 = vld [vmem:[#allocation2 + $0xe1] sm:$0xff] }
 0x3e5   : > { %2639 = vst.msk [vmem:[#allocation2 + $0x111] sm:$0xff] %vm2443_vm12, %v2564_v8  ;;  %3009 = vrot.lane.b32.xlu1 %v8595_v40, %s6042_s12  ;;  %v8600_v49 = vld [vmem:[#allocation2 + $0xd9] sm:$0xff]  ;;  %v2733_v23 = vld [vmem:[#allocation2 + $0xe2] sm:$0xff] }
 0x3e6   : > { %v2562_v31 = vpop.permute.xlu0 %2561  ;;  %3007 = vrot.lane.b32.xlu0 %v8600_v49, %s6042_s12  ;;  %v2732_v3 = vld [vmem:[#allocation2 + $0xda] sm:$0xff] }
 0x3e7   : > { %2638 = vst.msk [vmem:[#allocation2 + $0x109] sm:$0xff] %vm2443_vm12, %v2562_v31 }
 0x3e8   : > { %v2568_v14 = vpop.permute.xlu1 %2567  ;;  %v8605_v58 = vld [vmem:[#allocation2 + $0xf9] sm:$0xff] }
 0x3e9   : > { %2641 = vst.msk [vmem:[#allocation2 + $0x129] sm:$0xff] %vm2443_vm12, %v2568_v14  ;;  %3013 = vrot.lane.b32.xlu1 %v8605_v58, %s6042_s12  ;;  %v2735_v26 = vld [vmem:[#allocation2 + $0xfa] sm:$0xff] }
 0x3ea   : > { %v2566_v57 = vpop.permute.xlu0 %2565  ;;  %v8610_v8 = vld [vmem:[#allocation2 + $0xf1] sm:$0xff] }
 0x3eb   : > { %2640 = vst.msk [vmem:[#allocation2 + $0x121] sm:$0xff] %vm2443_vm12, %v2566_v57  ;;  %3011 = vrot.lane.b32.xlu0 %v8610_v8, %s6042_s12  ;;  %v2734_v62 = vld [vmem:[#allocation2 + $0xf2] sm:$0xff] }
 0x3ec   : > { %v2572_v52 = vpop.permute.xlu1 %2571  ;;  %v8615_v39 = vld [vmem:[#allocation2 + $0x111] sm:$0xff] }
 0x3ed   : > { %2643 = vst.msk [vmem:[#allocation2 + $0x141] sm:$0xff] %vm2443_vm12, %v2572_v52  ;;  %3017 = vrot.lane.b32.xlu1 %v8615_v39, %s6042_s12  ;;  %v2737_v15 = vld [vmem:[#allocation2 + $0x112] sm:$0xff] }
 0x3ee   : > { %v2570_v31 = vpop.permute.xlu0 %2569  ;;  %v8620_v14 = vld [vmem:[#allocation2 + $0x109] sm:$0xff] }
 0x3ef   : > { %2642 = vst.msk [vmem:[#allocation2 + $0x139] sm:$0xff] %vm2443_vm12, %v2570_v31  ;;  %3015 = vrot.lane.b32.xlu0 %v8620_v14, %s6042_s12  ;;  %v2736_v4 = vld [vmem:[#allocation2 + $0x10a] sm:$0xff] }
 0x3f0   : > { %v2576_v57 = vpop.permute.xlu1 %2575  ;;  %v2707_v7 = vld [vmem:[#allocation2 + $0x129] sm:$0xff] }
 0x3f1   : > { %2645 = vst.msk [vmem:[#allocation2 + $0x159] sm:$0xff] %vm2443_vm12, %v2576_v57  ;;  %3021 = vrot.lane.b32.xlu1 %v2707_v7, %s6042_s12 }
 0x3f2   : > { %v2574_v9 = vpop.permute.xlu0 %2573  ;;  %v2706_v17 = vld [vmem:[#allocation2 + $0x121] sm:$0xff] }
 0x3f3   : > { %2644 = vst.msk [vmem:[#allocation2 + $0x151] sm:$0xff] %vm2443_vm12, %v2574_v9  ;;  %3019 = vrot.lane.b32.xlu0 %v2706_v17, %s6042_s12 }
 0x3f4   : > { %v2580_v52 = vpop.permute.xlu1 %2579  ;;  %v2709_v56 = vld [vmem:[#allocation2 + $0x141] sm:$0xff] }
 0x3f5   : > { %2647 = vst.msk [vmem:[#allocation2 + $0x171] sm:$0xff] %vm2443_vm12, %v2580_v52  ;;  %3025 = vrot.lane.b32.xlu1 %v2709_v56, %s6042_s12 }
 0x3f6   : > { %v2578_v31 = vpop.permute.xlu0 %2577  ;;  %v2708_v59 = vld [vmem:[#allocation2 + $0x139] sm:$0xff] }
 0x3f7   : > { %2646 = vst.msk [vmem:[#allocation2 + $0x169] sm:$0xff] %vm2443_vm12, %v2578_v31  ;;  %3023 = vrot.lane.b32.xlu0 %v2708_v59, %s6042_s12  ;;  %v2714_v59 = vld [vmem:[#allocation2 + $0x2] sm:$0xff] }
 0x3f8   : > { %v2584_v57 = vpop.permute.xlu1 %2583  ;;  %v2711_v7 = vld [vmem:[#allocation2 + $0x159] sm:$0xff]  ;;  %v8641_v31 = vld [vmem:[#allocation2 + $0x22] sm:$0xff] }
 0x3f9   : > { %2649 = vst.msk [vmem:[#allocation2 + $0x189] sm:$0xff] %vm2443_vm12, %v2584_v57  ;;  %3029 = vrot.lane.b32.xlu1 %v2711_v7, %s6042_s12  ;;  %v8645_v57 = vld [vmem:[#allocation2 + $0x1a] sm:$0xff] }
 0x3fa   : > { %v2582_v9 = vpop.permute.xlu0 %2581  ;;  %v2710_v17 = vld [vmem:[#allocation2 + $0x151] sm:$0xff]  ;;  %v8649_v7 = vld [vmem:[#allocation2 + $0x3a] sm:$0xff] }
 0x3fb   : > { %2648 = vst.msk [vmem:[#allocation2 + $0x181] sm:$0xff] %vm2443_vm12, %v2582_v9  ;;  %3027 = vrot.lane.b32.xlu0 %v2710_v17, %s6042_s12  ;;  %v8653_v9 = vld [vmem:[#allocation2 + $0x32] sm:$0xff]  ;;  %v8661_v17 = vld [vmem:[#allocation2 + $0x4a] sm:$0xff] }
 0x3fc   : > { %v2713_v52 = vld [vmem:[#allocation2 + $0x171] sm:$0xff] }
 0x3fd   : > { %3033 = vrot.lane.b32.xlu1 %v2713_v52, %s6042_s12  ;;  %v8665_v52 = vld [vmem:[#allocation2 + $0x6a] sm:$0xff]  ;;  %v2742_v16 = vld [vmem:[#allocation2 + $0x152] sm:$0xff] }
 0x3fe   : > { %v2712_v56 = vld [vmem:[#allocation2 + $0x169] sm:$0xff]  ;;  %v8707_v41 = vpop.permute.xlu0 %2971 }
 0x3ff   : > { %3031 = vrot.lane.b32.xlu0 %v2712_v56, %s6042_s12  ;;  %v8669_v56 = vld [vmem:[#allocation2 + $0x62] sm:$0xff]  ;;  %10842 = vst [vmem:[#allocation83_spill] sm:$0xff] %v8707_v41  ;;  %v2744_v48 = vld [vmem:[#allocation2 + $0x16a] sm:$0xff]  ;;  %s6047_s12 = smov 64  }
 0x401   : > { %3101 = vrot.lane.b32.xlu1 %v2715_v61, %s6043_s13  ;;  %v8657_v61 = vld [vmem:[#allocation2 + $0x52] sm:$0xff] }
 0x403   : > { %3099 = vrot.lane.b32.xlu0 %v2714_v59, %s6043_s13  ;;  %v8673_v59 = vld [vmem:[#allocation2 + $0x82] sm:$0xff] }
 0x405   : > { %3105 = vrot.lane.b32.xlu1 %v8641_v31, %s6043_s13 }
 0x407   : > { %3103 = vrot.lane.b32.xlu0 %v8645_v57, %s6043_s13 }
 0x409   : > { %3109 = vrot.lane.b32.xlu1 %v8649_v7, %s6043_s13 }
 0x40b   : > { %3107 = vrot.lane.b32.xlu0 %v8653_v9, %s6043_s13 }
 0x40d   : > { %3113 = vrot.lane.b32.xlu1 %v8657_v61, %s6043_s13 }
 0x40f   : > { %3111 = vrot.lane.b32.xlu0 %v8661_v17, %s6043_s13 }
 0x411   : > { %3117 = vrot.lane.b32.xlu1 %v8665_v52, %s6043_s13 }
 0x413   : > { %3115 = vrot.lane.b32.xlu0 %v8669_v56, %s6043_s13 }
 0x415   : > { %3121 = vrot.lane.b32.xlu1 %v8673_v59, %s6043_s13 }
 0x417   : > { %3119 = vrot.lane.b32.xlu0 %v8677_v36, %s6043_s13 }
 0x419   : > { %3125 = vrot.lane.b32.xlu1 %v8681_v19, %s6043_s13 }
 0x41b   : > { %3123 = vrot.lane.b32.xlu0 %v8685_v29, %s6043_s13 }
 0x41d   : > { %3129 = vrot.lane.b32.xlu1 %v8689_v32, %s6043_s13 }
 0x41f   : > { %3127 = vrot.lane.b32.xlu0 %v8693_v38, %s6043_s13  ;;  %v8895_v38 = vld [vmem:[#allocation2 + $0x170] sm:$0xff] }
 0x421   : > { %3133 = vrot.lane.b32.xlu1 %v2731_v35, %s6043_s13  ;;  %v8705_v35 = vpop.permute.xlu1 %2973 }
 0x422   : > { %10841 = vst [vmem:[#allocation124_spill] sm:$0xff] %v8705_v35  ;;  %v8871_v35 = vld [vmem:[#allocation2 + $0x140] sm:$0xff] }
 0x423   : > { %3131 = vrot.lane.b32.xlu0 %v2730_v5, %s6043_s13  ;;  %v2739_v5 = vld [vmem:[#allocation2 + $0x12a] sm:$0xff] }
 0x425   : > { %3137 = vrot.lane.b32.xlu1 %v2733_v23, %s6043_s13  ;;  %v2740_v23 = vld [vmem:[#allocation2 + $0x13a] sm:$0xff] }
 0x427   : > { %3135 = vrot.lane.b32.xlu0 %v2732_v3, %s6043_s13  ;;  %v2738_v3 = vld [vmem:[#allocation2 + $0x122] sm:$0xff] }
 0x429   : > { %3141 = vrot.lane.b32.xlu1 %v2735_v26, %s6043_s13  ;;  %v2741_v26 = vld [vmem:[#allocation2 + $0x142] sm:$0xff] }
 0x42b   : > { %3139 = vrot.lane.b32.xlu0 %v2734_v62, %s6043_s13  ;;  %v8712_v62 = vpop.permute.xlu1 %2977 }
 0x42c   : > { %10843 = vst [vmem:[#allocation84_spill] sm:$0xff] %v8712_v62  ;;  %v8853_v62 = vld [vmem:[#allocation2 + $0x108] sm:$0xff] }
 0x42d   : > { %3145 = vrot.lane.b32.xlu1 %v2737_v15, %s6043_s13  ;;  %10877 = vst [vmem:[#allocation42_spill] sm:$0xff] %v8853_v62 }
 0x42f   : > { %3143 = vrot.lane.b32.xlu0 %v2736_v4, %s6043_s13  ;;  %v2743_v4 = vld [vmem:[#allocation2 + $0x15a] sm:$0xff] }
 0x431   : > { %3149 = vrot.lane.b32.xlu1 %v2739_v5, %s6043_s13 }
 0x432   : > { %v8714_v15 = vpop.permute.xlu0 %2975 }
 0x433   : > { %3147 = vrot.lane.b32.xlu0 %v2738_v3, %s6043_s13  ;;  %10844 = vst [vmem:[#allocation147_spill] sm:$0xff] %v8714_v15  ;;  %v2745_v3 = vld [vmem:[#allocation2 + $0x172] sm:$0xff]  ;;  %v8859_v15 = vld [vmem:[#allocation2 + $0x128] sm:$0xff] }
 0x435   : > { %3153 = vrot.lane.b32.xlu1 %v2741_v26, %s6043_s13 }
 0x437   : > { %3151 = vrot.lane.b32.xlu0 %v2740_v23, %s6043_s13  ;;  %v8718_v27 = vpop.permute.xlu1 %2981  ;;  %v8720_v5 = vpop.permute.xlu0 %2979  ;;  %v8729_v23 = vld [vmem:[#allocation2 + $0x20] sm:$0xff] }
 0x438   : > { %10845 = vst [vmem:[#allocation148_spill] sm:$0xff] %v8718_v27  ;;  %10846 = vst [vmem:[#allocation107_spill] sm:$0xff] %v8720_v5  ;;  %v8847_v5 = vld [vmem:[#allocation2 + $0x110] sm:$0xff] }
 0x439   : > { %3157 = vrot.lane.b32.xlu1 %v2743_v4, %s6043_s13  ;;  %10849 = vst [vmem:[#allocation174_spill] sm:$0xff] %v8729_v23  ;;  %10876 = vst [vmem:[#allocation41_spill] sm:$0xff] %v8847_v5 }
 0x43b   : > { %3155 = vrot.lane.b32.xlu0 %v2742_v16, %s6043_s13  ;;  %v8724_v26 = vpop.permute.xlu1 %2985  ;;  %v8726_v22 = vpop.permute.xlu0 %2983  ;;  %v8739_v16 = vld [vmem:[#allocation2 + $0x38] sm:$0xff] }
 0x43c   : > { %10847 = vst [vmem:[#allocation108_spill] sm:$0xff] %v8724_v26  ;;  %10848 = vst [vmem:[#allocation173_spill] sm:$0xff] %v8726_v22  ;;  %v8835_v22 = vld [vmem:[#allocation2 + $0xf8] sm:$0xff] }
 0x43d   : > { %3161 = vrot.lane.b32.xlu1 %v2745_v3, %s6043_s13  ;;  %10874 = vst [vmem:[#allocation177_spill] sm:$0xff] %v8835_v22 }
 0x43f   : > { %3159 = vrot.lane.b32.xlu0 %v2744_v48, %s6043_s13 }
 0x441   : > { %3229 = vrot.lane.b32.xlu1 %v8729_v23, %s6032_s22  ;;  %v8733_v4 = vpop.permute.xlu1 %2989 }
 0x442   : > { %10850 = vst [vmem:[#allocation33_spill] sm:$0xff] %v8733_v4 }
 0x443   : > { %3227 = vrot.lane.b32.xlu0 %v8735_v20, %s6032_s22  ;;  %v8741_v3 = vpop.permute.xlu0 %2987 }
 0x444   : > { %10852 = vst [vmem:[#allocation52_spill] sm:$0xff] %v8741_v3  ;;  %v8823_v3 = vld [vmem:[#allocation2 + $0xe0] sm:$0xff] }
 0x445   : > { %3233 = vrot.lane.b32.xlu1 %v8739_v16, %s6032_s22  ;;  %v8745_v48 = vpop.permute.xlu1 %2993  ;;  %10871 = vst [vmem:[#allocation152_spill] sm:$0xff] %v8823_v3 }
 0x446   : > { %10853 = vst [vmem:[#allocation125_spill] sm:$0xff] %v8745_v48 }
 0x447   : > { %3231 = vrot.lane.b32.xlu0 %v8747_v1, %s6032_s22  ;;  %v8753_v42 = vpop.permute.xlu0 %2991 }
 0x448   : > { %10854 = vst [vmem:[#allocation126_spill] sm:$0xff] %v8753_v42  ;;  %v8811_v42 = vld [vmem:[#allocation2 + $0xc8] sm:$0xff] }
 0x449   : > { %3237 = vrot.lane.b32.xlu1 %v8751_v37, %s6032_s22  ;;  %v8757_v18 = vpop.permute.xlu1 %2997  ;;  %10867 = vst [vmem:[#allocation128_spill] sm:$0xff] %v8811_v42 }
 0x44a   : > { %10855 = vst [vmem:[#allocation85_spill] sm:$0xff] %v8757_v18  ;;  %v8793_v18 = vld [vmem:[#allocation2 + $0x90] sm:$0xff] }
 0x44b   : > { %3235 = vrot.lane.b32.xlu0 %v8759_v43, %s6032_s22  ;;  %v8765_v63 = vpop.permute.xlu0 %2995  ;;  %10861 = vst [vmem:[#allocation175_spill] sm:$0xff] %v8793_v18 }
 0x44c   : > { %10856 = vst [vmem:[#allocation86_spill] sm:$0xff] %v8765_v63  ;;  %v8799_v63 = vld [vmem:[#allocation2 + $0xb0] sm:$0xff] }
 0x44d   : > { %3241 = vrot.lane.b32.xlu1 %v8763_v34, %s6032_s22  ;;  %v8769_v47 = vpop.permute.xlu1 %3001  ;;  %10863 = vst [vmem:[#allocation37_spill] sm:$0xff] %v8799_v63 }
 0x44e   : > { %10857 = vst [vmem:[#allocation149_spill] sm:$0xff] %v8769_v47 }
 0x44f   : > { %3239 = vrot.lane.b32.xlu0 %v8771_v30, %s6032_s22  ;;  %v8777_v28 = vpop.permute.xlu0 %2999 }
 0x450   : > { %10858 = vst [vmem:[#allocation150_spill] sm:$0xff] %v8777_v28 }
 0x451   : > { %3245 = vrot.lane.b32.xlu1 %v8775_v24, %s6032_s22 }
 0x453   : > { %3243 = vrot.lane.b32.xlu0 %v8781_v0, %s6032_s22  ;;  %v8785_v25 = vpop.permute.xlu1 %3005 }
 0x454   : > { %10859 = vst [vmem:[#allocation109_spill] sm:$0xff] %v8785_v25  ;;  %v8789_v47 = vpop.permute.xlu0 %3003  ;;  %v8805_v25 = vld [vmem:[#allocation2 + $0xa8] sm:$0xff] }
 0x455   : > { %10860 = vst [vmem:[#allocation110_spill] sm:$0xff] %v8789_v47  ;;  %3249 = vrot.lane.b32.xlu1 %v8787_v10, %s6032_s22  ;;  %10865 = vst [vmem:[#allocation55_spill] sm:$0xff] %v8805_v25 }
 0x457   : > { %3247 = vrot.lane.b32.xlu0 %v8793_v18, %s6032_s22  ;;  %v8797_v28 = vpop.permute.xlu1 %3009 }
 0x458   : > { %10862 = vst [vmem:[#allocation176_spill] sm:$0xff] %v8797_v28  ;;  %v8801_v48 = vpop.permute.xlu0 %3007  ;;  %v8817_v28 = vld [vmem:[#allocation2 + $0xc0] sm:$0xff] }
 0x459   : > { %10864 = vst [vmem:[#allocation38_spill] sm:$0xff] %v8801_v48  ;;  %3253 = vrot.lane.b32.xlu1 %v8799_v63, %s6032_s22  ;;  %10869 = vst [vmem:[#allocation88_spill] sm:$0xff] %v8817_v28  ;;  %v2777_v63 = vld [vmem:[#allocation2 + $0x188] sm:$0xff] }
 0x45b   : > { %3251 = vrot.lane.b32.xlu0 %v8805_v25, %s6032_s22  ;;  %v8809_v47 = vpop.permute.xlu1 %3013 }
 0x45c   : > { %10866 = vst [vmem:[#allocation127_spill] sm:$0xff] %v8809_v47  ;;  %v8829_v47 = vld [vmem:[#allocation2 + $0xd8] sm:$0xff] }
 0x45d   : > { %v8813_v4 = vpop.permute.xlu0 %3011  ;;  %3257 = vrot.lane.b32.xlu1 %v8811_v42, %s6032_s22  ;;  %10873 = vst [vmem:[#allocation112_spill] sm:$0xff] %v8829_v47  ;;  %v8889_v42 = vld [vmem:[#allocation2 + $0x150] sm:$0xff] }
 0x45e   : > { %10868 = vst [vmem:[#allocation87_spill] sm:$0xff] %v8813_v4 }
 0x45f   : > { %3255 = vrot.lane.b32.xlu0 %v8817_v28, %s6032_s22  ;;  %v8821_v48 = vpop.permute.xlu1 %3017 }
 0x460   : > { %10870 = vst [vmem:[#allocation151_spill] sm:$0xff] %v8821_v48  ;;  %v8841_v48 = vld [vmem:[#allocation2 + $0xf0] sm:$0xff] }
 0x461   : > { %v8825_v26 = vpop.permute.xlu0 %3015  ;;  %3261 = vrot.lane.b32.xlu1 %v8823_v3, %s6032_s22  ;;  %10875 = vst [vmem:[#allocation178_spill] sm:$0xff] %v8841_v48  ;;  %v8883_v3 = vld [vmem:[#allocation2 + $0x158] sm:$0xff] }
 0x462   : > { %10872 = vst [vmem:[#allocation111_spill] sm:$0xff] %v8825_v26 }
 0x463   : > { %3259 = vrot.lane.b32.xlu0 %v8829_v47, %s6032_s22  ;;  %v8833_v4 = vpop.permute.xlu1 %3021 }
 0x465   : > { %v8837_v27 = vpop.permute.xlu0 %3019  ;;  %3265 = vrot.lane.b32.xlu1 %v8835_v22, %s6032_s22 }
 0x467   : > { %3263 = vrot.lane.b32.xlu0 %v8841_v48, %s6032_s22  ;;  %v8845_v26 = vpop.permute.xlu1 %3025  ;;  %v8865_v48 = vld [vmem:[#allocation2 + $0x120] sm:$0xff] }
 0x469   : > { %v8849_v23 = vpop.permute.xlu0 %3023  ;;  %3269 = vrot.lane.b32.xlu1 %v8847_v5, %s6032_s22 }
 0x46b   : > { %3267 = vrot.lane.b32.xlu0 %v8853_v62, %s6032_s22  ;;  %v8857_v20 = vpop.permute.xlu1 %3029  ;;  %v8877_v62 = vld [vmem:[#allocation2 + $0x138] sm:$0xff] }
 0x46d   : > { %v8861_v22 = vpop.permute.xlu0 %3027  ;;  %3273 = vrot.lane.b32.xlu1 %v8859_v15, %s6032_s22 }
 0x46f   : > { %3271 = vrot.lane.b32.xlu0 %v8865_v48, %s6032_s22  ;;  %v8869_v5 = vpop.permute.xlu1 %3033 }
 0x471   : > { %v8873_v41 = vpop.permute.xlu0 %3031  ;;  %3277 = vrot.lane.b32.xlu1 %v8871_v35, %s6032_s22 }
 0x473   : > { %3275 = vrot.lane.b32.xlu0 %v8877_v62, %s6032_s22  ;;  %v8881_v47 = vpop.permute.xlu1 %3101 }
 0x474   : > { %10878 = vst [vmem:[#allocation56_spill] sm:$0xff] %v8881_v47  ;;  %v8901_v47 = vld [vmem:[#allocation2 + $0x168] sm:$0xff] }
 0x475   : > { %v8885_v28 = vpop.permute.xlu0 %3099  ;;  %3281 = vrot.lane.b32.xlu1 %v8883_v3, %s6032_s22 }
 0x476   : > { %10879 = vst [vmem:[#allocation129_spill] sm:$0xff] %v8885_v28 }
 0x477   : > { %3279 = vrot.lane.b32.xlu0 %v8889_v42, %s6032_s22  ;;  %v8893_v32 = vpop.permute.xlu1 %3105 }
 0x478   : > { %10880 = vst [vmem:[#allocation130_spill] sm:$0xff] %v8893_v32  ;;  %v2776_v32 = vld [vmem:[#allocation2 + $0x180] sm:$0xff] }
 0x479   : > { %v8897_v25 = vpop.permute.xlu0 %3103  ;;  %3285 = vrot.lane.b32.xlu1 %v8895_v38, %s6032_s22 }
 0x47a   : > { %10881 = vst [vmem:[#allocation89_spill] sm:$0xff] %v8897_v25 }
 0x47b   : > { %3283 = vrot.lane.b32.xlu0 %v8901_v47, %s6032_s22  ;;  %v8905_v28 = vpop.permute.xlu1 %3109 }
 0x47c   : > { %10882 = vst [vmem:[#allocation90_spill] sm:$0xff] %v8905_v28 }
 0x47d   : > { %v8907_v19 = vpop.permute.xlu0 %3107  ;;  %3289 = vrot.lane.b32.xlu1 %v2777_v63, %s6032_s22 }
 0x47f   : > { %3287 = vrot.lane.b32.xlu0 %v2776_v32, %s6032_s22  ;;  %v8911_v29 = vpop.permute.xlu1 %3113 }
 0x481   : > { %v8913_v25 = vpop.permute.xlu0 %3111  ;;  %3357 = vrot.lane.b32.xlu1 %v8515_v12, %s6044_s14 }
 0x483   : > { %3355 = vrot.lane.b32.xlu0 %v8520_v33, %s6044_s14  ;;  %v8919_v28 = vpop.permute.xlu1 %3117 }
 0x484   : > { %10883 = vst [vmem:[#allocation153_spill] sm:$0xff] %v8919_v28 }
 0x485   : > { %v8921_v18 = vpop.permute.xlu0 %3115  ;;  %3361 = vrot.lane.b32.xlu1 %v8525_v45, %s6044_s14 }
 0x487   : > { %3359 = vrot.lane.b32.xlu0 %v8530_v60, %s6044_s14  ;;  %v8927_v63 = vpop.permute.xlu1 %3121 }
 0x488   : > { %10884 = vst [vmem:[#allocation154_spill] sm:$0xff] %v8927_v63 }
 0x489   : > { %v8929_v32 = vpop.permute.xlu0 %3119  ;;  %3365 = vrot.lane.b32.xlu1 %v8535_v54, %s6044_s14 }
 0x48b   : > { %3363 = vrot.lane.b32.xlu0 %v8540_v13, %s6044_s14  ;;  %v8935_v12 = vpop.permute.xlu1 %3125 }
 0x48d   : > { %v8937_v33 = vpop.permute.xlu0 %3123  ;;  %3369 = vrot.lane.b32.xlu1 %v8545_v53, %s6044_s14 }
 0x48f   : > { %3367 = vrot.lane.b32.xlu0 %v8550_v6, %s6044_s14  ;;  %v8943_v28 = vpop.permute.xlu1 %3129 }
 0x490   : > { %10885 = vst [vmem:[#allocation113_spill] sm:$0xff] %v8943_v28 }
 0x491   : > { %v8945_v63 = vpop.permute.xlu0 %3127  ;;  %3373 = vrot.lane.b32.xlu1 %v8555_v44, %s6044_s14 }
 0x493   : > { %3371 = vrot.lane.b32.xlu0 %v8560_v2, %s6044_s14  ;;  %v8951_v54 = vpop.permute.xlu1 %3133 }
 0x494   : > { %10886 = vst [vmem:[#allocation114_spill] sm:$0xff] %v8951_v54 }
 0x495   : > { %v8953_v13 = vpop.permute.xlu0 %3131  ;;  %3377 = vrot.lane.b32.xlu1 %v8565_v21, %s6044_s14  ;;  %v4224_v21 = vld [vmem:[%s10129_s2] sm:$0xff] }
 0x496   : > { %10887 = vst [vmem:[#allocation179_spill] sm:$0xff] %v8953_v13 }
 0x497   : > { %3375 = vrot.lane.b32.xlu0 %v8570_v11, %s6044_s14  ;;  %v8959_v53 = vpop.permute.xlu1 %3137 }
 0x498   : > { %10888 = vst [vmem:[#allocation180_spill] sm:$0xff] %v8959_v53 }
 0x499   : > { %v8961_v6 = vpop.permute.xlu0 %3135  ;;  %3381 = vrot.lane.b32.xlu1 %v8575_v55, %s6044_s14 }
 0x49a   : > { %10889 = vst [vmem:[#allocation45_spill] sm:$0xff] %v8961_v6 }
 0x49b   : > { %3379 = vrot.lane.b32.xlu0 %v8580_v46, %s6044_s14  ;;  %v8967_v44 = vpop.permute.xlu1 %3141  ;;  %v4225_v46 = vld [vmem:[%s10129_s2 + $0x8] sm:$0xff] }
 0x49c   : > { %10890 = vst [vmem:[#allocation46_spill] sm:$0xff] %v8967_v44  ;;  %v5745_v44 = vpack.c.bf16 %v4225_v46, %v4224_v21 }
 0x49d   : > { %v8969_v2 = vpop.permute.xlu0 %3139  ;;  %3385 = vrot.lane.b32.xlu1 %v8585_v50, %s6044_s14 }
 0x49e   : > { %10891 = vst [vmem:[#allocation59_spill] sm:$0xff] %v8969_v2  ;;  %5746 = vmatprep.subr.bf16.mxu1 %v5745_v44  ;;  %v2887_v2 = vld [vmem:[#allocation2 + $0xc1] sm:$0xff] }
 0x49f   : > { %3383 = vrot.lane.b32.xlu0 %v8590_v51, %s6044_s14  ;;  %v8975_v11 = vpop.permute.xlu1 %3145  ;;  %v3988_v51 = vsel %vm2443_vm12, %v8859_v15, %v8833_v4  ;;  %5748 = vmatpush3.bf16.msra.mxu1 %v5745_v44  ;;  %v3987_v15 = vsel %vm2443_vm12, %v8865_v48, %v8837_v27  ;;  %v3990_v44 = vsel %vm2443_vm12, %v8871_v35, %v8845_v26  ;;  %v4228_v27 = vld [vmem:[%s10129_s2 + $0x20] sm:$0xff] }
 0x4a0   : > { %10892 = vst [vmem:[#allocation131_spill] sm:$0xff] %v8975_v11  ;;  %v3989_v35 = vsel %vm2443_vm12, %v8877_v62, %v8849_v23  ;;  %v4231_v62 = vld [vmem:[%s10129_s2 + $0x38] sm:$0xff] }
 0x4a1   : > { %v8983_v55 = vpop.permute.xlu0 %3143  ;;  %3389 = vrot.lane.b32.xlu1 %v8595_v40, %s6044_s14  ;;  %v4227_v40 = vld [vmem:[%s10129_s2 + $0x18] sm:$0xff] }
 0x4a2   : > { %10893 = vst [vmem:[#allocation132_spill] sm:$0xff] %v8983_v55  ;;  %v4226_v55 = vld [vmem:[%s10129_s2 + $0x10] sm:$0xff] }
 0x4a3   : > { %3387 = vrot.lane.b32.xlu0 %v8600_v49, %s6044_s14  ;;  %v3150_v50 = vpop.permute.xlu1 %3149  ;;  %v5749_v49 = vpack.c.bf16 %v4227_v40, %v4226_v55  ;;  %v3992_v55 = vsel %vm2443_vm12, %v8883_v3, %v8857_v20  ;;  %v3991_v20 = vsel %vm2443_vm12, %v8889_v42, %v8861_v22  ;;  %v4232_v22 = vld [vmem:[%s10129_s2 + $0x40] sm:$0xff] }
 0x4a4   : > { %v8993_v11 = vsel %vm3995_vm15, %v3988_v51, %v3150_v50 }
 0x4a5   : > { %10894 = vst [vmem:[#allocation91_spill] sm:$0xff] %v8993_v11  ;;  %v3148_v4 = vpop.permute.xlu0 %3147  ;;  %3393 = vrot.lane.b32.xlu1 %v8605_v58, %s6044_s14  ;;  %5750 = vmatprep.subr.bf16.mxu1 %v5749_v49  ;;  %v4229_v58 = vld [vmem:[%s10129_s2 + $0x28] sm:$0xff] }
 0x4a6   : > { %v9007_v21 = vsel %vm3995_vm15, %v3987_v15, %v3148_v4  ;;  %5752 = vmatpush3.bf16.msra.mxu1 %v5749_v49  ;;  %v3994_v15 = vsel %vm2443_vm12, %v8895_v38, %v8869_v5  ;;  %v2885_v11 = vld [vmem:[#allocation2 + $0xa9] sm:$0xff] }
 0x4a7   : > { %10895 = vst [vmem:[#allocation92_spill] sm:$0xff] %v9007_v21  ;;  %3391 = vrot.lane.b32.xlu0 %v8610_v8, %s6044_s14  ;;  %v3154_v46 = vpop.permute.xlu1 %3153  ;;  %v5753_v8 = vpack.c.bf16 %v4229_v58, %v4228_v27  ;;  %v2878_v27 = vld [vmem:[#allocation2 + $0x51] sm:$0xff] }
 0x4a8   : > { %v9015_v51 = vsel %vm3995_vm15, %v3990_v44, %v3154_v46  ;;  %v10924_v21 = vld [vmem:[#allocation123_spill] sm:$0xff] }
 0x4a9   : > { %10896 = vst [vmem:[#allocation155_spill] sm:$0xff] %v9015_v51  ;;  %v3152_v26 = vpop.permute.xlu0 %3151  ;;  %3397 = vrot.lane.b32.xlu1 %v8615_v39, %s6044_s14  ;;  %5754 = vmatprep.subr.bf16.mxu1 %v5753_v8  ;;  %v4230_v39 = vld [vmem:[%s10129_s2 + $0x30] sm:$0xff]  ;;  %v10922_v51 = vld [vmem:[#allocation37_spill] sm:$0xff] }
 0x4aa   : > { %v9029_v48 = vsel %vm3995_vm15, %v3989_v35, %v3152_v26  ;;  %5756 = vmatpush3.bf16.msra.mxu1 %v5753_v8  ;;  %v2877_v35 = vld [vmem:[#allocation2 + $0x49] sm:$0xff] }
 0x4ab   : > { %10897 = vst [vmem:[#allocation156_spill] sm:$0xff] %v9029_v48  ;;  %3395 = vrot.lane.b32.xlu0 %v8620_v14, %s6044_s14  ;;  %v3158_v50 = vpop.permute.xlu1 %3157  ;;  %v5757_v14 = vpack.c.bf16 %v4231_v62, %v4230_v39  ;;  %v2880_v62 = vld [vmem:[#allocation2 + $0x69] sm:$0xff]  ;;  %v2886_v48 = vld [vmem:[#allocation2 + $0xb1] sm:$0xff] }
 0x4ac   : > { %v9037_v40 = vsel %vm3995_vm15, %v3992_v55, %v3158_v50 }
 0x4ad   : > { %10898 = vst [vmem:[#allocation115_spill] sm:$0xff] %v9037_v40  ;;  %v3156_v23 = vpop.permute.xlu0 %3155  ;;  %3485 = vrot.lane.b32.xlu1 %v8641_v31, %s6045_s10  ;;  %5758 = vmatprep.subr.bf16.mxu1 %v5757_v14  ;;  %v3993_v31 = vsel %vm2443_vm12, %v8901_v47, %v8873_v41  ;;  %v2884_v40 = vld [vmem:[#allocation2 + $0x99] sm:$0xff] }
 0x4ae   : > { %v9051_v3 = vsel %vm3995_vm15, %v3991_v20, %v3156_v23  ;;  %5760 = vmatpush3.bf16.msra.mxu1 %v5757_v14  ;;  %v2879_v23 = vld [vmem:[#allocation2 + $0x61] sm:$0xff] }
 0x4af   : > { %10899 = vst [vmem:[#allocation116_spill] sm:$0xff] %v9051_v3  ;;  %3483 = vrot.lane.b32.xlu0 %v8645_v57, %s6045_s10  ;;  %v3162_v4 = vpop.permute.xlu1 %3161  ;;  %5665 = vmatprep.subr.mxu1 %v4232_v22  ;;  %v2883_v3 = vld [vmem:[#allocation2 + $0x91] sm:$0xff] }
 0x4b0   : > { %v9059_v42 = vsel %vm3995_vm15, %v3994_v15, %v3162_v4 }
 0x4b1   : > { %10900 = vst [vmem:[#allocation181_spill] sm:$0xff] %v9059_v42  ;;  %v3160_v49 = vpop.permute.xlu0 %3159  ;;  %3613 = vrot.lane.b32.xlu1 %v8739_v16, %s6034_s24 }
 0x4b2   : > { %v9070_v38 = vsel %vm3995_vm15, %v3993_v31, %v3160_v49  ;;  %5666 = vmatpush3.msra.mxu1 %v4232_v22  ;;  %v2882_v49 = vld [vmem:[#allocation2 + $0x81] sm:$0xff] }
 0x4b3   : > { %10901 = vst [vmem:[#allocation182_spill] sm:$0xff] %v9070_v38  ;;  %3611 = vrot.lane.b32.xlu0 %v8747_v1, %s6034_s24  ;;  %v9074_v57 = vpop.permute.xlu1 %3229  ;;  %v10919_v38 = vld [vmem:[#allocation175_spill] sm:$0xff] }
 0x4b5   : > { %v9076_v5 = vpop.permute.xlu0 %3227  ;;  %3741 = vrot.lane.b32.xlu1 %v8525_v45, %s6046_s27 }
 0x4b7   : > { %3739 = vrot.lane.b32.xlu0 %v8530_v60, %s6046_s27  ;;  %v9082_v47 = vpop.permute.xlu1 %3233 }
 0x4b9   : > { %v9084_v41 = vpop.permute.xlu0 %3231  ;;  %3487 = vrot.lane.b32.xlu1 %v8653_v9, %s6045_s10 }
 0x4bb   : > { %3867 = vrot.lane.b32.xlu0 %v8653_v9, %s6047_s12  ;;  %v9090_v44 = vpop.permute.xlu1 %3237 }
 0x4bd   : > { %v9092_v46 = vpop.permute.xlu0 %3235  ;;  %3489 = vrot.lane.b32.xlu1 %v8649_v7, %s6045_s10 }
 0x4bf   : > { %3869 = vrot.lane.b32.xlu0 %v8649_v7, %s6047_s12  ;;  %v9098_v45 = vpop.permute.xlu1 %3241 }
 0x4c1   : > { %v9100_v60 = vpop.permute.xlu0 %3239  ;;  %3617 = vrot.lane.b32.xlu1 %v8751_v37, %s6034_s24 }
 0x4c3   : > { %3615 = vrot.lane.b32.xlu0 %v8759_v43, %s6034_s24  ;;  %v9106_v9 = vpop.permute.xlu1 %3245 }
 0x4c5   : > { %v9108_v58 = vpop.permute.xlu0 %3243  ;;  %3745 = vrot.lane.b32.xlu1 %v2878_v27, %s6046_s27 }
 0x4c7   : > { %3743 = vrot.lane.b32.xlu0 %v2877_v35, %s6046_s27  ;;  %v9112_v7 = vpop.permute.xlu1 %3249  ;;  %v2881_v35 = vld [vmem:[#allocation2 + $0x79] sm:$0xff] }
 0x4c9   : > { %v9114_v26 = vpop.permute.xlu0 %3247  ;;  %3491 = vrot.lane.b32.xlu1 %v8661_v17, %s6045_s10 }
 0x4cb   : > { %3871 = vrot.lane.b32.xlu0 %v8661_v17, %s6047_s12  ;;  %v9120_v8 = vpop.permute.xlu1 %3253 }
 0x4cd   : > { %v9122_v55 = vpop.permute.xlu0 %3251  ;;  %3493 = vrot.lane.b32.xlu1 %v8657_v61, %s6045_s10 }
 0x4cf   : > { %3873 = vrot.lane.b32.xlu0 %v8657_v61, %s6047_s12  ;;  %v9128_v50 = vpop.permute.xlu1 %3257 }
 0x4d0   : > { %10902 = vst [vmem:[#allocation49_spill] sm:$0xff] %v9128_v50 }
 0x4d1   : > { %v9130_v39 = vpop.permute.xlu0 %3255  ;;  %3621 = vrot.lane.b32.xlu1 %v8763_v34, %s6034_s24 }
 0x4d3   : > { %3619 = vrot.lane.b32.xlu0 %v8771_v30, %s6034_s24  ;;  %v9136_v17 = vpop.permute.xlu1 %3261 }
 0x4d4   : > { %10903 = vst [vmem:[#allocation50_spill] sm:$0xff] %v9136_v17 }
 0x4d5   : > { %v9138_v20 = vpop.permute.xlu0 %3259  ;;  %3749 = vrot.lane.b32.xlu1 %v2880_v62, %s6046_s27 }
 0x4d6   : > { %10904 = vst [vmem:[#allocation60_spill] sm:$0xff] %v9138_v20  ;;  %v10938_v20 = vld [vmem:[#allocation129_spill] sm:$0xff] }
 0x4d7   : > { %3747 = vrot.lane.b32.xlu0 %v2879_v23, %s6046_s27  ;;  %v9142_v61 = vpop.permute.xlu1 %3265 }
 0x4d8   : > { %10905 = vst [vmem:[#allocation133_spill] sm:$0xff] %v9142_v61  ;;  %v2824_v61 = vld [vmem:[#allocation2 + $0xc2] sm:$0xff] }
 0x4d9   : > { %v9144_v14 = vpop.permute.xlu0 %3263  ;;  %3495 = vrot.lane.b32.xlu1 %v8669_v56, %s6045_s10 }
 0x4da   : > { %10906 = vst [vmem:[#allocation134_spill] sm:$0xff] %v9144_v14 }
 0x4db   : > { %3875 = vrot.lane.b32.xlu0 %v8669_v56, %s6047_s12  ;;  %v9150_v15 = vpop.permute.xlu1 %3269 }
 0x4dc   : > { %10907 = vst [vmem:[#allocation93_spill] sm:$0xff] %v9150_v15  ;;  %v2888_v15 = vld [vmem:[#allocation2 + $0xc9] sm:$0xff] }
 0x4dd   : > { %v9152_v4 = vpop.permute.xlu0 %3267  ;;  %3497 = vrot.lane.b32.xlu1 %v8665_v52, %s6045_s10 }
 0x4de   : > { %10908 = vst [vmem:[#allocation94_spill] sm:$0xff] %v9152_v4 }
 0x4df   : > { %3877 = vrot.lane.b32.xlu0 %v8665_v52, %s6047_s12  ;;  %v9158_v22 = vpop.permute.xlu1 %3273 }
 0x4e0   : > { %10909 = vst [vmem:[#allocation157_spill] sm:$0xff] %v9158_v22  ;;  %v10927_v22 = vld [vmem:[#allocation128_spill] sm:$0xff] }
 0x4e1   : > { %v9160_v31 = vpop.permute.xlu0 %3271  ;;  %3625 = vrot.lane.b32.xlu1 %v8775_v24, %s6034_s24 }
 0x4e2   : > { %10910 = vst [vmem:[#allocation158_spill] sm:$0xff] %v9160_v31  ;;  %v10928_v31 = vld [vmem:[#allocation88_spill] sm:$0xff] }
 0x4e3   : > { %3623 = vrot.lane.b32.xlu0 %v8781_v0, %s6034_s24  ;;  %v9166_v56 = vpop.permute.xlu1 %3277 }
 0x4e4   : > { %10911 = vst [vmem:[#allocation117_spill] sm:$0xff] %v9166_v56 }
 0x4e5   : > { %v9168_v27 = vpop.permute.xlu0 %3275  ;;  %3753 = vrot.lane.b32.xlu1 %v2882_v49, %s6046_s27 }
 0x4e6   : > { %10912 = vst [vmem:[#allocation118_spill] sm:$0xff] %v9168_v27  ;;  %v10925_v27 = vld [vmem:[#allocation51_spill] sm:$0xff] }
 0x4e7   : > { %3751 = vrot.lane.b32.xlu0 %v2881_v35, %s6046_s27  ;;  %v9172_v52 = vpop.permute.xlu1 %3281 }
 0x4e8   : > { %10913 = vst [vmem:[#allocation3_spill] sm:$0xff] %v9172_v52  ;;  %v10923_v52 = vld [vmem:[#allocation55_spill] sm:$0xff] }
 0x4e9   : > { %v9174_v62 = vpop.permute.xlu0 %3279  ;;  %3499 = vrot.lane.b32.xlu1 %v8677_v36, %s6045_s10 }
 0x4ea   : > { %10914 = vst [vmem:[#allocation4_spill] sm:$0xff] %v9174_v62 }
 0x4eb   : > { %3879 = vrot.lane.b32.xlu0 %v8677_v36, %s6047_s12  ;;  %v9180_v23 = vpop.permute.xlu1 %3285 }
 0x4ec   : > { %10915 = vst [vmem:[#allocation53_spill] sm:$0xff] %v9180_v23 }
 0x4ed   : > { %v9182_v42 = vpop.permute.xlu0 %3283  ;;  %3501 = vrot.lane.b32.xlu1 %v8673_v59, %s6045_s10 }
 0x4ee   : > { %10916 = vst [vmem:[#allocation54_spill] sm:$0xff] %v9182_v42  ;;  %v10921_v42 = vld [vmem:[#allocation29_spill] sm:$0xff] }
 0x4ef   : > { %3881 = vrot.lane.b32.xlu0 %v8673_v59, %s6047_s12  ;;  %v9188_v49 = vpop.permute.xlu1 %3289 }
 0x4f0   : > { %10917 = vst [vmem:[#allocation135_spill] sm:$0xff] %v9188_v49 }
 0x4f1   : > { %v9190_v35 = vpop.permute.xlu0 %3287  ;;  %3629 = vrot.lane.b32.xlu1 %v8787_v10, %s6034_s24 }
 0x4f2   : > { %10918 = vst [vmem:[#allocation136_spill] sm:$0xff] %v9190_v35  ;;  %v10920_v35 = vld [vmem:[#allocation30_spill] sm:$0xff] }
 0x4f3   : > { %3627 = vrot.lane.b32.xlu0 %v10919_v38, %s6034_s24  ;;  %v9196_v36 = vpop.permute.xlu1 %3357 }
 0x4f5   : > { %v9198_v23 = vpop.permute.xlu0 %3355  ;;  %3757 = vrot.lane.b32.xlu1 %v2884_v40, %s6046_s27 }
 0x4f7   : > { %3755 = vrot.lane.b32.xlu0 %v2883_v3, %s6046_s27  ;;  %v9202_v59 = vpop.permute.xlu1 %3361 }
 0x4f9   : > { %v9204_v49 = vpop.permute.xlu0 %3359  ;;  %3503 = vrot.lane.b32.xlu1 %v10920_v35, %s6045_s10 }
 0x4fb   : > { %3883 = vrot.lane.b32.xlu0 %v10920_v35, %s6047_s12  ;;  %v9210_v10 = vpop.permute.xlu1 %3365 }
 0x4fd   : > { %v9212_v38 = vpop.permute.xlu0 %3363  ;;  %3505 = vrot.lane.b32.xlu1 %v10921_v42, %s6045_s10 }
 0x4ff   : > { %3885 = vrot.lane.b32.xlu0 %v10921_v42, %s6047_s12  ;;  %v9218_v40 = vpop.permute.xlu1 %3369 }
 0x501   : > { %v9220_v3 = vpop.permute.xlu0 %3367  ;;  %3633 = vrot.lane.b32.xlu1 %v10922_v51, %s6034_s24 }
 0x503   : > { %3631 = vrot.lane.b32.xlu0 %v10923_v52, %s6034_s24  ;;  %v9226_v35 = vpop.permute.xlu1 %3373 }
 0x505   : > { %v9228_v62 = vpop.permute.xlu0 %3371  ;;  %3761 = vrot.lane.b32.xlu1 %v2886_v48, %s6046_s27 }
 0x507   : > { %3759 = vrot.lane.b32.xlu0 %v2885_v11, %s6046_s27  ;;  %v9232_v42 = vpop.permute.xlu1 %3377 }
 0x509   : > { %v9234_v56 = vpop.permute.xlu0 %3375  ;;  %3507 = vrot.lane.b32.xlu1 %v10924_v21, %s6045_s10 }
 0x50b   : > { %3887 = vrot.lane.b32.xlu0 %v10924_v21, %s6047_s12  ;;  %v9240_v51 = vpop.permute.xlu1 %3381 }
 0x50d   : > { %v9242_v52 = vpop.permute.xlu0 %3379  ;;  %3509 = vrot.lane.b32.xlu1 %v10925_v27, %s6045_s10 }
 0x50f   : > { %3889 = vrot.lane.b32.xlu0 %v10925_v27, %s6047_s12  ;;  %v9248_v11 = vpop.permute.xlu1 %3385 }
 0x510   : > { %10926 = vst [vmem:[#allocation159_spill] sm:$0xff] %v9248_v11 }
 0x511   : > { %v9250_v48 = vpop.permute.xlu0 %3383  ;;  %3637 = vrot.lane.b32.xlu1 %v10927_v22, %s6034_s24 }
 0x513   : > { %3635 = vrot.lane.b32.xlu0 %v10928_v31, %s6034_s24  ;;  %v9256_v21 = vpop.permute.xlu1 %3389  ;;  %v2825_v31 = vld [vmem:[#allocation2 + $0xca] sm:$0xff] }
 0x514   : > { %10929 = vst [vmem:[#allocation160_spill] sm:$0xff] %v9256_v21  ;;  %v2650_v21 = vld [vmem:[#allocation2] sm:$0xff] }
 0x515   : > { %v9258_v4 = vpop.permute.xlu0 %3387  ;;  %3765 = vrot.lane.b32.xlu1 %v2888_v15, %s6046_s27 }
 0x516   : > { %10930 = vst [vmem:[#allocation175_spill] sm:$0xff] %v9258_v4  ;;  %v2651_v4 = vld [vmem:[#allocation2 + $0x8] sm:$0xff] }
 0x517   : > { %3763 = vrot.lane.b32.xlu0 %v2887_v2, %s6046_s27  ;;  %v9262_v27 = vpop.permute.xlu1 %3393 }
 0x518   : > { %10931 = vst [vmem:[#allocation30_spill] sm:$0xff] %v9262_v27  ;;  %v10935_v27 = vld [vmem:[#allocation152_spill] sm:$0xff] }
 0x519   : > { %v9264_v53 = vpop.permute.xlu0 %3391  ;;  %3511 = vrot.lane.b32.xlu1 %v2824_v61, %s6045_s10 }
 0x51a   : > { %10932 = vst [vmem:[#allocation29_spill] sm:$0xff] %v9264_v53  ;;  %v10936_v53 = vld [vmem:[#allocation112_spill] sm:$0xff] }
 0x51b   : > { %3891 = vrot.lane.b32.xlu0 %v2824_v61, %s6047_s12  ;;  %v9268_v22 = vpop.permute.xlu1 %3397  ;;  %v2890_v61 = vld [vmem:[#allocation2 + $0xe1] sm:$0xff] }
 0x51c   : > { %10933 = vst [vmem:[#allocation37_spill] sm:$0xff] %v9268_v22  ;;  %v2889_v22 = vld [vmem:[#allocation2 + $0xd9] sm:$0xff] }
 0x51d   : > { %v9270_v14 = vpop.permute.xlu0 %3395  ;;  %3513 = vrot.lane.b32.xlu1 %v2825_v31, %s6045_s10 }
 0x51e   : > { %10934 = vst [vmem:[#allocation55_spill] sm:$0xff] %v9270_v14  ;;  %v10937_v14 = vld [vmem:[#allocation83_spill] sm:$0xff] }
 0x51f   : > { %3893 = vrot.lane.b32.xlu0 %v2825_v31, %s6047_s12  ;;  %v3486_v15 = vpop.permute.xlu1 %3485  ;;  %v3963_v54 = vsel %vm2443_vm12, %v2650_v21, %v10937_v14  ;;  %v10939_v14 = vld [vmem:[#allocation124_spill] sm:$0xff] }
 0x520   : > { %v3964_v21 = vsel %vm2443_vm12, %v2651_v4, %v10939_v14 }
 0x521   : > { %v3484_v2 = vpop.permute.xlu0 %3483  ;;  %3641 = vrot.lane.b32.xlu1 %v10935_v27, %s6034_s24  ;;  %v3996_v27 = vsel %vm3995_vm15, %v3963_v54, %v10938_v20  ;;  %v10940_v20 = vld [vmem:[#allocation56_spill] sm:$0xff] }
 0x522   : > { %v4028_v13 = vsel %vm1545_vm4, %v3996_v27, %v9076_v5  ;;  %v3997_v50 = vsel %vm3995_vm15, %v3964_v21, %v10940_v20  ;;  %v2827_v27 = vld [vmem:[#allocation2 + $0xe2] sm:$0xff] }
 0x523   : > { %3639 = vrot.lane.b32.xlu0 %v10936_v53, %s6034_s24  ;;  %v3614_v6 = vpop.permute.xlu1 %3613  ;;  %v2826_v53 = vld [vmem:[#allocation2 + $0xda] sm:$0xff]  ;;  %v4029_v28 = vsel %vm1545_vm4, %v3997_v50, %v9074_v57  ;;  %v10944_v20 = vld [vmem:[#allocation34_spill] sm:$0xff] }
 0x524   : > { %v4062_v4 = vsel %vm4060_vm0, %v4029_v28, %v9196_v36  ;;  %v10942_v28 = vld [vmem:[#allocation178_spill] sm:$0xff] }
 0x525   : > { %v3612_v17 = vpop.permute.xlu0 %3611  ;;  %3769 = vrot.lane.b32.xlu1 %v2890_v61, %s6046_s27  ;;  %v4061_v61 = vsel %vm4060_vm0, %v4028_v13, %v9198_v23 }
 0x527   : > { %3767 = vrot.lane.b32.xlu0 %v2889_v22, %s6046_s27  ;;  %v3742_v31 = vpop.permute.xlu1 %3741  ;;  %v4094_v22 = vsel %vm4093_vm1, %v4061_v61, %v3484_v2 }
 0x528   : > { %v4126_v5 = vsel %vm1611_vm6, %v4094_v22, %v3612_v17  ;;  %v2891_v22 = vld [vmem:[#allocation2 + $0xf1] sm:$0xff] }
 0x529   : > { %v3740_v11 = vpop.permute.xlu0 %3739  ;;  %3515 = vrot.lane.b32.xlu1 %v2826_v53, %s6045_s10 }
 0x52a   : > { %v4159_v13 = vsel %vm4158_vm2, %v4126_v5, %v3740_v11  ;;  %v10941_v11 = vld [vmem:[#allocation177_spill] sm:$0xff] }
 0x52b   : > { %3895 = vrot.lane.b32.xlu0 %v2826_v53, %s6047_s12  ;;  %v3488_v54 = vpop.permute.xlu1 %3487  ;;  %v4095_v53 = vsel %vm4093_vm1, %v4062_v4, %v3486_v15  ;;  %v2892_v15 = vld [vmem:[#allocation2 + $0xf9] sm:$0xff] }
 0x52c   : > { %v4127_v61 = vsel %vm1611_vm6, %v4095_v53, %v3614_v6  ;;  %v10943_v6 = vld [vmem:[#allocation147_spill] sm:$0xff] }
 0x52d   : > { %v3868_v23 = vpop.permute.xlu0 %3867  ;;  %3517 = vrot.lane.b32.xlu1 %v2827_v27, %s6045_s10  ;;  %v4160_v57 = vsel %vm4158_vm2, %v4127_v61, %v3742_v31  ;;  %v3965_v31 = vsel %vm2443_vm12, %v10944_v20, %v10943_v6  ;;  %v10946_v61 = vld [vmem:[#allocation84_spill] sm:$0xff] }
 0x52e   : > { %v4192_v2 = vsel %vm4191_vm3, %v4159_v13, %v3868_v23  ;;  %v2828_v23 = vld [vmem:[#allocation2 + $0xf2] sm:$0xff] }
 0x52f   : > { %3897 = vrot.lane.b32.xlu0 %v2827_v27, %s6047_s12  ;;  %5667 = vmatprep.mubr.msk.f32.mxu1 %vm1677_vm8, %v4192_v2  ;;  %v3490_v17 = vpop.permute.xlu1 %3489  ;;  %v10945_v27 = vld [vmem:[#allocation89_spill] sm:$0xff] }
 0x530   : > { %v3998_v13 = vsel %vm3995_vm15, %v3965_v31, %v10945_v27 }
 0x531   : > { %v3870_v50 = vpop.permute.xlu0 %3869  ;;  %3645 = vrot.lane.b32.xlu1 %v10941_v11, %s6034_s24  ;;  %v4030_v4 = vsel %vm1545_vm4, %v3998_v13, %v9084_v41 }
 0x532   : > { %v4193_v14 = vsel %vm4191_vm3, %v4160_v57, %v3870_v50  ;;  %v4063_v53 = vsel %vm4060_vm0, %v4030_v4, %v9204_v49  ;;  %v10947_v57 = vld [vmem:[#allocation174_spill] sm:$0xff]  ;;  %v10949_v4 = vld [vmem:[#allocation41_spill] sm:$0xff] }
 0x533   : > { %3643 = vrot.lane.b32.xlu0 %v10942_v28, %s6034_s24  ;;  %5668 = vmatmul.mubr.msk.f32.vlgmr.msra.gmra.mrb[0].mxu1 %vm1677_vm8, %v4193_v14  ;;  %v3618_v36 = vpop.permute.xlu1 %3617  ;;  %v3966_v50 = vsel %vm2443_vm12, %v10947_v57, %v10946_v61  ;;  %v4096_v11 = vsel %vm4093_vm1, %v4063_v53, %v3488_v54  ;;  %v10948_v28 = vld [vmem:[#allocation130_spill] sm:$0xff]  ;;  %v2894_v53 = vld [vmem:[#allocation2 + $0x111] sm:$0xff] }
 0x534   : > { %v2893_v57 = vld [vmem:[#allocation2 + $0x109] sm:$0xff] }
 0x535   : > { %v3616_v21 = vpop.permute.xlu0 %3615  ;;  %3773 = vrot.lane.b32.xlu1 %v2892_v15, %s6046_s27  ;;  %v3999_v15 = vsel %vm3995_vm15, %v3966_v50, %v10948_v28  ;;  %v2830_v28 = vld [vmem:[#allocation2 + $0x10a] sm:$0xff] }
 0x536   : > { %v4128_v41 = vsel %vm1611_vm6, %v4096_v11, %v3616_v21  ;;  %v4031_v6 = vsel %vm1545_vm4, %v3999_v15, %v9082_v47 }
 0x537   : > { %3771 = vrot.lane.b32.xlu0 %v2891_v22, %s6046_s27  ;;  %v3746_v5 = vpop.permute.xlu1 %3745  ;;  %v2829_v22 = vld [vmem:[#allocation2 + $0xfa] sm:$0xff]  ;;  %v4064_v54 = vsel %vm4060_vm0, %v4031_v6, %v9202_v59  ;;  %v10950_v59 = vld [vmem:[#allocation42_spill] sm:$0xff] }
 0x538   : > { %v4097_v27 = vsel %vm4093_vm1, %v4064_v54, %v3490_v17  ;;  %v10952_v6 = vld [vmem:[#allocation148_spill] sm:$0xff] }
 0x539   : > { %v3744_v2 = vpop.permute.xlu0 %3743  ;;  %3519 = vrot.lane.b32.xlu1 %v2828_v23, %s6045_s10  ;;  %v4129_v13 = vsel %vm1611_vm6, %v4097_v27, %v3618_v36  ;;  %v10951_v36 = vld [vmem:[#allocation107_spill] sm:$0xff] }
 0x53a   : > { %v4161_v49 = vsel %vm4158_vm2, %v4128_v41, %v3744_v2  ;;  %v4162_v47 = vsel %vm4158_vm2, %v4129_v13, %v3746_v5  ;;  %v3967_v5 = vsel %vm2443_vm12, %v8747_v1, %v10951_v36  ;;  %v3968_v1 = vsel %vm2443_vm12, %v8739_v16, %v10952_v6  ;;  %v10954_v36 = vld [vmem:[#allocation173_spill] sm:$0xff]  ;;  %v10955_v6 = vld [vmem:[#allocation108_spill] sm:$0xff] }
 0x53b   : > { %3899 = vrot.lane.b32.xlu0 %v2828_v23, %s6047_s12  ;;  %v3492_v14 = vpop.permute.xlu1 %3491  ;;  %v4000_v11 = vsel %vm3995_vm15, %v3967_v5, %v8907_v19  ;;  %v10953_v19 = vld [vmem:[#allocation90_spill] sm:$0xff] }
 0x53c   : > { %v4032_v15 = vsel %vm1545_vm4, %v4000_v11, %v9092_v46  ;;  %v4001_v54 = vsel %vm3995_vm15, %v3968_v1, %v10953_v19  ;;  %v2927_v11 = vld [vmem:[#allocation2 + $0x122] sm:$0xff] }
 0x53d   : > { %v3872_v20 = vpop.permute.xlu0 %3871  ;;  %3521 = vrot.lane.b32.xlu1 %v2829_v22, %s6045_s10  ;;  %v4033_v27 = vsel %vm1545_vm4, %v4001_v54, %v9090_v44  ;;  %v2864_v44 = vld [vmem:[#allocation2 + $0x128] sm:$0xff] }
 0x53e   : > { %v4194_v31 = vsel %vm4191_vm3, %v4161_v49, %v3872_v20  ;;  %v4066_v16 = vsel %vm4060_vm0, %v4033_v27, %v9210_v10  ;;  %v2863_v10 = vld [vmem:[#allocation2 + $0x120] sm:$0xff] }
 0x53f   : > { %3901 = vrot.lane.b32.xlu0 %v2829_v22, %s6047_s12  ;;  %5670 = vmatprep.mubr.msk.f32.mxu1 %vm1677_vm8, %v4194_v31  ;;  %v3494_v21 = vpop.permute.xlu1 %3493  ;;  %v4065_v22 = vsel %vm4060_vm0, %v4032_v15, %v9212_v38  ;;  %v2831_v31 = vld [vmem:[#allocation2 + $0x112] sm:$0xff] }
 0x540   : > { %v4098_v49 = vsel %vm4093_vm1, %v4065_v22, %v3492_v14  ;;  %v2896_v22 = vld [vmem:[#allocation2 + $0x129] sm:$0xff] }
 0x541   : > { %v3874_v23 = vpop.permute.xlu0 %3873  ;;  %3649 = vrot.lane.b32.xlu1 %v10949_v4, %s6034_s24 }
 0x542   : > { %v4195_v2 = vsel %vm4191_vm3, %v4162_v47, %v3874_v23  ;;  %v4099_v47 = vsel %vm4093_vm1, %v4066_v16, %v3494_v21  ;;  %v2866_v16 = vld [vmem:[#allocation2 + $0x140] sm:$0xff] }
 0x543   : > { %3647 = vrot.lane.b32.xlu0 %v10950_v59, %s6034_s24  ;;  %5671 = vmatmul.mubr.msk.f32.gmra.mrb[2].mxu1 %vm1677_vm8, %v4195_v2  ;;  %v3622_v17 = vpop.permute.xlu1 %3621 }
 0x544   : > { %v4131_v4 = vsel %vm1611_vm6, %v4099_v47, %v3622_v17  ;;  %v3969_v17 = vsel %vm2443_vm12, %v8759_v43, %v10954_v36  ;;  %v3970_v43 = vsel %vm2443_vm12, %v8751_v37, %v10955_v6  ;;  %v2865_v47 = vld [vmem:[#allocation2 + $0x138] sm:$0xff] }
 0x545   : > { %v3620_v61 = vpop.permute.xlu0 %3619  ;;  %3777 = vrot.lane.b32.xlu1 %v2894_v53, %s6046_s27 }
 0x546   : > { %v4130_v46 = vsel %vm1611_vm6, %v4098_v49, %v3620_v61  ;;  %v2800_v61 = vld [vmem:[#allocation2 + $0x121] sm:$0xff]  ;;  %v4003_v49 = vsel %vm3995_vm15, %v3970_v43, %v8911_v29 }
 0x547   : > { %3775 = vrot.lane.b32.xlu0 %v2893_v57, %s6046_s27  ;;  %v3750_v50 = vpop.permute.xlu1 %3749  ;;  %v4035_v19 = vsel %vm1545_vm4, %v4003_v49, %v9098_v45  ;;  %v2833_v45 = vld [vmem:[#allocation2 + $0x12a] sm:$0xff] }
 0x548   : > { %v4164_v2 = vsel %vm4158_vm2, %v4131_v4, %v3750_v50  ;;  %v4002_v50 = vsel %vm3995_vm15, %v3969_v17, %v8913_v25  ;;  %v4068_v37 = vsel %vm4060_vm0, %v4035_v19, %v9218_v40 }
 0x549   : > { %v3748_v41 = vpop.permute.xlu0 %3747  ;;  %3523 = vrot.lane.b32.xlu1 %v2830_v28, %s6045_s10 }
 0x54a   : > { %v4163_v38 = vsel %vm4158_vm2, %v4130_v46, %v3748_v41 }
 0x54b   : > { %3903 = vrot.lane.b32.xlu0 %v2830_v28, %s6047_s12  ;;  %v3496_v20 = vpop.permute.xlu1 %3495  ;;  %v4034_v28 = vsel %vm1545_vm4, %v4002_v50, %v9100_v60 }
 0x54c   : > { %v4067_v41 = vsel %vm4060_vm0, %v4034_v28, %v9220_v3 }
 0x54d   : > { %v3876_v13 = vpop.permute.xlu0 %3875  ;;  %3525 = vrot.lane.b32.xlu1 %v2831_v31, %s6045_s10  ;;  %v4100_v1 = vsel %vm4093_vm1, %v4067_v41, %v3496_v20 }
 0x54e   : > { %v4196_v14 = vsel %vm4191_vm3, %v4163_v38, %v3876_v13 }
 0x54f   : > { %3905 = vrot.lane.b32.xlu0 %v2831_v31, %s6047_s12  ;;  %5673 = vmatprep.mubr.msk.f32.mxu1 %vm1677_vm8, %v4196_v14  ;;  %v3498_v23 = vpop.permute.xlu1 %3497 }
 0x550   : > { %v4101_v46 = vsel %vm4093_vm1, %v4068_v37, %v3498_v23  ;;  %v10956_v23 = vld [vmem:[#allocation52_spill] sm:$0xff] }
 0x551   : > { %v3878_v59 = vpop.permute.xlu0 %3877  ;;  %3653 = vrot.lane.b32.xlu1 %v2864_v44, %s6034_s24  ;;  %v3971_v4 = vsel %vm2443_vm12, %v8771_v30, %v10956_v23  ;;  %v2868_v37 = vld [vmem:[#allocation2 + $0x158] sm:$0xff] }
 0x552   : > { %v4197_v53 = vsel %vm4191_vm3, %v4164_v2, %v3878_v59  ;;  %v4004_v2 = vsel %vm3995_vm15, %v3971_v4, %v8921_v18  ;;  %v2802_v59 = vld [vmem:[#allocation2 + $0x139] sm:$0xff] }
 0x553   : > { %3651 = vrot.lane.b32.xlu0 %v2863_v10, %s6034_s24  ;;  %5674 = vmatmul.mubr.msk.f32.gmra.mrb[4].mxu1 %vm1677_vm8, %v4197_v53  ;;  %v3626_v21 = vpop.permute.xlu1 %3625  ;;  %v4036_v53 = vsel %vm1545_vm4, %v4004_v2, %v9108_v58  ;;  %v10958_v18 = vld [vmem:[#allocation153_spill] sm:$0xff] }
 0x554   : > { %v4133_v31 = vsel %vm1611_vm6, %v4101_v46, %v3626_v21  ;;  %v4069_v21 = vsel %vm4060_vm0, %v4036_v53, %v9228_v62 }
 0x555   : > { %v3624_v57 = vpop.permute.xlu0 %3623  ;;  %3399 = vrot.lane.b32.xlu1 %v2800_v61, %s6044_s14 }
 0x556   : > { %v4132_v60 = vsel %vm1611_vm6, %v4100_v1, %v3624_v57 }
 0x557   : > { %3779 = vrot.lane.b32.xlu0 %v2800_v61, %s6046_s27  ;;  %v3754_v5 = vpop.permute.xlu1 %3753  ;;  %v10957_v61 = vld [vmem:[#allocation33_spill] sm:$0xff] }
 0x558   : > { %v4166_v27 = vsel %vm4158_vm2, %v4133_v31, %v3754_v5  ;;  %v3972_v30 = vsel %vm2443_vm12, %v8763_v34, %v10957_v61  ;;  %v2929_v5 = vld [vmem:[#allocation2 + $0x13a] sm:$0xff]  ;;  %v2867_v31 = vld [vmem:[#allocation2 + $0x150] sm:$0xff] }
 0x559   : > { %v3752_v15 = vpop.permute.xlu0 %3751  ;;  %3907 = vrot.lane.b32.xlu1 %v2927_v11, %s6047_s12  ;;  %v4005_v17 = vsel %vm3995_vm15, %v3972_v30, %v10958_v18  ;;  %v6011_v61 = vld [vmem:[#allocation2 + $0x90] sm:$0xff]  ;;  %v10962_v30 = vld [vmem:[#allocation86_spill] sm:$0xff] }
 0x55a   : > { %v4165_v3 = vsel %vm4158_vm2, %v4132_v60, %v3752_v15  ;;  %v4037_v50 = vsel %vm1545_vm4, %v4005_v17, %v9106_v9  ;;  %v2898_v15 = vld [vmem:[#allocation2 + $0x141] sm:$0xff] }
 0x55b   : > { %3781 = vrot.lane.b32.xlu0 %v2896_v22, %s6046_s27  ;;  %v3500_v25 = vpop.permute.xlu1 %3499  ;;  %v4070_v34 = vsel %vm4060_vm0, %v4037_v50, %v9226_v35  ;;  %v10959_v60 = vld [vmem:[#allocation126_spill] sm:$0xff]  ;;  %v2837_v17 = vld [vmem:[#allocation2 + $0x15a] sm:$0xff] }
 0x55c   : > { %v4102_v57 = vsel %vm4093_vm1, %v4069_v21, %v3500_v25  ;;  %v2835_v25 = vld [vmem:[#allocation2 + $0x142] sm:$0xff]  ;;  %v3973_v19 = vsel %vm2443_vm12, %v8781_v0, %v10959_v60 }
 0x55d   : > { %v3880_v54 = vpop.permute.xlu0 %3879  ;;  %3527 = vrot.lane.b32.xlu1 %v2927_v11, %s6045_s10 }
 0x55e   : > { %v4198_v20 = vsel %vm4191_vm3, %v4165_v3, %v3880_v54  ;;  %v4006_v54 = vsel %vm3995_vm15, %v3973_v19, %v8929_v32 }
 0x55f   : > { %3401 = vrot.lane.b32.xlu0 %v2896_v22, %s6044_s14  ;;  %5676 = vmatprep.mubr.msk.f32.mxu1 %vm1677_vm8, %v4198_v20  ;;  %v3502_v29 = vpop.permute.xlu1 %3501  ;;  %v4038_v20 = vsel %vm1545_vm4, %v4006_v54, %v9114_v26 }
 0x560   : > { %v4103_v41 = vsel %vm4093_vm1, %v4070_v34, %v3502_v29  ;;  %v4071_v29 = vsel %vm4060_vm0, %v4038_v20, %v9234_v56  ;;  %v6013_v20 = vld [vmem:[#allocation2 + $0xa8] sm:$0xff] }
 0x561   : > { %v3882_v38 = vpop.permute.xlu0 %3881  ;;  %3529 = vrot.lane.b32.xlu1 %v2833_v45, %s6045_s10 }
 0x562   : > { %v4199_v13 = vsel %vm4191_vm3, %v4166_v27, %v3882_v38  ;;  %v10961_v38 = vld [vmem:[#allocation154_spill] sm:$0xff] }
 0x563   : > { %3909 = vrot.lane.b32.xlu0 %v2833_v45, %s6047_s12  ;;  %5677 = vmatmul.mubr.msk.f32.gmra.mrb[6].mxu1 %vm1677_vm8, %v4199_v13  ;;  %v3630_v40 = vpop.permute.xlu1 %3629  ;;  %v10960_v45 = vld [vmem:[#allocation125_spill] sm:$0xff] }
 0x564   : > { %v4135_v9 = vsel %vm1611_vm6, %v4103_v41, %v3630_v40  ;;  %v3974_v0 = vsel %vm2443_vm12, %v8775_v24, %v10960_v45  ;;  %v2804_v40 = vld [vmem:[#allocation2 + $0x151] sm:$0xff] }
 0x565   : > { %v3628_v14 = vpop.permute.xlu0 %3627  ;;  %3657 = vrot.lane.b32.xlu1 %v2866_v16, %s6034_s24  ;;  %v4007_v13 = vsel %vm3995_vm15, %v3974_v0, %v10961_v38  ;;  %v2870_v41 = vld [vmem:[#allocation2 + $0x170] sm:$0xff] }
 0x566   : > { %v4134_v58 = vsel %vm1611_vm6, %v4102_v57, %v3628_v14  ;;  %v4039_v16 = vsel %vm1545_vm4, %v4007_v13, %v9112_v7  ;;  %v2931_v7 = vld [vmem:[#allocation2 + $0x152] sm:$0xff]  ;;  %v3975_v57 = vsel %vm2443_vm12, %v6011_v61, %v10962_v30  ;;  %v10965_v13 = vld [vmem:[#allocation149_spill] sm:$0xff] }
 0x567   : > { %3655 = vrot.lane.b32.xlu0 %v2865_v47, %s6034_s24  ;;  %v3758_v44 = vpop.permute.xlu1 %3757  ;;  %v4072_v24 = vsel %vm4060_vm0, %v4039_v16, %v9232_v42  ;;  %v2900_v42 = vld [vmem:[#allocation2 + $0x159] sm:$0xff]  ;;  %v4008_v18 = vsel %vm3995_vm15, %v3975_v57, %v8937_v33  ;;  %v6014_v38 = vld [vmem:[#allocation2 + $0xb0] sm:$0xff] }
 0x568   : > { %v4168_v6 = vsel %vm4158_vm2, %v4135_v9, %v3758_v44  ;;  %v2871_v30 = vld [vmem:[#allocation2 + $0x180] sm:$0xff] }
 0x569   : > { %v3756_v10 = vpop.permute.xlu0 %3755  ;;  %3403 = vrot.lane.b32.xlu1 %v2802_v59, %s6044_s14 }
 0x56a   : > { %v4167_v62 = vsel %vm4158_vm2, %v4134_v58, %v3756_v10  ;;  %v4040_v58 = vsel %vm1545_vm4, %v4008_v18, %v9122_v55 }
 0x56b   : > { %3783 = vrot.lane.b32.xlu0 %v2802_v59, %s6046_s27  ;;  %v3504_v36 = vpop.permute.xlu1 %3503  ;;  %v4073_v50 = vsel %vm4060_vm0, %v4040_v58, %v9242_v52  ;;  %v10969_v58 = vld [vmem:[#allocation110_spill] sm:$0xff] }
 0x56c   : > { %v4104_v27 = vsel %vm4093_vm1, %v4071_v29, %v3504_v36 }
 0x56d   : > { %v3884_v11 = vpop.permute.xlu0 %3883  ;;  %3911 = vrot.lane.b32.xlu1 %v2929_v5, %s6047_s12 }
 0x56e   : > { %v4200_v28 = vsel %vm4191_vm3, %v4167_v62, %v3884_v11  ;;  %v6012_v62 = vld [vmem:[#allocation2 + $0x98] sm:$0xff]  ;;  %v10963_v11 = vld [vmem:[#allocation85_spill] sm:$0xff] }
 0x56f   : > { %3785 = vrot.lane.b32.xlu0 %v2898_v15, %s6046_s27  ;;  %5679 = vmatprep.mubr.msk.f32.mxu1 %vm1677_vm8, %v4200_v28  ;;  %v3506_v22 = vpop.permute.xlu1 %3505  ;;  %v3976_v34 = vsel %vm2443_vm12, %v6012_v62, %v10963_v11  ;;  %v10970_v62 = vld [vmem:[#allocation179_spill] sm:$0xff] }
 0x570   : > { %v4105_v23 = vsel %vm4093_vm1, %v4072_v24, %v3506_v22  ;;  %v4009_v33 = vsel %vm3995_vm15, %v3976_v34, %v8935_v12  ;;  %v10967_v24 = vld [vmem:[#allocation49_spill] sm:$0xff] }
 0x571   : > { %v3886_v43 = vpop.permute.xlu0 %3885  ;;  %3531 = vrot.lane.b32.xlu1 %v2929_v5, %s6045_s10  ;;  %v4041_v22 = vsel %vm1545_vm4, %v4009_v33, %v9120_v8  ;;  %v2935_v34 = vld [vmem:[#allocation2 + $0x182] sm:$0xff] }
 0x572   : > { %v4201_v1 = vsel %vm4191_vm3, %v4168_v6, %v3886_v43  ;;  %v4074_v6 = vsel %vm4060_vm0, %v4041_v22, %v9240_v51  ;;  %v2904_v22 = vld [vmem:[#allocation2 + $0x189] sm:$0xff] }
 0x573   : > { %3405 = vrot.lane.b32.xlu0 %v2898_v15, %s6044_s14  ;;  %5680 = vmatmul.mubr.msk.f32.gmra.mrb[8].mxu1 %vm1677_vm8, %v4201_v1  ;;  %v3634_v35 = vpop.permute.xlu1 %3633  ;;  %v2869_v1 = vld [vmem:[#allocation2 + $0x168] sm:$0xff] }
 0x574   : > { %v4137_v44 = vsel %vm1611_vm6, %v4105_v23, %v3634_v35 }
 0x575   : > { %v3632_v49 = vpop.permute.xlu0 %3631  ;;  %3533 = vrot.lane.b32.xlu1 %v2835_v25, %s6045_s10 }
 0x576   : > { %v4136_v26 = vsel %vm1611_vm6, %v4104_v27, %v3632_v49 }
 0x577   : > { %3913 = vrot.lane.b32.xlu0 %v2835_v25, %s6047_s12  ;;  %v3762_v3 = vpop.permute.xlu1 %3761  ;;  %v2806_v25 = vld [vmem:[#allocation2 + $0x169] sm:$0xff] }
 0x578   : > { %v4170_v2 = vsel %vm4158_vm2, %v4137_v44, %v3762_v3  ;;  %v2933_v3 = vld [vmem:[#allocation2 + $0x16a] sm:$0xff] }
 0x579   : > { %v3760_v46 = vpop.permute.xlu0 %3759  ;;  %3661 = vrot.lane.b32.xlu1 %v2868_v37, %s6034_s24  ;;  %v2902_v37 = vld [vmem:[#allocation2 + $0x171] sm:$0xff] }
 0x57a   : > { %v4169_v56 = vsel %vm4158_vm2, %v4136_v26, %v3760_v46  ;;  %v10964_v46 = vld [vmem:[#allocation150_spill] sm:$0xff]  ;;  %v3978_v26 = vsel %vm2443_vm12, %v6014_v38, %v10965_v13  ;;  %v2873_v38 = vld [vmem:[#allocation2 + $0x198] sm:$0xff] }
 0x57b   : > { %3659 = vrot.lane.b32.xlu0 %v2867_v31, %s6034_s24  ;;  %v3508_v32 = vpop.permute.xlu1 %3507  ;;  %v3977_v29 = vsel %vm2443_vm12, %v6013_v20, %v10964_v46 }
 0x57c   : > { %v4106_v28 = vsel %vm4093_vm1, %v4073_v50, %v3508_v32  ;;  %v4010_v45 = vsel %vm3995_vm15, %v3977_v29, %v8945_v63  ;;  %v2841_v29 = vld [vmem:[#allocation2 + $0x18a] sm:$0xff] }
 0x57d   : > { %v3888_v14 = vpop.permute.xlu0 %3887  ;;  %3407 = vrot.lane.b32.xlu1 %v2804_v40, %s6044_s14  ;;  %v4042_v0 = vsel %vm1545_vm4, %v4010_v45, %v9130_v39 }
 0x57e   : > { %v4202_v47 = vsel %vm4191_vm3, %v4169_v56, %v3888_v14  ;;  %v4075_v32 = vsel %vm4060_vm0, %v4042_v0, %v9250_v48  ;;  %v10966_v56 = vld [vmem:[#allocation113_spill] sm:$0xff]  ;;  %v2839_v14 = vld [vmem:[#allocation2 + $0x172] sm:$0xff] }
 0x57f   : > { %3787 = vrot.lane.b32.xlu0 %v2804_v40, %s6046_s27  ;;  %5682 = vmatprep.mubr.msk.f32.mxu1 %vm1677_vm8, %v4202_v47  ;;  %v3510_v4 = vpop.permute.xlu1 %3509  ;;  %v4011_v63 = vsel %vm3995_vm15, %v3978_v26, %v10966_v56  ;;  %v2906_v26 = vld [vmem:[#allocation2 + $0x1a1] sm:$0xff] }
 0x580   : > { %v4107_v35 = vsel %vm4093_vm1, %v4074_v6, %v3510_v4  ;;  %v4043_v47 = vsel %vm1545_vm4, %v4011_v63, %v10967_v24  ;;  %v10968_v4 = vld [vmem:[#allocation159_spill] sm:$0xff]  ;;  %v2905_v24 = vld [vmem:[#allocation2 + $0x199] sm:$0xff] }
 0x581   : > { %v3890_v59 = vpop.permute.xlu0 %3889  ;;  %3915 = vrot.lane.b32.xlu1 %v2931_v7, %s6047_s12  ;;  %v4076_v44 = vsel %vm4060_vm0, %v4043_v47, %v10968_v4  ;;  %v10979_v47 = vld [vmem:[#allocation134_spill] sm:$0xff]  ;;  %v10980_v4 = vld [vmem:[#allocation29_spill] sm:$0xff] }
 0x582   : > { %v4203_v53 = vsel %vm4191_vm3, %v4170_v2, %v3890_v59 }
 0x583   : > { %3789 = vrot.lane.b32.xlu0 %v2900_v42, %s6046_s27  ;;  %5683 = vmatmul.mubr.msk.f32.gmra.mrb[10].mxu1 %vm1677_vm8, %v4203_v53  ;;  %v3638_v10 = vpop.permute.xlu1 %3637 }
 0x584   : > { %v4139_v8 = vsel %vm1611_vm6, %v4107_v35, %v3638_v10  ;;  %v10974_v35 = vld [vmem:[#allocation114_spill] sm:$0xff] }
 0x585   : > { %v3636_v21 = vpop.permute.xlu0 %3635  ;;  %3535 = vrot.lane.b32.xlu1 %v2931_v7, %s6045_s10 }
 0x586   : > { %v4138_v55 = vsel %vm1611_vm6, %v4106_v28, %v3636_v21  ;;  %v10971_v28 = vld [vmem:[#allocation60_spill] sm:$0xff] }
 0x587   : > { %3409 = vrot.lane.b32.xlu0 %v2900_v42, %s6044_s14  ;;  %v3766_v36 = vpop.permute.xlu1 %3765  ;;  %v2872_v42 = vld [vmem:[#allocation2 + $0x188] sm:$0xff] }
 0x588   : > { %v4172_v49 = vsel %vm4158_vm2, %v4139_v8, %v3766_v36  ;;  %v2808_v36 = vld [vmem:[#allocation2 + $0x181] sm:$0xff] }
 0x589   : > { %v3764_v5 = vpop.permute.xlu0 %3763  ;;  %3537 = vrot.lane.b32.xlu1 %v2837_v17, %s6045_s10 }
 0x58a   : > { %v4171_v52 = vsel %vm4158_vm2, %v4138_v55, %v3764_v5  ;;  %v10972_v55 = vld [vmem:[#allocation175_spill] sm:$0xff] }
 0x58b   : > { %3917 = vrot.lane.b32.xlu0 %v2837_v17, %s6047_s12  ;;  %v3512_v15 = vpop.permute.xlu1 %3511  ;;  %v6015_v17 = vld [vmem:[#allocation2 + $0xc0] sm:$0xff] }
 0x58c   : > { %v4108_v40 = vsel %vm4093_vm1, %v4075_v32, %v3512_v15  ;;  %v3979_v5 = vsel %vm2443_vm12, %v6015_v17, %v10969_v58 }
 0x58d   : > { %v3892_v9 = vpop.permute.xlu0 %3891  ;;  %3665 = vrot.lane.b32.xlu1 %v2870_v41, %s6034_s24  ;;  %v4012_v11 = vsel %vm3995_vm15, %v3979_v5, %v10970_v62  ;;  %v10984_v5 = vld [vmem:[#allocation30_spill] sm:$0xff] }
 0x58e   : > { %v4204_v43 = vsel %vm4191_vm3, %v4171_v52, %v3892_v9  ;;  %v4044_v15 = vsel %vm1545_vm4, %v4012_v11, %v10971_v28  ;;  %v6016_v52 = vld [vmem:[#allocation2 + $0xc8] sm:$0xff]  ;;  %v10973_v9 = vld [vmem:[#allocation109_spill] sm:$0xff] }
 0x58f   : > { %3663 = vrot.lane.b32.xlu0 %v2869_v1, %s6034_s24  ;;  %5685 = vmatprep.mubr.msk.f32.mxu1 %vm1677_vm8, %v4204_v43  ;;  %v3514_v12 = vpop.permute.xlu1 %3513  ;;  %v4077_v41 = vsel %vm4060_vm0, %v4044_v15, %v10972_v55  ;;  %v3980_v6 = vsel %vm2443_vm12, %v6016_v52, %v10973_v9  ;;  %v10985_v52 = vld [vmem:[#allocation87_spill] sm:$0xff] }
 0x590   : > { %v4109_v2 = vsel %vm4093_vm1, %v4076_v44, %v3514_v12  ;;  %v4013_v12 = vsel %vm3995_vm15, %v3980_v6, %v10974_v35  ;;  %v10987_v35 = vld [vmem:[#allocation94_spill] sm:$0xff] }
 0x591   : > { %v3894_v60 = vpop.permute.xlu0 %3893  ;;  %3411 = vrot.lane.b32.xlu1 %v2806_v25, %s6044_s14 }
 0x592   : > { %v4205_v51 = vsel %vm4191_vm3, %v4172_v49, %v3894_v60 }
 0x593   : > { %3791 = vrot.lane.b32.xlu0 %v2806_v25, %s6046_s27  ;;  %5686 = vmatmul.mubr.msk.f32.gmra.mrb[12].mxu1 %vm1677_vm8, %v4205_v51  ;;  %v3642_v19 = vpop.permute.xlu1 %3641  ;;  %v10975_v25 = vld [vmem:[#allocation50_spill] sm:$0xff] }
 0x594   : > { %v4141_v53 = vsel %vm1611_vm6, %v4109_v2, %v3642_v19  ;;  %v4045_v49 = vsel %vm1545_vm4, %v4013_v12, %v10975_v25  ;;  %v10976_v19 = vld [vmem:[#allocation160_spill] sm:$0xff]  ;;  %v6018_v2 = vld [vmem:[#allocation2 + $0xe0] sm:$0xff]  ;;  %v10988_v25 = vld [vmem:[#allocation55_spill] sm:$0xff] }
 0x595   : > { %v3640_v54 = vpop.permute.xlu0 %3639  ;;  %3919 = vrot.lane.b32.xlu1 %v2933_v3, %s6047_s12 }
 0x596   : > { %v4140_v39 = vsel %vm1611_vm6, %v4108_v40, %v3640_v54  ;;  %v6017_v40 = vld [vmem:[#allocation2 + $0xd8] sm:$0xff] }
 0x597   : > { %3793 = vrot.lane.b32.xlu0 %v2902_v37, %s6046_s27  ;;  %v3770_v31 = vpop.permute.xlu1 %3769 }
 0x598   : > { %v4174_v10 = vsel %vm4158_vm2, %v4141_v53, %v3770_v31 }
 0x599   : > { %v3768_v27 = vpop.permute.xlu0 %3767  ;;  %3539 = vrot.lane.b32.xlu1 %v2933_v3, %s6045_s10  ;;  %v4078_v3 = vsel %vm4060_vm0, %v4045_v49, %v10976_v19 }
 0x59a   : > { %v4173_v48 = vsel %vm4158_vm2, %v4140_v39, %v3768_v27  ;;  %v2874_v27 = vld [vmem:[#allocation2 + $0x1a0] sm:$0xff] }
 0x59b   : > { %3413 = vrot.lane.b32.xlu0 %v2902_v37, %s6044_s14  ;;  %v3516_v16 = vpop.permute.xlu1 %3515  ;;  %v10978_v39 = vld [vmem:[#allocation45_spill] sm:$0xff] }
 0x59c   : > { %v4110_v43 = vsel %vm4093_vm1, %v4077_v41, %v3516_v16  ;;  %v10977_v16 = vld [vmem:[#allocation38_spill] sm:$0xff] }
 0x59d   : > { %v3896_v23 = vpop.permute.xlu0 %3895  ;;  %3541 = vrot.lane.b32.xlu1 %v2839_v14, %s6045_s10  ;;  %v3981_v56 = vsel %vm2443_vm12, %v6017_v40, %v10977_v16 }
 0x59e   : > { %v4206_v7 = vsel %vm4191_vm3, %v4173_v48, %v3896_v23 }
 0x59f   : > { %3921 = vrot.lane.b32.xlu0 %v2839_v14, %s6047_s12  ;;  %5688 = vmatprep.mubr.msk.f32.mxu1 %vm1677_vm8, %v4206_v7  ;;  %v3518_v59 = vpop.permute.xlu1 %3517  ;;  %v4014_v14 = vsel %vm3995_vm15, %v3981_v56, %v10978_v39  ;;  %v2938_v7 = vld [vmem:[#allocation2 + $0x1a2] sm:$0xff] }
 0x5a0   : > { %v4111_v37 = vsel %vm4093_vm1, %v4078_v3, %v3518_v59  ;;  %v4046_v48 = vsel %vm1545_vm4, %v4014_v14, %v10979_v47  ;;  %v10981_v59 = vld [vmem:[#allocation176_spill] sm:$0xff] }
 0x5a1   : > { %v3898_v21 = vpop.permute.xlu0 %3897  ;;  %3669 = vrot.lane.b32.xlu1 %v2872_v42, %s6034_s24  ;;  %v4079_v44 = vsel %vm4060_vm0, %v4046_v48, %v10980_v4  ;;  %v3982_v53 = vsel %vm2443_vm12, %v6018_v2, %v10981_v59  ;;  %v6021_v48 = vld [vmem:[#allocation2 + $0x108] sm:$0xff] }
 0x5a2   : > { %v4207_v61 = vsel %vm4191_vm3, %v4174_v10, %v3898_v21  ;;  %v10982_v21 = vld [vmem:[#allocation180_spill] sm:$0xff]  ;;  %v10995_v59 = vld [vmem:[#allocation158_spill] sm:$0xff] }
 0x5a3   : > { %3667 = vrot.lane.b32.xlu0 %v2871_v30, %s6034_s24  ;;  %5689 = vmatmul.mubr.msk.f32.gmra.mrb[14].mxu1 %vm1677_vm8, %v4207_v61  ;;  %v3646_v57 = vpop.permute.xlu1 %3645  ;;  %v4015_v61 = vsel %vm3995_vm15, %v3982_v53, %v10982_v21 }
 0x5a4   : > { %v4143_v46 = vsel %vm1611_vm6, %v4111_v37, %v3646_v57  ;;  %v2937_v57 = vld [vmem:[#allocation2 + $0x19a] sm:$0xff] }
 0x5a5   : > { %v3644_v18 = vpop.permute.xlu0 %3643  ;;  %3415 = vrot.lane.b32.xlu1 %v2808_v36, %s6044_s14 }
 0x5a6   : > { %v4142_v8 = vsel %vm1611_vm6, %v4110_v43, %v3644_v18  ;;  %v10986_v43 = vld [vmem:[#allocation59_spill] sm:$0xff] }
 0x5a7   : > { %3795 = vrot.lane.b32.xlu0 %v2808_v36, %s6046_s27  ;;  %v3774_v50 = vpop.permute.xlu1 %3773  ;;  %v10983_v36 = vld [vmem:[#allocation133_spill] sm:$0xff] }
 0x5a8   : > { %v4176_v31 = vsel %vm4158_vm2, %v4143_v46, %v3774_v50  ;;  %v4047_v18 = vsel %vm1545_vm4, %v4015_v61, %v10983_v36  ;;  %v6020_v46 = vld [vmem:[#allocation2 + $0xf8] sm:$0xff] }
 0x5a9   : > { %v3772_v33 = vpop.permute.xlu0 %3771  ;;  %3923 = vrot.lane.b32.xlu1 %v2935_v34, %s6047_s12  ;;  %v4080_v50 = vsel %vm4060_vm0, %v4047_v18, %v10984_v5  ;;  %v10996_v5 = vld [vmem:[#allocation151_spill] sm:$0xff] }
 0x5aa   : > { %v4175_v60 = vsel %vm4158_vm2, %v4142_v8, %v3772_v33 }
 0x5ab   : > { %3797 = vrot.lane.b32.xlu0 %v2904_v22, %s6046_s27  ;;  %v3520_v1 = vpop.permute.xlu1 %3519 }
 0x5ac   : > { %v4112_v42 = vsel %vm4093_vm1, %v4079_v44, %v3520_v1 }
 0x5ad   : > { %v3900_v51 = vpop.permute.xlu0 %3899  ;;  %3543 = vrot.lane.b32.xlu1 %v2935_v34, %s6045_s10 }
 0x5ae   : > { %v4208_v54 = vsel %vm4191_vm3, %v4175_v60, %v3900_v51 }
 0x5af   : > { %3417 = vrot.lane.b32.xlu0 %v2904_v22, %s6044_s14  ;;  %5691 = vmatprep.mubr.msk.f32.mxu1 %vm1677_vm8, %v4208_v54  ;;  %v3522_v20 = vpop.permute.xlu1 %3521  ;;  %v6019_v22 = vld [vmem:[#allocation2 + $0xf0] sm:$0xff]  ;;  %s5485_s14 = sshll.u32 %s11112_s16, 8 }
 0x5b0   : > { %v4113_v11 = vsel %vm4093_vm1, %v4080_v50, %v3522_v20  ;;  %v3983_v9 = vsel %vm2443_vm12, %v6019_v22, %v10985_v52  ;;  %s9971_s18 = scalar_lea.vmem %s10131_s4, %s5485_s14 }
 0x5b1   : > { %v3902_v45 = vpop.permute.xlu0 %3901  ;;  %3545 = vrot.lane.b32.xlu1 %v2841_v29, %s6045_s10  ;;  %v4016_v1 = vsel %vm3995_vm15, %v3983_v9, %v10986_v43 }
 0x5b2   : > { %v4209_v0 = vsel %vm4191_vm3, %v4176_v31, %v3902_v45  ;;  %v4048_v12 = vsel %vm1545_vm4, %v4016_v1, %v10987_v35 }
 0x5b3   : > { %3925 = vrot.lane.b32.xlu0 %v2841_v29, %s6047_s12  ;;  %5692 = vmatmul.mubr.msk.f32.gmra.mrb[16].mxu1 %vm1677_vm8, %v4209_v0  ;;  %v3650_v32 = vpop.permute.xlu1 %3649  ;;  %v4081_v49 = vsel %vm4060_vm0, %v4048_v12, %v10988_v25  ;;  %v10989_v29 = vld [vmem:[#allocation127_spill] sm:$0xff]  ;;  %v10990_v0 = vld [vmem:[#allocation46_spill] sm:$0xff] }
 0x5b4   : > { %v4145_v28 = vsel %vm1611_vm6, %v4113_v11, %v3650_v32  ;;  %v3984_v31 = vsel %vm2443_vm12, %v6020_v46, %v10989_v29  ;;  %v10991_v32 = vld [vmem:[#allocation93_spill] sm:$0xff]  ;;  %v10997_v11 = vld [vmem:[#allocation131_spill] sm:$0xff]  ;;  %v10999_v12 = vld [vmem:[#allocation118_spill] sm:$0xff] }
 0x5b5   : > { %v3648_v13 = vpop.permute.xlu0 %3647  ;;  %3673 = vrot.lane.b32.xlu1 %v2874_v27, %s6034_s24  ;;  %v4017_v27 = vsel %vm3995_vm15, %v3984_v31, %v10990_v0  ;;  %v11001_v31 = vld [vmem:[#allocation117_spill] sm:$0xff] }
 0x5b6   : > { %v4144_v30 = vsel %vm1611_vm6, %v4112_v42, %v3648_v13 }
 0x5b7   : > { %3671 = vrot.lane.b32.xlu0 %v2873_v38, %s6034_s24  ;;  %v3778_v63 = vpop.permute.xlu1 %3777  ;;  %v4049_v38 = vsel %vm1545_vm4, %v4017_v27, %v10991_v32  ;;  %s6048_s24 = smov 76  }
 0x5b8   : > { %v4178_v15 = vsel %vm4158_vm2, %v4145_v28, %v3778_v63  ;;  %v10998_v28 = vld [vmem:[#allocation157_spill] sm:$0xff] }
 0x5b9   : > { %v3776_v23 = vpop.permute.xlu0 %3775  ;;  %3801 = vrot.lane.b32.xlu1 %v2906_v26, %s6046_s27  ;;  %v10992_v26 = vld [vmem:[#allocation37_spill] sm:$0xff] }
 0x5ba   : > { %v4177_v17 = vsel %vm4158_vm2, %v4144_v30, %v3776_v23  ;;  %v4082_v40 = vsel %vm4060_vm0, %v4049_v38, %v10992_v26  ;;  %v10993_v23 = vld [vmem:[#allocation111_spill] sm:$0xff] }
 0x5bb   : > { %3799 = vrot.lane.b32.xlu0 %v2905_v24, %s6046_s27  ;;  %v3524_v10 = vpop.permute.xlu1 %3523  ;;  %v3985_v4 = vsel %vm2443_vm12, %v6021_v48, %v10993_v23 }
 0x5bc   : > { %v4114_v60 = vsel %vm4093_vm1, %v4081_v49, %v3524_v10 }
 0x5bd   : > { %v3904_v58 = vpop.permute.xlu0 %3903  ;;  %3929 = vrot.lane.b32.xlu1 %v2938_v7, %s6047_s12  ;;  %v10994_v7 = vld [vmem:[#allocation132_spill] sm:$0xff] }
 0x5be   : > { %v4210_v62 = vsel %vm4191_vm3, %v4177_v17, %v3904_v58  ;;  %v4018_v2 = vsel %vm3995_vm15, %v3985_v4, %v10994_v7  ;;  %v6022_v58 = vld [vmem:[#allocation2 + $0x110] sm:$0xff] }
 0x5bf   : > { %3927 = vrot.lane.b32.xlu0 %v2937_v57, %s6047_s12  ;;  %5694 = vmatprep.mubr.msk.f32.mxu1 %vm1677_vm8, %v4210_v62  ;;  %v3526_v34 = vpop.permute.xlu1 %3525  ;;  %v4050_v53 = vsel %vm1545_vm4, %v4018_v2, %v10995_v59  ;;  %v3986_v50 = vsel %vm2443_vm12, %v6022_v58, %v10996_v5 }
 0x5c0   : > { %v4115_v16 = vsel %vm4093_vm1, %v4082_v40, %v3526_v34  ;;  %v4019_v34 = vsel %vm3995_vm15, %v3986_v50, %v10997_v11 }
 0x5c1   : > { %v3906_v33 = vpop.permute.xlu0 %3905 }
 0x5c2   : > { %v4211_v55 = vsel %vm4191_vm3, %v4178_v15, %v3906_v33  ;;  %v4051_v15 = vsel %vm1545_vm4, %v4019_v34, %v10998_v28 }
 0x5c3   : > { %5695 = vmatmul.mubr.msk.f32.gmra.mrb[18].mxu1 %vm1677_vm8, %v4211_v55  ;;  %v3654_v41 = vpop.permute.xlu1 %3653 }
 0x5c4   : > { %v4147_v63 = vsel %vm1611_vm6, %v4115_v16, %v3654_v41 }
 0x5c5   : > { %v3652_v6 = vpop.permute.xlu0 %3651 }
 0x5c6   : > { %v4146_v19 = vsel %vm1611_vm6, %v4114_v60, %v3652_v6 }
 0x5c7   : > { %v3400_v8 = vpop.permute.xlu1 %3399 }
 0x5c8   : > { %v4083_v10 = vsel %vm4060_vm0, %v4050_v53, %v3400_v8  ;;  %v11000_v8 = vld [vmem:[#allocation92_spill] sm:$0xff] }
 0x5c9   : > { %v3780_v51 = vpop.permute.xlu0 %3779  ;;  %v4052_v25 = vsel %vm1545_vm4, %v11000_v8, %v10999_v12 }
 0x5ca   : > { %v4179_v3 = vsel %vm4158_vm2, %v4146_v19, %v3780_v51 }
 0x5cb   : > { %v3908_v54 = vpop.permute.xlu1 %3907 }
 0x5cc   : > { %v4212_v37 = vsel %vm4191_vm3, %v4179_v3, %v3908_v54 }
 0x5cd   : > { %v3782_v20 = vpop.permute.xlu0 %3781  ;;  %5697 = vmatprep.mubr.msk.f32.mxu1 %vm1677_vm8, %v4212_v37 }
 0x5ce   : > { %v4180_v39 = vsel %vm4158_vm2, %v4147_v63, %v3782_v20 }
 0x5cf   : > { %v3528_v45 = vpop.permute.xlu1 %3527 }
 0x5d0   : > { %v4116_v21 = vsel %vm4093_vm1, %v4083_v10, %v3528_v45  ;;  %v11002_v45 = vld [vmem:[#allocation91_spill] sm:$0xff] }
 0x5d1   : > { %v3402_v13 = vpop.permute.xlu0 %3401  ;;  %v4053_v0 = vsel %vm1545_vm4, %v11002_v45, %v11001_v31 }
 0x5d2   : > { %v4084_v55 = vsel %vm4060_vm0, %v4051_v15, %v3402_v13 }
 0x5d3   : > { %v3530_v56 = vpop.permute.xlu1 %3529 }
 0x5d4   : > { %v4117_v41 = vsel %vm4093_vm1, %v4084_v55, %v3530_v56  ;;  %v11007_v55 = vld [vmem:[#allocation54_spill] sm:$0xff] }
 0x5d5   : > { %v3910_v14 = vpop.permute.xlu0 %3909 }
 0x5d6   : > { %v4213_v24 = vsel %vm4191_vm3, %v4180_v39, %v3910_v14  ;;  %v11003_v14 = vld [vmem:[#allocation4_spill] sm:$0xff] }
 0x5d7   : > { %5698 = vmatmul.mubr.msk.f32.gmra.mrb[20].mxu1 %vm1677_vm8, %v4213_v24  ;;  %v3658_v47 = vpop.permute.xlu1 %3657  ;;  %v11004_v24 = vld [vmem:[#allocation156_spill] sm:$0xff] }
 0x5d8   : > { %v4149_v52 = vsel %vm1611_vm6, %v4117_v41, %v3658_v47  ;;  %v4054_v47 = vsel %vm1545_vm4, %v11004_v24, %v11003_v14  ;;  %v11008_v41 = vld [vmem:[#allocation116_spill] sm:$0xff]  ;;  %v11014_v14 = vld [vmem:[#allocation181_spill] sm:$0xff] }
 0x5d9   : > { %v3656_v44 = vpop.permute.xlu0 %3655 }
 0x5da   : > { %v4148_v30 = vsel %vm1611_vm6, %v4116_v21, %v3656_v44 }
 0x5db   : > { %v3404_v42 = vpop.permute.xlu1 %3403 }
 0x5dc   : > { %v4085_v60 = vsel %vm4060_vm0, %v4052_v25, %v3404_v42 }
 0x5dd   : > { %v3784_v61 = vpop.permute.xlu0 %3783 }
 0x5de   : > { %v4181_v57 = vsel %vm4158_vm2, %v4148_v30, %v3784_v61  ;;  %v11005_v30 = vld [vmem:[#allocation3_spill] sm:$0xff] }
 0x5df   : > { %v3912_v36 = vpop.permute.xlu1 %3911 }
 0x5e0   : > { %v4214_v18 = vsel %vm4191_vm3, %v4181_v57, %v3912_v36  ;;  %v11006_v57 = vld [vmem:[#allocation155_spill] sm:$0xff] }
 0x5e1   : > { %v3786_v17 = vpop.permute.xlu0 %3785  ;;  %5700 = vmatprep.mubr.msk.f32.mxu1 %vm1677_vm8, %v4214_v18  ;;  %v4055_v36 = vsel %vm1545_vm4, %v11006_v57, %v11005_v30 }
 0x5e2   : > { %v4182_v9 = vsel %vm4158_vm2, %v4149_v52, %v3786_v17 }
 0x5e3   : > { %v3532_v62 = vpop.permute.xlu1 %3531 }
 0x5e4   : > { %v4118_v51 = vsel %vm4093_vm1, %v4085_v60, %v3532_v62 }
 0x5e5   : > { %v3406_v33 = vpop.permute.xlu0 %3405 }
 0x5e6   : > { %v4086_v32 = vsel %vm4060_vm0, %v4053_v0, %v3406_v33 }
 0x5e7   : > { %v3534_v22 = vpop.permute.xlu1 %3533 }
 0x5e8   : > { %v4119_v38 = vsel %vm4093_vm1, %v4086_v32, %v3534_v22  ;;  %v4056_v22 = vsel %vm1545_vm4, %v11008_v41, %v11007_v55 }
 0x5e9   : > { %v3914_v6 = vpop.permute.xlu0 %3913 }
 0x5ea   : > { %v4215_v43 = vsel %vm4191_vm3, %v4182_v9, %v3914_v6 }
 0x5eb   : > { %5701 = vmatmul.mubr.msk.f32.gmra.mrb[22].mxu1 %vm1677_vm8, %v4215_v43  ;;  %v3662_v1 = vpop.permute.xlu1 %3661 }
 0x5ec   : > { %v4151_v26 = vsel %vm1611_vm6, %v4119_v38, %v3662_v1 }
 0x5ed   : > { %v3660_v35 = vpop.permute.xlu0 %3659 }
 0x5ee   : > { %v4150_v3 = vsel %vm1611_vm6, %v4118_v51, %v3660_v35  ;;  %v11009_v51 = vld [vmem:[#allocation53_spill] sm:$0xff] }
 0x5ef   : > { %v3408_v49 = vpop.permute.xlu1 %3407 }
 0x5f0   : > { %v4087_v23 = vsel %vm4060_vm0, %v4054_v47, %v3408_v49 }
 0x5f1   : > { %v3788_v19 = vpop.permute.xlu0 %3787 }
 0x5f2   : > { %v4183_v54 = vsel %vm4158_vm2, %v4150_v3, %v3788_v19  ;;  %v11010_v19 = vld [vmem:[#allocation115_spill] sm:$0xff] }
 0x5f3   : > { %v3916_v37 = vpop.permute.xlu1 %3915  ;;  %v4057_v3 = vsel %vm1545_vm4, %v11010_v19, %v11009_v51  ;;  %v11018_v51 = vld [vmem:[#allocation15_spill] sm:$0xff]  ;;  %v11019_v19 = vld [vmem:[#allocation16_spill] sm:$0xff] }
 0x5f4   : > { %v4216_v20 = vsel %vm4191_vm3, %v4183_v54, %v3916_v37 }
 0x5f5   : > { %v3790_v46 = vpop.permute.xlu0 %3789  ;;  %5703 = vmatprep.mubr.msk.f32.mxu1 %vm1677_vm8, %v4216_v20 }
 0x5f6   : > { %v4184_v40 = vsel %vm4158_vm2, %v4151_v26, %v3790_v46 }
 0x5f7   : > { %v3536_v29 = vpop.permute.xlu1 %3535 }
 0x5f8   : > { %v4120_v4 = vsel %vm4093_vm1, %v4087_v23, %v3536_v29 }
 0x5f9   : > { %v3410_v27 = vpop.permute.xlu0 %3409 }
 0x5fa   : > { %v4088_v17 = vsel %vm4060_vm0, %v4055_v36, %v3410_v27 }
 0x5fb   : > { %v3538_v13 = vpop.permute.xlu1 %3537 }
 0x5fc   : > { %v4121_v58 = vsel %vm4093_vm1, %v4088_v17, %v3538_v13 }
 0x5fd   : > { %v3918_v16 = vpop.permute.xlu0 %3917 }
 0x5fe   : > { %v4217_v56 = vsel %vm4191_vm3, %v4184_v40, %v3918_v16  ;;  %v11011_v40 = vld [vmem:[#allocation136_spill] sm:$0xff]  ;;  %v11012_v16 = vld [vmem:[#allocation182_spill] sm:$0xff] }
 0x5ff   : > { %5704 = vmatmul.mubr.msk.f32.gmra.mrb[24].mxu1 %vm1677_vm8, %v4217_v56  ;;  %v3666_v63 = vpop.permute.xlu1 %3665  ;;  %v4058_v56 = vsel %vm1545_vm4, %v11012_v16, %v11011_v40  ;;  %v11034_v40 = vld [vmem:[#allocation70_spill] sm:$0xff]  ;;  %v11035_v16 = vld [vmem:[#allocation36_spill] sm:$0xff] }
 0x600   : > { %v4153_v50 = vsel %vm1611_vm6, %v4121_v58, %v3666_v63 }
 0x601   : > { %v3664_v39 = vpop.permute.xlu0 %3663 }
 0x602   : > { %v4152_v7 = vsel %vm1611_vm6, %v4120_v4, %v3664_v39  ;;  %v11013_v39 = vld [vmem:[#allocation135_spill] sm:$0xff] }
 0x603   : > { %v3412_v48 = vpop.permute.xlu1 %3411  ;;  %v4059_v24 = vsel %vm1545_vm4, %v11014_v14, %v11013_v39  ;;  %v11038_v39 = vld [vmem:[#allocation39_spill] sm:$0xff] }
 0x604   : > { %v4089_v6 = vsel %vm4060_vm0, %v4056_v22, %v3412_v48 }
 0x605   : > { %v3792_v44 = vpop.permute.xlu0 %3791 }
 0x606   : > { %v5669_v2 = vpop.f32.mrb[0].mxu1  ;;  %v4185_v59 = vsel %vm4158_vm2, %v4152_v7, %v3792_v44 }
 0x607   : > { %4588 = vrot.lane.b32.xlu1 %v5669_v2, %s6043_s13  ;;  %v4395_v53 = vpop.f32.mrb[1].mxu1  ;;  %v3920_v42 = vpop.permute.xlu1 %3919 }
 0x608   : > { %v4218_v10 = vsel %vm4191_vm3, %v4185_v59, %v3920_v42  ;;  %4586 = vrot.lane.b32.xlu0 %v4395_v53, %s6043_s13 }
 0x609   : > { %v3794_v21 = vpop.permute.xlu0 %3793  ;;  %5706 = vmatprep.mubr.msk.f32.mxu1 %vm1677_vm8, %v4218_v10 }
 0x60a   : > { %v4186_v62 = vsel %vm4158_vm2, %v4153_v50, %v3794_v21 }
 0x60b   : > { %v3540_v61 = vpop.permute.xlu1 %3539 }
 0x60c   : > { %v4122_v43 = vsel %vm4093_vm1, %v4089_v6, %v3540_v61 }
 0x60d   : > { %v3414_v18 = vpop.permute.xlu0 %3413 }
 0x60e   : > { %v4090_v37 = vsel %vm4060_vm0, %v4057_v3, %v3414_v18  ;;  %v11020_v3 = vld [vmem:[#allocation19_spill] sm:$0xff] }
 0x60f   : > { %v3542_v5 = vpop.permute.xlu1 %3541 }
 0x610   : > { %v4123_v20 = vsel %vm4093_vm1, %v4090_v37, %v3542_v5  ;;  %v11022_v37 = vld [vmem:[#allocation23_spill] sm:$0xff] }
 0x611   : > { %v3922_v11 = vpop.permute.xlu0 %3921 }
 0x612   : > { %v4219_v34 = vsel %vm4191_vm3, %v4186_v62, %v3922_v11 }
 0x613   : > { %5707 = vmatmul.mubr.msk.f32.gmra.mrb[26].mxu1 %vm1677_vm8, %v4219_v34  ;;  %v3670_v28 = vpop.permute.xlu1 %3669 }
 0x614   : > { %v4155_v29 = vsel %vm1611_vm6, %v4123_v20, %v3670_v28  ;;  %v11023_v20 = vld [vmem:[#allocation24_spill] sm:$0xff] }
 0x615   : > { %v3668_v15 = vpop.permute.xlu0 %3667 }
 0x616   : > { %v5672_v33 = vpop.f32.mrb[2].mxu1  ;;  %v4154_v35 = vsel %vm1611_vm6, %v4122_v43, %v3668_v15 }
 0x617   : > { %4592 = vrot.lane.b32.xlu1 %v5672_v33, %s6043_s13  ;;  %v4405_v52 = vpop.f32.mrb[3].mxu1  ;;  %v3416_v9 = vpop.permute.xlu1 %3415 }
 0x618   : > { %4590 = vrot.lane.b32.xlu0 %v4405_v52, %s6043_s13  ;;  %v4091_v47 = vsel %vm4060_vm0, %v4058_v56, %v3416_v9  ;;  %v11036_v56 = vld [vmem:[#allocation71_spill] sm:$0xff] }
 0x619   : > { %v3796_v1 = vpop.permute.xlu0 %3795 }
 0x61a   : > { %v4187_v12 = vsel %vm4158_vm2, %v4154_v35, %v3796_v1 }
 0x61b   : > { %v3924_v8 = vpop.permute.xlu1 %3923 }
 0x61c   : > { %v4220_v25 = vsel %vm4191_vm3, %v4187_v12, %v3924_v8 }
 0x61d   : > { %v3798_v49 = vpop.permute.xlu0 %3797  ;;  %5709 = vmatprep.mubr.msk.f32.mxu1 %vm1677_vm8, %v4220_v25  ;;  %v11015_v25 = vld [vmem:[#allocation12_spill] sm:$0xff] }
 0x61e   : > { %v4188_v31 = vsel %vm4158_vm2, %v4155_v29, %v3798_v49  ;;  %v11016_v49 = vld [vmem:[#allocation13_spill] sm:$0xff]  ;;  %v11025_v29 = vld [vmem:[#allocation28_spill] sm:$0xff] }
 0x61f   : > { %v3544_v60 = vpop.permute.xlu1 %3543 }
 0x620   : > { %v4124_v48 = vsel %vm4093_vm1, %v4091_v47, %v3544_v60  ;;  %v11017_v60 = vld [vmem:[#allocation14_spill] sm:$0xff]  ;;  %v11039_v47 = vld [vmem:[#allocation95_spill] sm:$0xff] }
 0x621   : > { %v3418_v54 = vpop.permute.xlu0 %3417 }
 0x622   : > { %v4092_v23 = vsel %vm4060_vm0, %v4059_v24, %v3418_v54  ;;  %v11021_v54 = vld [vmem:[#allocation20_spill] sm:$0xff] }
 0x623   : > { %v3546_v46 = vpop.permute.xlu1 %3545 }
 0x624   : > { %v4125_v4 = vsel %vm4093_vm1, %v4092_v23, %v3546_v46  ;;  %v11024_v46 = vld [vmem:[#allocation27_spill] sm:$0xff] }
 0x625   : > { %v3926_v45 = vpop.permute.xlu0 %3925 }
 0x626   : > { %v4221_v0 = vsel %vm4191_vm3, %v4188_v31, %v3926_v45  ;;  %v5675_v27 = vpop.f32.mrb[4].mxu1  ;;  %v11026_v31 = vld [vmem:[#allocation63_spill] sm:$0xff]  ;;  %v11027_v45 = vld [vmem:[#allocation64_spill] sm:$0xff] }
 0x627   : > { %4596 = vrot.lane.b32.xlu1 %v5675_v27, %s6043_s13  ;;  %v4415_v32 = vpop.f32.mrb[5].mxu1  ;;  %5710 = vmatmul.mubr.msk.f32.gmra.mrb[28].mxu1 %vm1677_vm8, %v4221_v0  ;;  %v3674_v38 = vpop.permute.xlu1 %3673  ;;  %v11028_v0 = vld [vmem:[#allocation31_spill] sm:$0xff]  ;;  %v11029_v27 = vld [vmem:[#allocation32_spill] sm:$0xff] }
 0x628   : > { %4594 = vrot.lane.b32.xlu0 %v4415_v32, %s6043_s13  ;;  %v4157_v2 = vsel %vm1611_vm6, %v4125_v4, %v3674_v38  ;;  %v11030_v32 = vld [vmem:[#allocation67_spill] sm:$0xff]  ;;  %v11031_v38 = vld [vmem:[#allocation68_spill] sm:$0xff] }
 0x629   : > { %v3672_v13 = vpop.permute.xlu0 %3671  ;;  %v11041_v4 = vld [vmem:[#allocation96_spill] sm:$0xff] }
 0x62a   : > { %v4156_v44 = vsel %vm1611_vm6, %v4124_v48, %v3672_v13  ;;  %v11032_v13 = vld [vmem:[#allocation35_spill] sm:$0xff]  ;;  %v11040_v48 = vld [vmem:[#allocation58_spill] sm:$0xff] }
 0x62b   : > { %v3802_v26 = vpop.permute.xlu1 %3801 }
 0x62c   : > { %v4190_v42 = vsel %vm4158_vm2, %v4157_v2, %v3802_v26  ;;  %v11033_v26 = vld [vmem:[#allocation69_spill] sm:$0xff] }
 0x62d   : > { %v3800_v63 = vpop.permute.xlu0 %3799 }
 0x62e   : > { %v4189_v59 = vsel %vm4158_vm2, %v4156_v44, %v3800_v63  ;;  %v11037_v63 = vld [vmem:[#allocation72_spill] sm:$0xff]  ;;  %v11042_v44 = vld [vmem:[#allocation73_spill] sm:$0xff] }
 0x62f   : > { %v3930_v7 = vpop.permute.xlu1 %3929 }
 0x630   : > { %v4223_v21 = vsel %vm4191_vm3, %v4190_v42, %v3930_v7  ;;  %v11044_v42 = vld [vmem:[#allocation74_spill] sm:$0xff] }
 0x631   : > { %v3928_v53 = vpop.permute.xlu0 %3927 }
 0x632   : > { %v4222_v10 = vsel %vm4191_vm3, %v4189_v59, %v3928_v53  ;;  %v11043_v53 = vld [vmem:[#allocation161_spill] sm:$0xff] }
 0x633   : > { %5712 = vmatprep.mubr.msk.f32.mxu1 %vm1677_vm8, %v4222_v10 }
 0x634   : > { %5713 = vmatmul.mubr.msk.f32.gmra.mrb[30].mxu1 %vm1677_vm8, %v4223_v21  ;;  %v11045_v21 = vld [vmem:[#allocation162_spill] sm:$0xff] }
 0x636   : > { %v5678_v61 = vpop.f32.mrb[6].mxu1 }
 0x637   : > { %4600 = vrot.lane.b32.xlu1 %v5678_v61, %s6043_s13  ;;  %v4425_v30 = vpop.f32.mrb[7].mxu1  ;;  %v11046_v61 = vld [vmem:[#allocation7_spill] sm:$0xff] }
 0x638   : > { %4598 = vrot.lane.b32.xlu0 %v4425_v30, %s6043_s13 }
 0x646   : > { %v5681_v57 = vpop.f32.mrb[8].mxu1 }
 0x647   : > { %4604 = vrot.lane.b32.xlu1 %v5681_v57, %s6043_s13  ;;  %v4435_v36 = vpop.f32.mrb[9].mxu1 }
 0x648   : > { %4602 = vrot.lane.b32.xlu0 %v4435_v36, %s6043_s13 }
 0x656   : > { %v5684_v18 = vpop.f32.mrb[10].mxu1 }
 0x657   : > { %4608 = vrot.lane.b32.xlu1 %v5684_v18, %s6043_s13  ;;  %v4445_v17 = vpop.f32.mrb[11].mxu1  ;;  %v11047_v18 = vld [vmem:[#allocation5_spill] sm:$0xff] }
 0x658   : > { %4606 = vrot.lane.b32.xlu0 %v4445_v17, %s6043_s13  ;;  %v11048_v17 = vld [vmem:[#allocation137_spill] sm:$0xff] }
 0x666   : > { %v5687_v58 = vpop.f32.mrb[12].mxu1 }
 0x667   : > { %4612 = vrot.lane.b32.xlu1 %v5687_v58, %s6043_s13  ;;  %v4455_v5 = vpop.f32.mrb[13].mxu1 }
 0x668   : > { %4610 = vrot.lane.b32.xlu0 %v4455_v5, %s6043_s13  ;;  %v11049_v5 = vld [vmem:[#allocation6_spill] sm:$0xff] }
 0x676   : > { %v5690_v50 = vpop.f32.mrb[14].mxu1 }
 0x677   : > { %4616 = vrot.lane.b32.xlu1 %v5690_v50, %s6043_s13  ;;  %v4465_v62 = vpop.f32.mrb[15].mxu1  ;;  %v11050_v50 = vld [vmem:[#allocation138_spill] sm:$0xff] }
 0x678   : > { %4614 = vrot.lane.b32.xlu0 %v4465_v62, %s6043_s13 }
 0x679   : > { %v4589_v14 = vpop.permute.xlu1 %4588 }
 0x67a   : > { %v4587_v24 = vpop.permute.xlu0 %4586  ;;  %v4683_v23 = vadd.f32 %v4589_v14, %v11040_v48 }
 0x67b   : > { %v4682_v7 = vadd.f32 %v4587_v24, %v11042_v44  ;;  %v11064_v44 = vld [vmem:[#allocation99_spill] sm:$0xff] }
 0x67c   : > { %5917 = vtanh.f32 %v4683_v23  ;;  %v11063_v23 = vld [vmem:[#allocation140_spill] sm:$0xff] }
 0x67d   : > { %5919 = vtanh.f32 %v4682_v7 }
 0x686   : > { %v5693_v11 = vpop.f32.mrb[16].mxu1 }
 0x687   : > { %4620 = vrot.lane.b32.xlu1 %v5693_v11, %s6043_s13  ;;  %v4475_v34 = vpop.f32.mrb[17].mxu1 }
 0x688   : > { %4618 = vrot.lane.b32.xlu0 %v4475_v34, %s6043_s13 }
 0x689   : > { %v4593_v2 = vpop.permute.xlu1 %4592 }
 0x68a   : > { %v4591_v59 = vpop.permute.xlu0 %4590  ;;  %v4685_v10 = vadd.f32 %v4593_v2, %v11044_v42 }
 0x68b   : > { %v4684_v30 = vadd.f32 %v4591_v59, %v11046_v61  ;;  %v11066_v61 = vld [vmem:[#allocation17_spill] sm:$0xff] }
 0x68c   : > { %5921 = vtanh.f32 %v4685_v10  ;;  %v11065_v10 = vld [vmem:[#allocation166_spill] sm:$0xff] }
 0x68d   : > { %5923 = vtanh.f32 %v4684_v30 }
 0x696   : > { %v5696_v28 = vpop.f32.mrb[18].mxu1 }
 0x697   : > { %4624 = vrot.lane.b32.xlu1 %v5696_v28, %s6043_s13  ;;  %v4485_v15 = vpop.f32.mrb[19].mxu1  ;;  %v11051_v28 = vld [vmem:[#allocation40_spill] sm:$0xff] }
 0x698   : > { %4622 = vrot.lane.b32.xlu0 %v4485_v15, %s6043_s13  ;;  %v11052_v15 = vld [vmem:[#allocation97_spill] sm:$0xff] }
 0x699   : > { %v4597_v57 = vpop.permute.xlu1 %4596 }
 0x69a   : > { %v4595_v36 = vpop.permute.xlu0 %4594  ;;  %v4687_v58 = vadd.f32 %v4597_v57, %v11048_v17 }
 0x69b   : > { %v4686_v62 = vadd.f32 %v4595_v36, %v11050_v50  ;;  %v11068_v50 = vld [vmem:[#allocation65_spill] sm:$0xff] }
 0x69c   : > { %5925 = vtanh.f32 %v4687_v58  ;;  %v11067_v58 = vld [vmem:[#allocation44_spill] sm:$0xff] }
 0x69d   : > { %5927 = vtanh.f32 %v4686_v62 }
 0x6a9   : > { %v4601_v11 = vpop.permute.xlu1 %4600 }
 0x6aa   : > { %v5699_v33 = vpop.f32.mrb[20].mxu1  ;;  %v4599_v34 = vpop.permute.xlu0 %4598 }
 0x6ab   : > { %4628 = vrot.lane.b32.xlu1 %v5699_v33, %s6043_s13  ;;  %v4495_v55 = vpop.f32.mrb[21].mxu1  ;;  %v4689_v33 = vadd.f32 %v4601_v11, %v11052_v15 }
 0x6ac   : > { %4626 = vrot.lane.b32.xlu0 %v4495_v55, %s6043_s13  ;;  %v11053_v55 = vld [vmem:[#allocation57_spill] sm:$0xff] }
 0x6ad   : > { %5929 = vtanh.f32 %v4689_v33  ;;  %v11069_v33 = vld [vmem:[#allocation78_spill] sm:$0xff] }
 0x6be   : > { %v5702_v41 = vpop.f32.mrb[22].mxu1 }
 0x6bf   : > { %4632 = vrot.lane.b32.xlu1 %v5702_v41, %s6043_s13  ;;  %v4505_v22 = vpop.f32.mrb[23].mxu1  ;;  %v11054_v41 = vld [vmem:[#allocation98_spill] sm:$0xff] }
 0x6c0   : > { %4630 = vrot.lane.b32.xlu0 %v4505_v22, %s6043_s13  ;;  %v4688_v22 = vadd.f32 %v4599_v34, %v11054_v41  ;;  %v11070_v41 = vld [vmem:[#allocation141_spill] sm:$0xff] }
 0x6c2   : > { %5931 = vtanh.f32 %v4688_v22 }
 0x6d2   : > { %v5705_v52 = vpop.f32.mrb[24].mxu1 }
 0x6d3   : > { %4636 = vrot.lane.b32.xlu1 %v5705_v52, %s6043_s13  ;;  %v4515_v9 = vpop.f32.mrb[25].mxu1  ;;  %v4605_v52 = vpop.permute.xlu1 %4604 }
 0x6d4   : > { %4634 = vrot.lane.b32.xlu0 %v4515_v9, %s6043_s13  ;;  %v5918_v9 = vpop.eup %5917 }
 0x6e6   : > { %v5708_v6 = vpop.f32.mrb[26].mxu1 }
 0x6e7   : > { %4640 = vrot.lane.b32.xlu1 %v5708_v6, %s6043_s13  ;;  %v4525_v43 = vpop.f32.mrb[27].mxu1  ;;  %v4603_v6 = vpop.permute.xlu0 %4602 }
 0x6e8   : > { %4638 = vrot.lane.b32.xlu0 %v4525_v43, %s6043_s13  ;;  %v5920_v43 = vpop.eup %5919 }
 0x6fa   : > { %v5711_v1 = vpop.f32.mrb[28].mxu1 }
 0x6fb   : > { %4644 = vrot.lane.b32.xlu1 %v5711_v1, %s6043_s13  ;;  %v4535_v35 = vpop.f32.mrb[29].mxu1  ;;  %v11055_v1 = vld [vmem:[#allocation163_spill] sm:$0xff] }
 0x6fc   : > { %4642 = vrot.lane.b32.xlu0 %v4535_v35, %s6043_s13  ;;  %v4691_v35 = vadd.f32 %v4605_v52, %v11055_v1  ;;  %v11071_v1 = vld [vmem:[#allocation102_spill] sm:$0xff] }
 0x6fe   : > { %5933 = vtanh.f32 %v4691_v35 }
 0x707   : > { %v5714_v12 = vpop.f32.mrb[30].mxu1 }
 0x708   : > { %4648 = vrot.lane.b32.xlu1 %v5714_v12, %s6043_s13  ;;  %v4545_v8 = vpop.f32.mrb[31].mxu1  ;;  %v11056_v12 = vld [vmem:[#allocation164_spill] sm:$0xff] }
 0x709   : > { %4646 = vrot.lane.b32.xlu0 %v4545_v8, %s6043_s13  ;;  %s6049_s13 = smov 112   ;;  %v4690_v8 = vadd.f32 %v4603_v6, %v11056_v12  ;;  %v11072_v12 = vld [vmem:[#allocation167_spill] sm:$0xff] }
 0x70b   : > { %5935 = vtanh.f32 %v4690_v8 }
 0x70c   : > { %4780 = vrot.lane.b32.xlu1 %v11015_v25, %s6048_s24  ;;  %v4609_v25 = vpop.permute.xlu1 %4608 }
 0x70d   : > { %4778 = vrot.lane.b32.xlu0 %v11016_v49, %s6048_s24  ;;  %v5922_v49 = vpop.eup %5921 }
 0x710   : > { %4784 = vrot.lane.b32.xlu1 %v11017_v60, %s6048_s24  ;;  %v4607_v60 = vpop.permute.xlu0 %4606 }
 0x711   : > { %4782 = vrot.lane.b32.xlu0 %v11018_v51, %s6048_s24  ;;  %v5924_v51 = vpop.eup %5923 }
 0x714   : > { %4788 = vrot.lane.b32.xlu1 %v11019_v19, %s6048_s24  ;;  %v11057_v19 = vld [vmem:[#allocation9_spill] sm:$0xff] }
 0x715   : > { %4786 = vrot.lane.b32.xlu0 %v11020_v3, %s6048_s24  ;;  %v4693_v3 = vadd.f32 %v4609_v25, %v11057_v19  ;;  %v11073_v19 = vld [vmem:[#allocation22_spill] sm:$0xff] }
 0x717   : > { %5937 = vtanh.f32 %v4693_v3 }
 0x718   : > { %4792 = vrot.lane.b32.xlu1 %v11021_v54, %s6048_s24  ;;  %v11058_v54 = vld [vmem:[#allocation10_spill] sm:$0xff] }
 0x719   : > { %4790 = vrot.lane.b32.xlu0 %v11022_v37, %s6048_s24  ;;  %v4692_v37 = vadd.f32 %v4607_v60, %v11058_v54  ;;  %v11074_v54 = vld [vmem:[#allocation119_spill] sm:$0xff] }
 0x71b   : > { %5939 = vtanh.f32 %v4692_v37 }
 0x71c   : > { %4796 = vrot.lane.b32.xlu1 %v11023_v20, %s6048_s24  ;;  %v4613_v20 = vpop.permute.xlu1 %4612 }
 0x71d   : > { %4794 = vrot.lane.b32.xlu0 %v11024_v46, %s6048_s24  ;;  %v5926_v46 = vpop.eup %5925 }
 0x720   : > { %4800 = vrot.lane.b32.xlu1 %v11025_v29, %s6048_s24  ;;  %v4611_v29 = vpop.permute.xlu0 %4610 }
 0x721   : > { %4798 = vrot.lane.b32.xlu0 %v11026_v31, %s6048_s24  ;;  %v5928_v31 = vpop.eup %5927 }
 0x724   : > { %4804 = vrot.lane.b32.xlu1 %v11027_v45, %s6048_s24  ;;  %v11059_v45 = vld [vmem:[#allocation43_spill] sm:$0xff] }
 0x725   : > { %4802 = vrot.lane.b32.xlu0 %v11028_v0, %s6048_s24  ;;  %v4695_v0 = vadd.f32 %v4613_v20, %v11059_v45  ;;  %v11075_v45 = vld [vmem:[#allocation120_spill] sm:$0xff] }
 0x727   : > { %5941 = vtanh.f32 %v4695_v0 }
 0x728   : > { %4808 = vrot.lane.b32.xlu1 %v11029_v27, %s6048_s24  ;;  %v11060_v27 = vld [vmem:[#allocation61_spill] sm:$0xff] }
 0x729   : > { %4806 = vrot.lane.b32.xlu0 %v11030_v32, %s6048_s24  ;;  %v4694_v32 = vadd.f32 %v4611_v29, %v11060_v27  ;;  %v11076_v27 = vld [vmem:[#allocation80_spill] sm:$0xff] }
 0x72b   : > { %5943 = vtanh.f32 %v4694_v32 }
 0x72c   : > { %4812 = vrot.lane.b32.xlu1 %v11031_v38, %s6048_s24  ;;  %v4617_v38 = vpop.permute.xlu1 %4616 }
 0x72d   : > { %4810 = vrot.lane.b32.xlu0 %v11032_v13, %s6048_s24  ;;  %v5930_v13 = vpop.eup %5929 }
 0x730   : > { %4816 = vrot.lane.b32.xlu1 %v11033_v26, %s6048_s24  ;;  %v4615_v26 = vpop.permute.xlu0 %4614  ;;  %v4621_v14 = vpop.permute.xlu1 %4620 }
 0x731   : > { %4814 = vrot.lane.b32.xlu0 %v11034_v40, %s6048_s24  ;;  %v5932_v40 = vpop.eup %5931 }
 0x732   : > { %v5934_v24 = vpop.eup %5933 }
 0x733   : > { %v5936_v48 = vpop.eup %5935 }
 0x734   : > { %4820 = vrot.lane.b32.xlu1 %v11035_v16, %s6048_s24  ;;  %v11061_v16 = vld [vmem:[#allocation8_spill] sm:$0xff]  ;;  %v4625_v2 = vpop.permute.xlu1 %4624  ;;  %v5938_v59 = vpop.eup %5937 }
 0x735   : > { %4818 = vrot.lane.b32.xlu0 %v11036_v56, %s6048_s24  ;;  %v4697_v56 = vadd.f32 %v4617_v38, %v11061_v16  ;;  %v5940_v42 = vpop.eup %5939  ;;  %v11077_v16 = vld [vmem:[#allocation144_spill] sm:$0xff] }
 0x736   : > { %v5942_v36 = vpop.eup %5941 }
 0x737   : > { %5945 = vtanh.f32 %v4697_v56  ;;  %v5944_v17 = vpop.eup %5943 }
 0x738   : > { %4824 = vrot.lane.b32.xlu1 %v11037_v63, %s6048_s24  ;;  %v11062_v63 = vld [vmem:[#allocation76_spill] sm:$0xff]  ;;  %v4629_v57 = vpop.permute.xlu1 %4628 }
 0x739   : > { %4822 = vrot.lane.b32.xlu0 %v11038_v39, %s6048_s24  ;;  %v4696_v39 = vadd.f32 %v4615_v26, %v11062_v63 }
 0x73b   : > { %5947 = vtanh.f32 %v4696_v39 }
 0x73c   : > { %4828 = vrot.lane.b32.xlu1 %v11039_v47, %s6048_s24  ;;  %v4619_v47 = vpop.permute.xlu0 %4618  ;;  %v4633_v11 = vpop.permute.xlu1 %4632 }
 0x73d   : > { %4826 = vrot.lane.b32.xlu0 %v11041_v4, %s6048_s24  ;;  %v4699_v4 = vadd.f32 %v4621_v14, %v11063_v23  ;;  %v4698_v7 = vadd.f32 %v4619_v47, %v11064_v44  ;;  %v11078_v14 = vld [vmem:[#allocation104_spill] sm:$0xff] }
 0x73f   : > { %5949 = vtanh.f32 %v4699_v4 }
 0x740   : > { %4832 = vrot.lane.b32.xlu1 %v11043_v53, %s6048_s24  ;;  %v4623_v53 = vpop.permute.xlu0 %4622  ;;  %5951 = vtanh.f32 %v4698_v7 }
 0x741   : > { %4830 = vrot.lane.b32.xlu0 %v11045_v21, %s6048_s24  ;;  %v4701_v21 = vadd.f32 %v4625_v2, %v11065_v10  ;;  %v4700_v30 = vadd.f32 %v4623_v53, %v11066_v61  ;;  %v5946_v34 = vpop.eup %5945 }
 0x743   : > { %5953 = vtanh.f32 %v4701_v21 }
 0x744   : > { %4836 = vrot.lane.b32.xlu1 %v11047_v18, %s6048_s24  ;;  %v4627_v18 = vpop.permute.xlu0 %4626  ;;  %5955 = vtanh.f32 %v4700_v30 }
 0x745   : > { %4834 = vrot.lane.b32.xlu0 %v11049_v5, %s6048_s24  ;;  %v4703_v5 = vadd.f32 %v4629_v57, %v11067_v58  ;;  %v4702_v62 = vadd.f32 %v4627_v18, %v11068_v50  ;;  %v5948_v15 = vpop.eup %5947  ;;  %v4637_v52 = vpop.permute.xlu1 %4636 }
 0x746   : > { %v4707_v35 = vadd.f32 %v4637_v52, %v11071_v1 }
 0x747   : > { %5957 = vtanh.f32 %v4703_v5 }
 0x748   : > { %4840 = vrot.lane.b32.xlu1 %v11051_v28, %s6048_s24  ;;  %v4631_v28 = vpop.permute.xlu0 %4630  ;;  %5959 = vtanh.f32 %v4702_v62 }
 0x749   : > { %4838 = vrot.lane.b32.xlu0 %v11053_v55, %s6048_s24  ;;  %v4705_v55 = vadd.f32 %v4633_v11, %v11069_v33  ;;  %v4704_v22 = vadd.f32 %v4631_v28, %v11070_v41 }
 0x74b   : > { %5961 = vtanh.f32 %v4705_v55 }
 0x74c   : > { %4940 = vrot.lane.b32.xlu1 %v5918_v9, %s6049_s13  ;;  %v5950_v9 = vpop.eup %5949  ;;  %v4635_v6 = vpop.permute.xlu0 %4634  ;;  %5963 = vtanh.f32 %v4704_v22 }
 0x74d   : > { %4938 = vrot.lane.b32.xlu0 %v5920_v43, %s6049_s13  ;;  %v5952_v43 = vpop.eup %5951  ;;  %v4706_v8 = vadd.f32 %v4635_v6, %v11072_v12  ;;  %5965 = vtanh.f32 %v4707_v35 }
 0x74f   : > { %5967 = vtanh.f32 %v4706_v8 }
 0x750   : > { %4944 = vrot.lane.b32.xlu1 %v5922_v49, %s6049_s13  ;;  %v5954_v49 = vpop.eup %5953 }
 0x751   : > { %4942 = vrot.lane.b32.xlu0 %v5924_v51, %s6049_s13  ;;  %v5956_v51 = vpop.eup %5955 }
 0x754   : > { %4948 = vrot.lane.b32.xlu1 %v5926_v46, %s6049_s13  ;;  %v5958_v46 = vpop.eup %5957 }
 0x755   : > { %4946 = vrot.lane.b32.xlu0 %v5928_v31, %s6049_s13  ;;  %v5960_v31 = vpop.eup %5959 }
 0x756   : > { %v5962_v38 = vpop.eup %5961 }
 0x758   : > { %4952 = vrot.lane.b32.xlu1 %v5930_v13, %s6049_s13  ;;  %v5964_v13 = vpop.eup %5963 }
 0x759   : > { %4950 = vrot.lane.b32.xlu0 %v5932_v40, %s6049_s13  ;;  %v4641_v25 = vpop.permute.xlu1 %4640  ;;  %v5966_v40 = vpop.eup %5965 }
 0x75a   : > { %v4639_v60 = vpop.permute.xlu0 %4638  ;;  %v4709_v3 = vadd.f32 %v4641_v25, %v11073_v19  ;;  %v5968_v39 = vpop.eup %5967  ;;  %v11079_v25 = vld [vmem:[#allocation62_spill] sm:$0xff] }
 0x75b   : > { %v4708_v37 = vadd.f32 %v4639_v60, %v11074_v54  ;;  %v11080_v60 = vld [vmem:[#allocation75_spill] sm:$0xff] }
 0x75c   : > { %4956 = vrot.lane.b32.xlu1 %v5934_v24, %s6049_s13  ;;  %5969 = vtanh.f32 %v4709_v3 }
 0x75d   : > { %4954 = vrot.lane.b32.xlu0 %v5936_v48, %s6049_s13  ;;  %5971 = vtanh.f32 %v4708_v37 }
 0x760   : > { %4960 = vrot.lane.b32.xlu1 %v5938_v59, %s6049_s13 }
 0x761   : > { %4958 = vrot.lane.b32.xlu0 %v5940_v42, %s6049_s13 }
 0x764   : > { %4964 = vrot.lane.b32.xlu1 %v5942_v36, %s6049_s13 }
 0x765   : > { %4962 = vrot.lane.b32.xlu0 %v5944_v17, %s6049_s13 }
 0x766   : > { %v5970_v48 = vpop.eup %5969 }
 0x767   : > { %v5972_v4 = vpop.eup %5971 }
 0x768   : > { %4968 = vrot.lane.b32.xlu1 %v5946_v34, %s6049_s13 }
 0x769   : > { %4966 = vrot.lane.b32.xlu0 %v5948_v15, %s6049_s13 }
 0x76c   : > { %4972 = vrot.lane.b32.xlu1 %v5950_v9, %s6049_s13 }
 0x76d   : > { %4970 = vrot.lane.b32.xlu0 %v5952_v43, %s6049_s13  ;;  %v4645_v20 = vpop.permute.xlu1 %4644 }
 0x76e   : > { %v4643_v29 = vpop.permute.xlu0 %4642  ;;  %v4711_v0 = vadd.f32 %v4645_v20, %v11075_v45 }
 0x76f   : > { %v4710_v32 = vadd.f32 %v4643_v29, %v11076_v27  ;;  %v11081_v29 = vld [vmem:[#allocation11_spill] sm:$0xff] }
 0x770   : > { %4976 = vrot.lane.b32.xlu1 %v5954_v49, %s6049_s13  ;;  %5973 = vtanh.f32 %v4711_v0  ;;  %v4747_v49 = vsub.f32 1.0, %v11079_v25  ;;  %v11082_v0 = vld [vmem:[#allocation139_spill] sm:$0xff] }
 0x771   : > { %4974 = vrot.lane.b32.xlu0 %v5956_v51, %s6049_s13  ;;  %5975 = vtanh.f32 %v4710_v32  ;;  %v4746_v51 = vsub.f32 1.0, %v11080_v60  ;;  %v4748_v27 = vsub.f32 1.0, %v11082_v0 }
 0x774   : > { %4980 = vrot.lane.b32.xlu1 %v5958_v46, %s6049_s13 }
 0x775   : > { %4978 = vrot.lane.b32.xlu0 %v5960_v31, %s6049_s13  ;;  %v4749_v31 = vsub.f32 1.0, %v11081_v29 }
 0x778   : > { %4984 = vrot.lane.b32.xlu1 %v5962_v38, %s6049_s13 }
 0x779   : > { %4982 = vrot.lane.b32.xlu0 %v5964_v13, %s6049_s13 }
 0x77a   : > { %v4649_v26 = vpop.permute.xlu1 %4648  ;;  %v5974_v7 = vpop.eup %5973 }
 0x77b   : > { %v4713_v56 = vadd.f32 %v4649_v26, %v11077_v16  ;;  %v4647_v63 = vpop.permute.xlu0 %4646  ;;  %v5976_v59 = vpop.eup %5975 }
 0x77c   : > { %v4712_v24 = vadd.f32 %v4647_v63, %v11078_v14  ;;  %4988 = vrot.lane.b32.xlu1 %v5966_v40, %s6049_s13  ;;  %v11083_v63 = vld [vmem:[#allocation100_spill] sm:$0xff] }
 0x77d   : > { %5977 = vtanh.f32 %v4713_v56  ;;  %4986 = vrot.lane.b32.xlu0 %v5968_v39, %s6049_s13  ;;  %v4751_v39 = vsub.f32 1.0, %v11083_v63 }
 0x77e   : > { %5979 = vtanh.f32 %v4712_v24  ;;  %v4781_v47 = vpop.permute.xlu1 %4780  ;;  %v11084_v24 = vld [vmem:[#allocation165_spill] sm:$0xff] }
 0x77f   : > { %v4779_v23 = vpop.permute.xlu0 %4778  ;;  %v4875_v3 = vmul.f32 %v4781_v47, %v4747_v49  ;;  %v4750_v47 = vsub.f32 1.0, %v11084_v24  ;;  %v11086_v49 = vld [vmem:[#allocation66_spill] sm:$0xff] }
 0x780   : > { %4992 = vrot.lane.b32.xlu1 %v5970_v48, %s6049_s13  ;;  %v4874_v20 = vmul.f32 %v4779_v23, %v4746_v51 }
 0x781   : > { %4990 = vrot.lane.b32.xlu0 %v5972_v4, %s6049_s13 }
 0x782   : > { %v4785_v44 = vpop.permute.xlu1 %4784 }
 0x783   : > { %v4783_v2 = vpop.permute.xlu0 %4782  ;;  %v4877_v13 = vmul.f32 %v4785_v44, %v4749_v31  ;;  %v11088_v31 = vld [vmem:[#allocation142_spill] sm:$0xff] }
 0x784   : > { %4996 = vrot.lane.b32.xlu1 %v5974_v7, %s6049_s13  ;;  %v4876_v16 = vmul.f32 %v4783_v2, %v4748_v27 }
 0x785   : > { %4994 = vrot.lane.b32.xlu0 %v5976_v59, %s6049_s13 }
 0x786   : > { %v4789_v53 = vpop.permute.xlu1 %4788 }
 0x787   : > { %v5978_v42 = vpop.eup %5977  ;;  %v4787_v10 = vpop.permute.xlu0 %4786  ;;  %v4879_v4 = vmul.f32 %v4789_v53, %v4751_v39 }
 0x788   : > { %v5980_v21 = vpop.eup %5979  ;;  %5000 = vrot.lane.b32.xlu1 %v5978_v42, %s6049_s13  ;;  %v4878_v2 = vmul.f32 %v4787_v10, %v4750_v47  ;;  %v11085_v42 = vld [vmem:[#allocation18_spill] sm:$0xff] }
 0x789   : > { %4998 = vrot.lane.b32.xlu0 %v5980_v21, %s6049_s13  ;;  %v4753_v21 = vsub.f32 1.0, %v11085_v42 }
 0x78a   : > { %v9912_v61 = vpop.permute.xlu1 %4792 }
 0x78b   : > { %v9914_v30 = vpop.permute.xlu0 %4790  ;;  %v4881_v53 = vmul.f32 %v9912_v61, %v4753_v21 }
 0x78e   : > { %v9916_v57 = vpop.permute.xlu1 %4796 }
 0x78f   : > { %v9918_v36 = vpop.permute.xlu0 %4794 }
 0x792   : > { %v9920_v18 = vpop.permute.xlu1 %4800 }
 0x793   : > { %v9922_v17 = vpop.permute.xlu0 %4798 }
 0x796   : > { %v9924_v58 = vpop.permute.xlu1 %4804 }
 0x797   : > { %v9926_v5 = vpop.permute.xlu0 %4802 }
 0x79a   : > { %v9928_v50 = vpop.permute.xlu1 %4808 }
 0x79b   : > { %v9930_v62 = vpop.permute.xlu0 %4806 }
 0x79e   : > { %v9932_v11 = vpop.permute.xlu1 %4812 }
 0x79f   : > { %v9934_v34 = vpop.permute.xlu0 %4810 }
 0x7a2   : > { %v9936_v28 = vpop.permute.xlu1 %4816 }
 0x7a3   : > { %v9938_v15 = vpop.permute.xlu0 %4814 }
 0x7a6   : > { %v9940_v33 = vpop.permute.xlu1 %4820 }
 0x7a7   : > { %v9942_v55 = vpop.permute.xlu0 %4818 }
 0x7aa   : > { %v9944_v41 = vpop.permute.xlu1 %4824 }
 0x7ab   : > { %v9946_v22 = vpop.permute.xlu0 %4822 }
 0x7ae   : > { %v9948_v52 = vpop.permute.xlu1 %4828 }
 0x7af   : > { %v9950_v9 = vpop.permute.xlu0 %4826 }
 0x7b2   : > { %v9952_v6 = vpop.permute.xlu1 %4832 }
 0x7b3   : > { %v9954_v43 = vpop.permute.xlu0 %4830 }
 0x7b6   : > { %v9956_v1 = vpop.permute.xlu1 %4836 }
 0x7b7   : > { %v9958_v35 = vpop.permute.xlu0 %4834 }
 0x7ba   : > { %v9960_v12 = vpop.permute.xlu1 %4840 }
 0x7bb   : > { %v9962_v8 = vpop.permute.xlu0 %4838 }
 0x7be   : > { %v4941_v19 = vpop.permute.xlu1 %4940 }
 0x7bf   : > { %v5035_v54 = vmul.f32 %v11079_v25, %v4941_v19  ;;  %v4939_v37 = vpop.permute.xlu0 %4938 }
 0x7c0   : > { %v5034_v46 = vmul.f32 %v11080_v60, %v4939_v37  ;;  %v4752_v60 = vsub.f32 1.0, %v11086_v49 }
 0x7c1   : > { %v5067_v45 = vadd.f32 %v5035_v54, %v4875_v3 }
 0x7c2   : > { %v5066_v32 = vadd.f32 %v5034_v46, %v4874_v20  ;;  %v4945_v38 = vpop.permute.xlu1 %4944  ;;  %v4880_v54 = vmul.f32 %v9914_v30, %v4752_v60  ;;  %v11087_v20 = vld [vmem:[#allocation77_spill] sm:$0xff]  ;;  %v11093_v60 = vld [vmem:[#allocation79_spill] sm:$0xff] }
 0x7c3   : > { %5099 = vst.msk [vmem:[%s9971_s18 + $0x8] sm:$0xff] %vm2443_vm12, %v5067_v45  ;;  %v5037_v26 = vmul.f32 %v11081_v29, %v4945_v38  ;;  %v4943_v40 = vpop.permute.xlu0 %4942  ;;  %v4755_v46 = vsub.f32 1.0, %v11087_v20  ;;  %v4754_v45 = vsub.f32 1.0, %v11088_v31 }
 0x7c4   : > { %5098 = vst.msk [vmem:[%s9971_s18] sm:$0xff] %vm2443_vm12, %v5066_v32  ;;  %v5036_v56 = vmul.f32 %v11082_v0, %v4943_v40 }
 0x7c5   : > { %v5069_v14 = vadd.f32 %v5037_v26, %v4877_v13  ;;  %v4883_v27 = vmul.f32 %v9916_v57, %v4755_v46  ;;  %v4882_v38 = vmul.f32 %v9918_v36, %v4754_v45  ;;  %v11089_v26 = vld [vmem:[#allocation101_spill] sm:$0xff] }
 0x7c6   : > { %v5068_v48 = vadd.f32 %v5036_v56, %v4876_v16  ;;  %v4949_v23 = vpop.permute.xlu1 %4948  ;;  %v4757_v40 = vsub.f32 1.0, %v11089_v26  ;;  %v11090_v56 = vld [vmem:[#allocation168_spill] sm:$0xff] }
 0x7c7   : > { %5101 = vst.msk [vmem:[%s9971_s18 + $0x18] sm:$0xff] %vm2443_vm12, %v5069_v14  ;;  %v5039_v44 = vmul.f32 %v11083_v63, %v4949_v23  ;;  %v4947_v7 = vpop.permute.xlu0 %4946  ;;  %v4756_v63 = vsub.f32 1.0, %v11090_v56  ;;  %v11091_v23 = vld [vmem:[#allocation21_spill] sm:$0xff] }
 0x7c8   : > { %5100 = vst.msk [vmem:[%s9971_s18 + $0x10] sm:$0xff] %vm2443_vm12, %v5068_v48  ;;  %v5038_v59 = vmul.f32 %v11084_v24, %v4947_v7  ;;  %v4885_v14 = vmul.f32 %v9920_v18, %v4757_v40  ;;  %v11092_v7 = vld [vmem:[#allocation47_spill] sm:$0xff] }
 0x7c9   : > { %v5071_v25 = vadd.f32 %v5039_v44, %v4879_v4  ;;  %v4884_v47 = vmul.f32 %v9922_v17, %v4756_v63  ;;  %v4759_v4 = vsub.f32 1.0, %v11091_v23 }
 0x7ca   : > { %v5070_v51 = vadd.f32 %v5038_v59, %v4878_v2  ;;  %v4953_v19 = vpop.permute.xlu1 %4952  ;;  %v4758_v2 = vsub.f32 1.0, %v11092_v7 }
 0x7cb   : > { %5103 = vst.msk [vmem:[%s9971_s18 + $0x28] sm:$0xff] %vm2443_vm12, %v5071_v25  ;;  %v5041_v3 = vmul.f32 %v11085_v42, %v4953_v19  ;;  %v4951_v10 = vpop.permute.xlu0 %4950  ;;  %v4887_v42 = vmul.f32 %v9924_v58, %v4759_v4  ;;  %v11100_v4 = vld [vmem:[#allocation48_spill] sm:$0xff] }
 0x7cc   : > { %5102 = vst.msk [vmem:[%s9971_s18 + $0x20] sm:$0xff] %vm2443_vm12, %v5070_v51  ;;  %v5040_v37 = vmul.f32 %v11086_v49, %v4951_v10  ;;  %v4886_v25 = vmul.f32 %v9926_v5, %v4758_v2  ;;  %v4761_v51 = vsub.f32 1.0, %v11093_v60 }
 0x7cd   : > { %v5073_v29 = vadd.f32 %v5041_v3, %v4881_v53  ;;  %v11094_v53 = vld [vmem:[#allocation143_spill] sm:$0xff] }
 0x7ce   : > { %v5072_v0 = vadd.f32 %v5040_v37, %v4880_v54  ;;  %v4957_v61 = vpop.permute.xlu1 %4956  ;;  %v4760_v3 = vsub.f32 1.0, %v11094_v53  ;;  %v4889_v54 = vmul.f32 %v9928_v50, %v4761_v51 }
 0x7cf   : > { %5105 = vst.msk [vmem:[%s9971_s18 + $0x38] sm:$0xff] %vm2443_vm12, %v5073_v29  ;;  %v5043_v32 = vmul.f32 %v11087_v20, %v4957_v61  ;;  %v4955_v30 = vpop.permute.xlu0 %4954  ;;  %v11095_v29 = vld [vmem:[#allocation103_spill] sm:$0xff] }
 0x7d0   : > { %5104 = vst.msk [vmem:[%s9971_s18 + $0x30] sm:$0xff] %vm2443_vm12, %v5072_v0  ;;  %v5042_v13 = vmul.f32 %v11088_v31, %v4955_v30  ;;  %v4888_v20 = vmul.f32 %v9930_v62, %v4760_v3  ;;  %v4763_v31 = vsub.f32 1.0, %v11095_v29  ;;  %v11096_v0 = vld [vmem:[#allocation169_spill] sm:$0xff] }
 0x7d1   : > { %v5075_v16 = vadd.f32 %v5043_v32, %v4883_v27  ;;  %v4762_v61 = vsub.f32 1.0, %v11096_v0 }
 0x7d2   : > { %v5074_v39 = vadd.f32 %v5042_v13, %v4882_v38  ;;  %v4961_v57 = vpop.permute.xlu1 %4960  ;;  %v4891_v32 = vmul.f32 %v9932_v11, %v4763_v31 }
 0x7d3   : > { %5107 = vst.msk [vmem:[%s9971_s18 + $0x48] sm:$0xff] %vm2443_vm12, %v5075_v16  ;;  %v5045_v24 = vmul.f32 %v11089_v26, %v4961_v57  ;;  %v4959_v36 = vpop.permute.xlu0 %4958  ;;  %v4890_v38 = vmul.f32 %v9934_v34, %v4762_v61  ;;  %v11097_v26 = vld [vmem:[#allocation170_spill] sm:$0xff]  ;;  %v11105_v61 = vld [vmem:[#allocation145_spill] sm:$0xff] }
 0x7d4   : > { %5106 = vst.msk [vmem:[%s9971_s18 + $0x40] sm:$0xff] %vm2443_vm12, %v5074_v39  ;;  %v5044_v48 = vmul.f32 %v11090_v56, %v4959_v36  ;;  %v4765_v40 = vsub.f32 1.0, %v11097_v26  ;;  %v11098_v56 = vld [vmem:[#allocation25_spill] sm:$0xff] }
 0x7d5   : > { %v5077_v44 = vadd.f32 %v5045_v24, %v4885_v14  ;;  %v4764_v63 = vsub.f32 1.0, %v11098_v56 }
 0x7d6   : > { %v5076_v59 = vadd.f32 %v5044_v48, %v4884_v47  ;;  %v4965_v18 = vpop.permute.xlu1 %4964  ;;  %v4893_v57 = vmul.f32 %v9936_v28, %v4765_v40  ;;  %v11099_v47 = vld [vmem:[#allocation26_spill] sm:$0xff] }
 0x7d7   : > { %5109 = vst.msk [vmem:[%s9971_s18 + $0x58] sm:$0xff] %vm2443_vm12, %v5077_v44  ;;  %v5047_v21 = vmul.f32 %v11091_v23, %v4965_v18  ;;  %v4963_v17 = vpop.permute.xlu0 %4962  ;;  %v4892_v24 = vmul.f32 %v9938_v15, %v4764_v63  ;;  %v4767_v48 = vsub.f32 1.0, %v11099_v47  ;;  %v4766_v44 = vsub.f32 1.0, %v11100_v4 }
 0x7d8   : > { %5108 = vst.msk [vmem:[%s9971_s18 + $0x50] sm:$0xff] %vm2443_vm12, %v5076_v59  ;;  %v5046_v49 = vmul.f32 %v11092_v7, %v4963_v17 }
 0x7d9   : > { %v5079_v19 = vadd.f32 %v5047_v21, %v4887_v42  ;;  %v4895_v2 = vmul.f32 %v9940_v33, %v4767_v48  ;;  %v4894_v18 = vmul.f32 %v9942_v55, %v4766_v44  ;;  %v11101_v21 = vld [vmem:[#allocation121_spill] sm:$0xff] }
 0x7da   : > { %v5078_v10 = vadd.f32 %v5046_v49, %v4886_v25  ;;  %v4969_v58 = vpop.permute.xlu1 %4968  ;;  %v4769_v17 = vsub.f32 1.0, %v11101_v21  ;;  %v11102_v49 = vld [vmem:[#allocation122_spill] sm:$0xff] }
 0x7db   : > { %5111 = vst.msk [vmem:[%s9971_s18 + $0x68] sm:$0xff] %vm2443_vm12, %v5079_v19  ;;  %v5049_v37 = vmul.f32 %v11093_v60, %v4969_v58  ;;  %v4967_v5 = vpop.permute.xlu0 %4966  ;;  %v4768_v60 = vsub.f32 1.0, %v11102_v49  ;;  %v11103_v58 = vld [vmem:[#allocation81_spill] sm:$0xff] }
 0x7dc   : > { %5110 = vst.msk [vmem:[%s9971_s18 + $0x60] sm:$0xff] %vm2443_vm12, %v5078_v10  ;;  %v5048_v46 = vmul.f32 %v11094_v53, %v4967_v5  ;;  %v4897_v19 = vmul.f32 %v9944_v41, %v4769_v17  ;;  %v11104_v5 = vld [vmem:[#allocation82_spill] sm:$0xff] }
 0x7dd   : > { %v5081_v45 = vadd.f32 %v5049_v37, %v4889_v54  ;;  %v4896_v3 = vmul.f32 %v9946_v22, %v4768_v60  ;;  %v4771_v54 = vsub.f32 1.0, %v11103_v58 }
 0x7de   : > { %v5080_v27 = vadd.f32 %v5048_v46, %v4888_v20  ;;  %v4973_v50 = vpop.permute.xlu1 %4972  ;;  %v4770_v20 = vsub.f32 1.0, %v11104_v5 }
 0x7df   : > { %5113 = vst.msk [vmem:[%s9971_s18 + $0x78] sm:$0xff] %vm2443_vm12, %v5081_v45  ;;  %v5051_v30 = vmul.f32 %v11095_v29, %v4973_v50  ;;  %v4971_v62 = vpop.permute.xlu0 %4970  ;;  %v4899_v29 = vmul.f32 %v9948_v52, %v4771_v54 }
 0x7e0   : > { %5112 = vst.msk [vmem:[%s9971_s18 + $0x70] sm:$0xff] %vm2443_vm12, %v5080_v27  ;;  %v5050_v13 = vmul.f32 %v11096_v0, %v4971_v62  ;;  %v4898_v45 = vmul.f32 %v9950_v9, %v4770_v20  ;;  %v4773_v27 = vsub.f32 1.0, %v11105_v61 }
 0x7e1   : > { %v5083_v16 = vadd.f32 %v5051_v30, %v4891_v32  ;;  %v11106_v32 = vld [vmem:[#allocation146_spill] sm:$0xff] }
 0x7e2   : > { %v5082_v39 = vadd.f32 %v5050_v13, %v4890_v38  ;;  %v4977_v11 = vpop.permute.xlu1 %4976  ;;  %v4772_v30 = vsub.f32 1.0, %v11106_v32  ;;  %v4901_v38 = vmul.f32 %v9952_v6, %v4773_v27 }
 0x7e3   : > { %5115 = vst.msk [vmem:[%s9971_s18 + $0x88] sm:$0xff] %vm2443_vm12, %v5083_v16  ;;  %v5053_v14 = vmul.f32 %v11097_v26, %v4977_v11  ;;  %v4975_v34 = vpop.permute.xlu0 %4974  ;;  %v11107_v16 = vld [vmem:[#allocation105_spill] sm:$0xff] }
 0x7e4   : > { %5114 = vst.msk [vmem:[%s9971_s18 + $0x80] sm:$0xff] %vm2443_vm12, %v5082_v39  ;;  %v5052_v36 = vmul.f32 %v11098_v56, %v4975_v34  ;;  %v4900_v26 = vmul.f32 %v9954_v43, %v4772_v30  ;;  %v4775_v56 = vsub.f32 1.0, %v11107_v16  ;;  %v11108_v39 = vld [vmem:[#allocation106_spill] sm:$0xff] }
 0x7e5   : > { %v5085_v23 = vadd.f32 %v5053_v14, %v4893_v57  ;;  %v4774_v11 = vsub.f32 1.0, %v11108_v39 }
 0x7e6   : > { %v5084_v7 = vadd.f32 %v5052_v36, %v4892_v24  ;;  %v4981_v28 = vpop.permute.xlu1 %4980  ;;  %v4903_v14 = vmul.f32 %v9956_v1, %v4775_v56 }
 0x7e7   : > { %5117 = vst.msk [vmem:[%s9971_s18 + $0x98] sm:$0xff] %vm2443_vm12, %v5085_v23  ;;  %v5055_v59 = vmul.f32 %v11099_v47, %v4981_v28  ;;  %v4979_v15 = vpop.permute.xlu0 %4978  ;;  %v4902_v24 = vmul.f32 %v9958_v35, %v4774_v11  ;;  %v11109_v47 = vld [vmem:[#allocation171_spill] sm:$0xff] }
 0x7e8   : > { %5116 = vst.msk [vmem:[%s9971_s18 + $0x90] sm:$0xff] %vm2443_vm12, %v5084_v7  ;;  %v5054_v42 = vmul.f32 %v11100_v4, %v4979_v15  ;;  %v4777_v48 = vsub.f32 1.0, %v11109_v47  ;;  %v11110_v4 = vld [vmem:[#allocation172_spill] sm:$0xff] }
 0x7e9   : > { %v5087_v25 = vadd.f32 %v5055_v59, %v4895_v2  ;;  %v4776_v44 = vsub.f32 1.0, %v11110_v4 }
 0x7ea   : > { %v5086_v51 = vadd.f32 %v5054_v42, %v4894_v18  ;;  %v4985_v33 = vpop.permute.xlu1 %4984  ;;  %v4905_v28 = vmul.f32 %v9960_v12, %v4777_v48 }
 0x7eb   : > { %5119 = vst.msk [vmem:[%s9971_s18 + $0xa8] sm:$0xff] %vm2443_vm12, %v5087_v25  ;;  %v5057_v53 = vmul.f32 %v11101_v21, %v4985_v33  ;;  %v4983_v55 = vpop.permute.xlu0 %4982  ;;  %v4904_v59 = vmul.f32 %v9962_v8, %v4776_v44 }
 0x7ec   : > { %5118 = vst.msk [vmem:[%s9971_s18 + $0xa0] sm:$0xff] %vm2443_vm12, %v5086_v51  ;;  %v5056_v10 = vmul.f32 %v11102_v49, %v4983_v55 }
 0x7ed   : > { %v5089_v37 = vadd.f32 %v5057_v53, %v4897_v19 }
 0x7ee   : > { %v5088_v46 = vadd.f32 %v5056_v10, %v4896_v3  ;;  %v4989_v41 = vpop.permute.xlu1 %4988 }
 0x7ef   : > { %5121 = vst.msk [vmem:[%s9971_s18 + $0xb8] sm:$0xff] %vm2443_vm12, %v5089_v37  ;;  %v5059_v31 = vmul.f32 %v11103_v58, %v4989_v41  ;;  %v4987_v22 = vpop.permute.xlu0 %4986 }
 0x7f0   : > { %5120 = vst.msk [vmem:[%s9971_s18 + $0xb0] sm:$0xff] %vm2443_vm12, %v5088_v46  ;;  %v5058_v0 = vmul.f32 %v11104_v5, %v4987_v22 }
 0x7f1   : > { %v5091_v50 = vadd.f32 %v5059_v31, %v4899_v29 }
 0x7f2   : > { %v5090_v62 = vadd.f32 %v5058_v0, %v4898_v45  ;;  %v4993_v52 = vpop.permute.xlu1 %4992 }
 0x7f3   : > { %5123 = vst.msk [vmem:[%s9971_s18 + $0xc8] sm:$0xff] %vm2443_vm12, %v5091_v50  ;;  %v5061_v13 = vmul.f32 %v11105_v61, %v4993_v52  ;;  %v4991_v9 = vpop.permute.xlu0 %4990 }
 0x7f4   : > { %5122 = vst.msk [vmem:[%s9971_s18 + $0xc0] sm:$0xff] %vm2443_vm12, %v5090_v62  ;;  %v5060_v40 = vmul.f32 %v11106_v32, %v4991_v9 }
 0x7f5   : > { %v5093_v63 = vadd.f32 %v5061_v13, %v4901_v38 }
 0x7f6   : > { %v5092_v57 = vadd.f32 %v5060_v40, %v4900_v26  ;;  %v4997_v6 = vpop.permute.xlu1 %4996 }
 0x7f7   : > { %5125 = vst.msk [vmem:[%s9971_s18 + $0xd8] sm:$0xff] %vm2443_vm12, %v5093_v63  ;;  %v5063_v34 = vmul.f32 %v11107_v16, %v4997_v6  ;;  %v4995_v43 = vpop.permute.xlu0 %4994 }
 0x7f8   : > { %5124 = vst.msk [vmem:[%s9971_s18 + $0xd0] sm:$0xff] %vm2443_vm12, %v5092_v57  ;;  %v5062_v36 = vmul.f32 %v11108_v39, %v4995_v43 }
 0x7f9   : > { %v5095_v23 = vadd.f32 %v5063_v34, %v4903_v14 }
 0x7fa   : > { %v5094_v1 = vadd.f32 %v5062_v36, %v4902_v24  ;;  %v5001_v7 = vpop.permute.xlu1 %5000 }
 0x7fb   : > { %5127 = vst.msk [vmem:[%s9971_s18 + $0xe8] sm:$0xff] %vm2443_vm12, %v5095_v23  ;;  %v5065_v2 = vmul.f32 %v11109_v47, %v5001_v7  ;;  %v4999_v35 = vpop.permute.xlu0 %4998 }
 0x7fc   : > { %5126 = vst.msk [vmem:[%s9971_s18 + $0xe0] sm:$0xff] %vm2443_vm12, %v5094_v1  ;;  %v5064_v15 = vmul.f32 %v11110_v4, %v4999_v35 }
 0x7fd   : > { %v5097_v18 = vadd.f32 %v5065_v2, %v4905_v28 }
 0x7fe   : > { %v5096_v42 = vadd.f32 %v5064_v15, %v4904_v59 }
 0x7ff   : > { %5129 = vst.msk [vmem:[%s9971_s18 + $0xf8] sm:$0xff] %vm2443_vm12, %v5097_v18 }
 0x800   : > { %5128 = vst.msk [vmem:[%s9971_s18 + $0xf0] sm:$0xff] %vm2443_vm12, %v5096_v42 }
 0x801 PF: > { %s14_s15 = sadd.s32 1, %s6029_s15  }
 0x802   : > { %p11_p4 = scmp.ge.s32.totalorder %s14_s15, 4  }
 0x804   :  { %13 = sbr.rel (!%p11_p4) target bundleno = 1 (0x1), region = 71 }

</bundles_post_ra>
